<compile_context>
chip_gen: v6e
topology: v6e:2x2x1
jax: 0.10.0
libtpu: 0.0.40
codegen_flags: <defaults>
</compile_context>

<pallas_src>
import numpy as np
import jax
import jax.numpy as jnp
from jax.experimental import pallas as pl
from jax.experimental.pallas import tpu as pltpu

EPS = 1e-5
LANE = 128


def _round_up(v, m):
    return (v + m - 1) // m * m


def _pick_batch_tile(N, H, W):
    """Smallest divisor of N whose per-tile matmul M = nb*H*W reaches 256."""
    for nb in range(1, N + 1):
        if N % nb == 0 and nb * H * W >= 256:
            return nb
    return N


def _vmem_limit_bytes():
    """Per-generation VMEM budget: ~3/4 of physical capacity, with headroom."""
    try:
        cap = pltpu.get_tpu_info().vmem_capacity_bytes
        return int(min(cap * 3 // 4, 96 * 1024 * 1024))
    except Exception:
        return 32 * 1024 * 1024


# ---------------------------------------------------------------------------
# In-kernel helpers
# ---------------------------------------------------------------------------
def _conv3x3_taps(xpad_ref, w_ref, NB, H, W, Cp):
    """3x3 conv of the zero-haloed padded tile: nine accumulated
    (M, Cp) x (Cp, Cp) bf16 matmuls, f32 accumulation on the MXU."""
    M = NB * H * W
    acc = jnp.zeros((M, Cp), jnp.float32)
    for t in range(9):
        dy, dx = t // 3, t % 3
        lhs = xpad_ref[:, dy:dy + H, dx:dx + W, :].reshape(M, Cp)
        acc = acc + jnp.dot(lhs, w_ref[t], preferred_element_type=jnp.float32)
    return acc


def _emit_stats(acc, s_ref, q_ref):
    """Per-tile partial BN statistics (sum, sum of squares), f32."""
    s_ref[...] = jnp.sum(acc, axis=0, keepdims=True)[None]
    q_ref[...] = jnp.sum(acc * acc, axis=0, keepdims=True)[None]


# ---------------------------------------------------------------------------
# Kernels
# ---------------------------------------------------------------------------
def conv1_stats_kernel(x_ref, w_ref, h1_ref, s_ref, q_ref, xpad_ref):
    # x_ref:   (NB, H, W, Cp) f32     input tile (channel-padded)
    # w_ref:   (9, Cp, Cp)    bf16    tap-major conv1 weights, VMEM-resident
    # h1_ref:  (NB, H, W, Cp) bf16    raw conv1 output (unnormalized)
    # s_ref/q_ref: (1, 1, Cp) f32     per-tile sum / sum-of-squares
    # xpad_ref:(NB, H+2, W+2, Cp) bf16 scratch (spatially padded activations)
    NB, H, W, Cp = x_ref.shape
    xpad_ref[...] = jnp.zeros_like(xpad_ref)          # one full unmasked fill
    xpad_ref[:, 1:H + 1, 1:W + 1, :] = x_ref[...].astype(jnp.bfloat16)
    acc = _conv3x3_taps(xpad_ref, w_ref, NB, H, W, Cp)
    h1_ref[...] = acc.reshape(NB, H, W, Cp).astype(jnp.bfloat16)
    _emit_stats(acc, s_ref, q_ref)


def conv2_stats_kernel(h1_ref, sc_ref, sh_ref, w_ref,
                       h2_ref, s_ref, q_ref, xpad_ref):
    # BN1 (folded scale/shift) + ReLU + conv2 (raw) + BN2 partial statistics.
    NB, H, W, Cp = h1_ref.shape
    xpad_ref[...] = jnp.zeros_like(xpad_ref)
    a1 = jnp.maximum(
        h1_ref[...].astype(jnp.float32) * sc_ref[...].reshape(1, 1, 1, Cp)
        + sh_ref[...].reshape(1, 1, 1, Cp), 0.0)      # f32 element-wise math
    xpad_ref[:, 1:H + 1, 1:W + 1, :] = a1.astype(jnp.bfloat16)
    acc = _conv3x3_taps(xpad_ref, w_ref, NB, H, W, Cp)
    h2_ref[...] = acc.reshape(NB, H, W, Cp)
    _emit_stats(acc, s_ref, q_ref)


def bn_add_relu_kernel(h2_ref, x_ref, sc_ref, sh_ref, out_ref):
    # BN2 (folded scale/shift) + residual add + ReLU; lane-dense store.
    _, _, _, Cp = x_ref.shape
    out_ref[...] = jnp.maximum(
        h2_ref[...] * sc_ref[...].reshape(1, 1, 1, Cp)
        + sh_ref[...].reshape(1, 1, 1, Cp) + x_ref[...], 0.0)


# ---------------------------------------------------------------------------
# Wrapper
# ---------------------------------------------------------------------------
def _fold_bn(s, q, gamma, beta, count):
    """Fold global batch stats into a per-channel scale/shift (pure JAX, tiny)."""
    mean = jnp.sum(s, axis=0) / count                 # (1, Cp)
    ex2 = jnp.sum(q, axis=0) / count
    var = jnp.maximum(ex2 - mean * mean, 0.0)         # clamp cancellation
    scale = gamma * jax.lax.rsqrt(var + EPS)          # EUP rsqrt
    shift = beta - mean * scale
    return scale, shift


def residual_block_pallas(x_nchw, w1, w2, g1, b1, g2, b2):
    """x_nchw: (N, C, H, W) f32; w1/w2: (3,3,C,C) HWIO; g/b: (C,). -> (N,C,H,W)."""
    N, C, H, W = x_nchw.shape
    Cp = _round_up(C, LANE)
    NB = _pick_batch_tile(N, H, W)
    T = N // NB
    R = N * H * W                                     # pixels per channel (BN)

    # NCHW -> NHWC, channels padded to the lane width.
    # TODO(synk): accept channel-padded NHWC activations directly to skip this
    # extra HBM round trip of x outside the kernels.
    x = jnp.transpose(x_nchw, (0, 2, 3, 1)).astype(jnp.float32)
    x = jnp.pad(x, ((0, 0), (0, 0), (0, 0), (0, Cp - C)))

    def pack_w(w):   # HWIO (3,3,C,C) -> (9, Cp, Cp) bf16, tap-major
        wp = jnp.zeros((3, 3, Cp, Cp), jnp.float32).at[:, :, :C, :C].set(w)
        return wp.reshape(9, Cp, Cp).astype(jnp.bfloat16)

    def pack_vec(v, fill):
        return jnp.full((Cp,), fill, jnp.float32).at[:C].set(v).reshape(1, Cp)

    w1p, w2p = pack_w(w1), pack_w(w2)
    g1p, b1p = pack_vec(g1, 1.0), pack_vec(b1, 0.0)
    g2p, b2p = pack_vec(g2, 1.0), pack_vec(b2, 0.0)

    cparams = pltpu.CompilerParams(
        dimension_semantics=("parallel",),            # megacore-shardable
        vmem_limit_bytes=_vmem_limit_bytes())

    tile_spec = pl.BlockSpec((NB, H, W, Cp), lambda i: (i, 0, 0, 0))
    w_spec = pl.BlockSpec((9, Cp, Cp), lambda i: (0, 0, 0))       # resident
    vec_spec = pl.BlockSpec((1, Cp), lambda i: (0, 0))            # resident
    stat_spec = pl.BlockSpec((1, 1, Cp), lambda i: (i, 0, 0))     # per-tile
    xpad_scr = pltpu.VMEM((NB, H + 2, W + 2, Cp), jnp.bfloat16)
    stat_shape = jax.ShapeDtypeStruct((T, 1, Cp), jnp.float32)

    # Pass 1: conv1 (raw) + per-tile BN1 statistics.
    h1, s1, q1 = pl.pallas_call(
        conv1_stats_kernel,
        grid_spec=pltpu.PrefetchScalarGridSpec(
            num_scalar_prefetch=0, grid=(T,),
            in_specs=[tile_spec, w_spec],
            out_specs=(tile_spec, stat_spec, stat_spec),
            scratch_shapes=[xpad_scr]),
        out_shape=(jax.ShapeDtypeStruct((N, H, W, Cp), jnp.bfloat16),
                   stat_shape, stat_shape),
        compiler_params=cparams,
    )(x, w1p)

    scale1, shift1 = _fold_bn(s1, q1, g1p, b1p, R)

    # Pass 2: BN1 + ReLU + conv2 (raw) + per-tile BN2 statistics.
    h2, s2, q2 = pl.pallas_call(
        conv2_stats_kernel,
        grid_spec=pltpu.PrefetchScalarGridSpec(
            num_scalar_prefetch=0, grid=(T,),
            in_specs=[tile_spec, vec_spec, vec_spec, w_spec],
            out_specs=(tile_spec, stat_spec, stat_spec),
            scratch_shapes=[xpad_scr]),
        out_shape=(jax.ShapeDtypeStruct((N, H, W, Cp), jnp.float32),
                   stat_shape, stat_shape),
        compiler_params=cparams,
    )(h1, scale1, shift1, w2p)

    scale2, shift2 = _fold_bn(s2, q2, g2p, b2p, R)

    # Pass 3: BN2 + residual add + ReLU.
    out = pl.pallas_call(
        bn_add_relu_kernel,
        grid_spec=pltpu.PrefetchScalarGridSpec(
            num_scalar_prefetch=0, grid=(T,),
            in_specs=[tile_spec, tile_spec, vec_spec, vec_spec],
            out_specs=tile_spec),
        out_shape=jax.ShapeDtypeStruct((N, H, W, Cp), jnp.float32),
        compiler_params=cparams,
    )(h2, x, scale2, shift2)

    # Drop channel padding, back to NCHW.
    return jnp.transpose(out[..., :C], (0, 3, 1, 2))


# ---------------------------------------------------------------------------
# Pure-JAX reference (same semantics as the PyTorch module in train mode)
# ---------------------------------------------------------------------------
def residual_block_ref(x_nchw, w1, w2, g1, b1, g2, b2):
    x = jnp.transpose(x_nchw, (0, 2, 3, 1))  # NHWC

    def conv(h, w):
        return jax.lax.conv_general_dilated(
            h, w, window_strides=(1, 1), padding="SAME",
            dimension_numbers=("NHWC", "HWIO", "NHWC"))

    def bn(h, g, b):
        mean = jnp.mean(h, axis=(0, 1, 2), keepdims=True)
        var = jnp.mean((h - mean) ** 2, axis=(0, 1, 2), keepdims=True)
        return (h - mean) * jax.lax.rsqrt(var + EPS) * g.reshape(1, 1, 1, -1) \
            + b.reshape(1, 1, 1, -1)

    h = jnp.maximum(bn(conv(x, w1), g1, b1), 0.0)
    h = bn(conv(h, w2), g2, b2)
    out = jnp.maximum(h + x, 0.0)
    return jnp.transpose(out, (0, 3, 1, 2))


if __name__ == "__main__":
    N, C, H, W = 2, 4, 16, 16
    key = jax.random.PRNGKey(0)
    kx, kw1, kw2, kg1, kb1, kg2, kb2 = jax.random.split(key, 7)

    x = jax.random.normal(kx, (N, C, H, W), jnp.float32)
    # conv weights in HWIO layout: (3, 3, Cin, Cout), no bias
    w1 = 0.1 * jax.random.normal(kw1, (3, 3, C, C), jnp.float32)
    w2 = 0.1 * jax.random.normal(kw2, (3, 3, C, C), jnp.float32)
    # BN affine params (torch default gamma=1, beta=0; perturb for a stronger test)
    g1 = 1.0 + 0.1 * jax.random.normal(kg1, (C,), jnp.float32)
    b1 = 0.1 * jax.random.normal(kb1, (C,), jnp.float32)
    g2 = 1.0 + 0.1 * jax.random.normal(kg2, (C,), jnp.float32)
    b2 = 0.1 * jax.random.normal(kb2, (C,), jnp.float32)

    out = jax.block_until_ready(
        residual_block_pallas(x, w1, w2, g1, b1, g2, b2))
    ref = jax.block_until_ready(
        residual_block_ref(x, w1, w2, g1, b1, g2, b2))

    np.testing.assert_allclose(np.asarray(out), np.asarray(ref),
                               rtol=5e-2, atol=5e-2)
    print("KERNEL_OK")
</pallas_src>

<mosaic_0001>
module attributes {stable_mosaic.version = 11 : i64} {
  func.func @conv1_stats_kernel(%arg0: i32, %arg1: memref<1x16x16x128xf32, #tpu.memory_space<vmem>>, %arg2: memref<9x128x128xbf16, #tpu.memory_space<vmem>>, %arg3: memref<1x16x16x128xbf16, #tpu.memory_space<vmem>>, %arg4: memref<1x1x128xf32, #tpu.memory_space<vmem>>, %arg5: memref<1x1x128xf32, #tpu.memory_space<vmem>>, %arg6: memref<1x18x18x128xbf16, #tpu.memory_space<vmem>>) attributes {dimension_semantics = [#tpu.dimension_semantics<parallel>], iteration_bounds = array<i64: 2>, scalar_prefetch = 0 : i64, scratch_operands = 1 : i64, tpu.core_type = #tpu.core_type<tc>, window_params = [{transform_indices = @transform_0, window_bounds = array<i64: 1, 16, 16, 128>}, {pipeline_mode = #tpu.pipeline_mode<synchronous>, transform_indices = @transform_1, window_bounds = array<i64: 9, 128, 128>}, {transform_indices = @transform_2, window_bounds = array<i64: 1, 16, 16, 128>}, {transform_indices = @transform_3, window_bounds = array<i64: 1, 1, 128>}, {transform_indices = @transform_4, window_bounds = array<i64: 1, 1, 128>}]} {
    %cst = arith.constant 0.000000e+00 : bf16
    %0 = vector.broadcast %cst : bf16 to vector<1x18x18x128xbf16>
    %c0 = arith.constant 0 : index
    %c0_0 = arith.constant 0 : index
    %c0_1 = arith.constant 0 : index
    %c0_2 = arith.constant 0 : index
    %1 = vector.load %arg6[%c0, %c0_0, %c0_1, %c0_2] : memref<1x18x18x128xbf16, #tpu.memory_space<vmem>>, vector<1x18x18x128xbf16>
    tpu.vector_store %arg6[%c0, %c0_0, %c0_1, %c0_2], %0 {strides = array<i32>} : memref<1x18x18x128xbf16, #tpu.memory_space<vmem>>, vector<1x18x18x128xbf16>,
    %c0_3 = arith.constant 0 : index
    %c0_4 = arith.constant 0 : index
    %c0_5 = arith.constant 0 : index
    %c0_6 = arith.constant 0 : index
    %2 = vector.load %arg1[%c0_3, %c0_4, %c0_5, %c0_6] : memref<1x16x16x128xf32, #tpu.memory_space<vmem>>, vector<1x16x16x128xf32>
    %3 = arith.truncf %2 : vector<1x16x16x128xf32> to vector<1x16x16x128xbf16>
    %c0_7 = arith.constant 0 : index
    %c1 = arith.constant 1 : index
    %c1_8 = arith.constant 1 : index
    %c0_9 = arith.constant 0 : index
    %4 = vector.load %arg6[%c0_7, %c1, %c1_8, %c0_9] : memref<1x18x18x128xbf16, #tpu.memory_space<vmem>>, vector<1x16x16x128xbf16>
    tpu.vector_store %arg6[%c0_7, %c1, %c1_8, %c0_9], %3 {strides = array<i32>} : memref<1x18x18x128xbf16, #tpu.memory_space<vmem>>, vector<1x16x16x128xbf16>,
    %cst_10 = arith.constant 0.000000e+00 : f32
    %5 = vector.broadcast %cst_10 : f32 to vector<256x128xf32>
    %c0_11 = arith.constant 0 : index
    %c0_12 = arith.constant 0 : index
    %c0_13 = arith.constant 0 : index
    %c0_14 = arith.constant 0 : index
    %6 = vector.load %arg6[%c0_11, %c0_12, %c0_13, %c0_14] : memref<1x18x18x128xbf16, #tpu.memory_space<vmem>>, vector<1x16x16x128xbf16>
    %7 = vector.shape_cast %6 : vector<1x16x16x128xbf16> to vector<256x128xbf16>
    %c0_15 = arith.constant 0 : index
    %c0_16 = arith.constant 0 : index
    %c0_17 = arith.constant 0 : index
    %8 = vector.load %arg2[%c0_15, %c0_16, %c0_17] : memref<9x128x128xbf16, #tpu.memory_space<vmem>>, vector<1x128x128xbf16>
    %9 = vector.shape_cast %8 : vector<1x128x128xbf16> to vector<128x128xbf16>
    %cst_18 = arith.constant dense<0.000000e+00> : vector<256x128xf32>
    %10 = tpu.matmul %7, %9, %cst_18 {dimension_numbers = #tpu.dot_dimension_numbers<[1], [0], [0], [1], [0, 0, 1, 1], [], []>} : vector<256x128xbf16>, vector<128x128xbf16>, vector<256x128xf32> -> vector<256x128xf32>
    %11 = arith.addf %5, %10 : vector<256x128xf32>
    %c0_19 = arith.constant 0 : index
    %c0_20 = arith.constant 0 : index
    %c1_21 = arith.constant 1 : index
    %c0_22 = arith.constant 0 : index
    %12 = vector.load %arg6[%c0_19, %c0_20, %c1_21, %c0_22] : memref<1x18x18x128xbf16, #tpu.memory_space<vmem>>, vector<1x16x16x128xbf16>
    %13 = vector.shape_cast %12 : vector<1x16x16x128xbf16> to vector<256x128xbf16>
    %c1_23 = arith.constant 1 : index
    %c0_24 = arith.constant 0 : index
    %c0_25 = arith.constant 0 : index
    %14 = vector.load %arg2[%c1_23, %c0_24, %c0_25] : memref<9x128x128xbf16, #tpu.memory_space<vmem>>, vector<1x128x128xbf16>
    %15 = vector.shape_cast %14 : vector<1x128x128xbf16> to vector<128x128xbf16>
    %cst_26 = arith.constant dense<0.000000e+00> : vector<256x128xf32>
    %16 = tpu.matmul %13, %15, %cst_26 {dimension_numbers = #tpu.dot_dimension_numbers<[1], [0], [0], [1], [0, 0, 1, 1], [], []>} : vector<256x128xbf16>, vector<128x128xbf16>, vector<256x128xf32> -> vector<256x128xf32>
    %17 = arith.addf %11, %16 : vector<256x128xf32>
    %c0_27 = arith.constant 0 : index
    %c0_28 = arith.constant 0 : index
    %c2 = arith.constant 2 : index
    %c0_29 = arith.constant 0 : index
    %18 = vector.load %arg6[%c0_27, %c0_28, %c2, %c0_29] : memref<1x18x18x128xbf16, #tpu.memory_space<vmem>>, vector<1x16x16x128xbf16>
    %19 = vector.shape_cast %18 : vector<1x16x16x128xbf16> to vector<256x128xbf16>
    %c2_30 = arith.constant 2 : index
    %c0_31 = arith.constant 0 : index
    %c0_32 = arith.constant 0 : index
    %20 = vector.load %arg2[%c2_30, %c0_31, %c0_32] : memref<9x128x128xbf16, #tpu.memory_space<vmem>>, vector<1x128x128xbf16>
    %21 = vector.shape_cast %20 : vector<1x128x128xbf16> to vector<128x128xbf16>
    %cst_33 = arith.constant dense<0.000000e+00> : vector<256x128xf32>
    %22 = tpu.matmul %19, %21, %cst_33 {dimension_numbers = #tpu.dot_dimension_numbers<[1], [0], [0], [1], [0, 0, 1, 1], [], []>} : vector<256x128xbf16>, vector<128x128xbf16>, vector<256x128xf32> -> vector<256x128xf32>
    %23 = arith.addf %17, %22 : vector<256x128xf32>
    %c0_34 = arith.constant 0 : index
    %c1_35 = arith.constant 1 : index
    %c0_36 = arith.constant 0 : index
    %c0_37 = arith.constant 0 : index
    %24 = vector.load %arg6[%c0_34, %c1_35, %c0_36, %c0_37] : memref<1x18x18x128xbf16, #tpu.memory_space<vmem>>, vector<1x16x16x128xbf16>
    %25 = vector.shape_cast %24 : vector<1x16x16x128xbf16> to vector<256x128xbf16>
    %c3 = arith.constant 3 : index
    %c0_38 = arith.constant 0 : index
    %c0_39 = arith.constant 0 : index
    %26 = vector.load %arg2[%c3, %c0_38, %c0_39] : memref<9x128x128xbf16, #tpu.memory_space<vmem>>, vector<1x128x128xbf16>
    %27 = vector.shape_cast %26 : vector<1x128x128xbf16> to vector<128x128xbf16>
    %cst_40 = arith.constant dense<0.000000e+00> : vector<256x128xf32>
    %28 = tpu.matmul %25, %27, %cst_40 {dimension_numbers = #tpu.dot_dimension_numbers<[1], [0], [0], [1], [0, 0, 1, 1], [], []>} : vector<256x128xbf16>, vector<128x128xbf16>, vector<256x128xf32> -> vector<256x128xf32>
    %29 = arith.addf %23, %28 : vector<256x128xf32>
    %c0_41 = arith.constant 0 : index
    %c1_42 = arith.constant 1 : index
    %c1_43 = arith.constant 1 : index
    %c0_44 = arith.constant 0 : index
    %30 = vector.load %arg6[%c0_41, %c1_42, %c1_43, %c0_44] : memref<1x18x18x128xbf16, #tpu.memory_space<vmem>>, vector<1x16x16x128xbf16>
    %31 = vector.shape_cast %30 : vector<1x16x16x128xbf16> to vector<256x128xbf16>
    %c4 = arith.constant 4 : index
    %c0_45 = arith.constant 0 : index
    %c0_46 = arith.constant 0 : index
    %32 = vector.load %arg2[%c4, %c0_45, %c0_46] : memref<9x128x128xbf16, #tpu.memory_space<vmem>>, vector<1x128x128xbf16>
    %33 = vector.shape_cast %32 : vector<1x128x128xbf16> to vector<128x128xbf16>
    %cst_47 = arith.constant dense<0.000000e+00> : vector<256x128xf32>
    %34 = tpu.matmul %31, %33, %cst_47 {dimension_numbers = #tpu.dot_dimension_numbers<[1], [0], [0], [1], [0, 0, 1, 1], [], []>} : vector<256x128xbf16>, vector<128x128xbf16>, vector<256x128xf32> -> vector<256x128xf32>
    %35 = arith.addf %29, %34 : vector<256x128xf32>
    %c0_48 = arith.constant 0 : index
    %c1_49 = arith.constant 1 : index
    %c2_50 = arith.constant 2 : index
    %c0_51 = arith.constant 0 : index
    %36 = vector.load %arg6[%c0_48, %c1_49, %c2_50, %c0_51] : memref<1x18x18x128xbf16, #tpu.memory_space<vmem>>, vector<1x16x16x128xbf16>
    %37 = vector.shape_cast %36 : vector<1x16x16x128xbf16> to vector<256x128xbf16>
    %c5 = arith.constant 5 : index
    %c0_52 = arith.constant 0 : index
    %c0_53 = arith.constant 0 : index
    %38 = vector.load %arg2[%c5, %c0_52, %c0_53] : memref<9x128x128xbf16, #tpu.memory_space<vmem>>, vector<1x128x128xbf16>
    %39 = vector.shape_cast %38 : vector<1x128x128xbf16> to vector<128x128xbf16>
    %cst_54 = arith.constant dense<0.000000e+00> : vector<256x128xf32>
    %40 = tpu.matmul %37, %39, %cst_54 {dimension_numbers = #tpu.dot_dimension_numbers<[1], [0], [0], [1], [0, 0, 1, 1], [], []>} : vector<256x128xbf16>, vector<128x128xbf16>, vector<256x128xf32> -> vector<256x128xf32>
    %41 = arith.addf %35, %40 : vector<256x128xf32>
    %c0_55 = arith.constant 0 : index
    %c2_56 = arith.constant 2 : index
    %c0_57 = arith.constant 0 : index
    %c0_58 = arith.constant 0 : index
    %42 = vector.load %arg6[%c0_55, %c2_56, %c0_57, %c0_58] : memref<1x18x18x128xbf16, #tpu.memory_space<vmem>>, vector<1x16x16x128xbf16>
    %43 = vector.shape_cast %42 : vector<1x16x16x128xbf16> to vector<256x128xbf16>
    %c6 = arith.constant 6 : index
    %c0_59 = arith.constant 0 : index
    %c0_60 = arith.constant 0 : index
    %44 = vector.load %arg2[%c6, %c0_59, %c0_60] : memref<9x128x128xbf16, #tpu.memory_space<vmem>>, vector<1x128x128xbf16>
    %45 = vector.shape_cast %44 : vector<1x128x128xbf16> to vector<128x128xbf16>
    %cst_61 = arith.constant dense<0.000000e+00> : vector<256x128xf32>
    %46 = tpu.matmul %43, %45, %cst_61 {dimension_numbers = #tpu.dot_dimension_numbers<[1], [0], [0], [1], [0, 0, 1, 1], [], []>} : vector<256x128xbf16>, vector<128x128xbf16>, vector<256x128xf32> -> vector<256x128xf32>
    %47 = arith.addf %41, %46 : vector<256x128xf32>
    %c0_62 = arith.constant 0 : index
    %c2_63 = arith.constant 2 : index
    %c1_64 = arith.constant 1 : index
    %c0_65 = arith.constant 0 : index
    %48 = vector.load %arg6[%c0_62, %c2_63, %c1_64, %c0_65] : memref<1x18x18x128xbf16, #tpu.memory_space<vmem>>, vector<1x16x16x128xbf16>
    %49 = vector.shape_cast %48 : vector<1x16x16x128xbf16> to vector<256x128xbf16>
    %c7 = arith.constant 7 : index
    %c0_66 = arith.constant 0 : index
    %c0_67 = arith.constant 0 : index
    %50 = vector.load %arg2[%c7, %c0_66, %c0_67] : memref<9x128x128xbf16, #tpu.memory_space<vmem>>, vector<1x128x128xbf16>
    %51 = vector.shape_cast %50 : vector<1x128x128xbf16> to vector<128x128xbf16>
    %cst_68 = arith.constant dense<0.000000e+00> : vector<256x128xf32>
    %52 = tpu.matmul %49, %51, %cst_68 {dimension_numbers = #tpu.dot_dimension_numbers<[1], [0], [0], [1], [0, 0, 1, 1], [], []>} : vector<256x128xbf16>, vector<128x128xbf16>, vector<256x128xf32> -> vector<256x128xf32>
    %53 = arith.addf %47, %52 : vector<256x128xf32>
    %c0_69 = arith.constant 0 : index
    %c2_70 = arith.constant 2 : index
    %c2_71 = arith.constant 2 : index
    %c0_72 = arith.constant 0 : index
    %54 = vector.load %arg6[%c0_69, %c2_70, %c2_71, %c0_72] : memref<1x18x18x128xbf16, #tpu.memory_space<vmem>>, vector<1x16x16x128xbf16>
    %55 = vector.shape_cast %54 : vector<1x16x16x128xbf16> to vector<256x128xbf16>
    %c8 = arith.constant 8 : index
    %c0_73 = arith.constant 0 : index
    %c0_74 = arith.constant 0 : index
    %56 = vector.load %arg2[%c8, %c0_73, %c0_74] : memref<9x128x128xbf16, #tpu.memory_space<vmem>>, vector<1x128x128xbf16>
    %57 = vector.shape_cast %56 : vector<1x128x128xbf16> to vector<128x128xbf16>
    %cst_75 = arith.constant dense<0.000000e+00> : vector<256x128xf32>
    %58 = tpu.matmul %55, %57, %cst_75 {dimension_numbers = #tpu.dot_dimension_numbers<[1], [0], [0], [1], [0, 0, 1, 1], [], []>} : vector<256x128xbf16>, vector<128x128xbf16>, vector<256x128xf32> -> vector<256x128xf32>
    %59 = arith.addf %53, %58 : vector<256x128xf32>
    %60 = vector.shape_cast %59 : vector<256x128xf32> to vector<1x16x16x128xf32>
    %61 = arith.truncf %60 : vector<1x16x16x128xf32> to vector<1x16x16x128xbf16>
    %c0_76 = arith.constant 0 : index
    %c0_77 = arith.constant 0 : index
    %c0_78 = arith.constant 0 : index
    %c0_79 = arith.constant 0 : index
    %62 = vector.load %arg3[%c0_76, %c0_77, %c0_78, %c0_79] : memref<1x16x16x128xbf16, #tpu.memory_space<vmem>>, vector<1x16x16x128xbf16>
    tpu.vector_store %arg3[%c0_76, %c0_77, %c0_78, %c0_79], %61 {strides = array<i32>} : memref<1x16x16x128xbf16, #tpu.memory_space<vmem>>, vector<1x16x16x128xbf16>,
    %cst_80 = arith.constant dense<0.000000e+00> : vector<128xf32>
    %63 = vector.multi_reduction <add>, %59, %cst_80 [0] : vector<256x128xf32> to vector<128xf32>
    %64 = vector.shape_cast %63 : vector<128xf32> to vector<1x128xf32>
    %65 = vector.shape_cast %64 : vector<1x128xf32> to vector<1x1x128xf32>
    %c0_81 = arith.constant 0 : index
    %c0_82 = arith.constant 0 : index
    %c0_83 = arith.constant 0 : index
    %66 = vector.load %arg4[%c0_81, %c0_82, %c0_83] : memref<1x1x128xf32, #tpu.memory_space<vmem>>, vector<1x1x128xf32>
    tpu.vector_store %arg4[%c0_81, %c0_82, %c0_83], %65 {strides = array<i32>} : memref<1x1x128xf32, #tpu.memory_space<vmem>>, vector<1x1x128xf32>,
    %67 = arith.mulf %59, %59 : vector<256x128xf32>
    %cst_84 = arith.constant dense<0.000000e+00> : vector<128xf32>
    %68 = vector.multi_reduction <add>, %67, %cst_84 [0] : vector<256x128xf32> to vector<128xf32>
    %69 = vector.shape_cast %68 : vector<128xf32> to vector<1x128xf32>
    %70 = vector.shape_cast %69 : vector<1x128xf32> to vector<1x1x128xf32>
    %c0_85 = arith.constant 0 : index
    %c0_86 = arith.constant 0 : index
    %c0_87 = arith.constant 0 : index
    %71 = vector.load %arg5[%c0_85, %c0_86, %c0_87] : memref<1x1x128xf32, #tpu.memory_space<vmem>>, vector<1x1x128xf32>
    tpu.vector_store %arg5[%c0_85, %c0_86, %c0_87], %70 {strides = array<i32>} : memref<1x1x128xf32, #tpu.memory_space<vmem>>, vector<1x1x128xf32>,
    return
  }
  func.func @transform_0(%arg0: i32) -> (i32, i32, i32, i32) {
    %c0_i32 = arith.constant 0 : i32
    %c0_i32_0 = arith.constant 0 : i32
    %c0_i32_1 = arith.constant 0 : i32
    %c0_i32_2 = arith.constant 0 : i32
    return %arg0, %c0_i32, %c0_i32_0, %c0_i32_1 : i32, i32, i32, i32
  }
  func.func @transform_1(%arg0: i32) -> (i32, i32, i32) {
    %c0_i32 = arith.constant 0 : i32
    %c0_i32_0 = arith.constant 0 : i32
    %c0_i32_1 = arith.constant 0 : i32
    %c0_i32_2 = arith.constant 0 : i32
    return %c0_i32, %c0_i32_0, %c0_i32_1 : i32, i32, i32
  }
  func.func @transform_2(%arg0: i32) -> (i32, i32, i32, i32) {
    %c0_i32 = arith.constant 0 : i32
    %c0_i32_0 = arith.constant 0 : i32
    %c0_i32_1 = arith.constant 0 : i32
    %c0_i32_2 = arith.constant 0 : i32
    return %arg0, %c0_i32, %c0_i32_0, %c0_i32_1 : i32, i32, i32, i32
  }
  func.func @transform_3(%arg0: i32) -> (i32, i32, i32) {
    %c0_i32 = arith.constant 0 : i32
    %c0_i32_0 = arith.constant 0 : i32
    %c0_i32_1 = arith.constant 0 : i32
    return %arg0, %c0_i32, %c0_i32_0 : i32, i32, i32
  }
  func.func @transform_4(%arg0: i32) -> (i32, i32, i32) {
    %c0_i32 = arith.constant 0 : i32
    %c0_i32_0 = arith.constant 0 : i32
    %c0_i32_1 = arith.constant 0 : i32
    return %arg0, %c0_i32, %c0_i32_0 : i32, i32, i32
  }
}

</mosaic_0001>

<bundles_post_ra>
// kernel: tpu_custom_call.1
= control target key start
LH: loop header
LB: loop body
LE: loop exit
PB: predicated region body
PF: predicated region fallthrough
CT: control target
= control target key end

     0   :  { %10 = vsyncpa [#allocation4], 0  ;;  %s10355_s0 = inlined_call_operand.hbm [shape: f32[2,16,16,128], index: 0, kind: input, shape index: {}]   ;;  %s10356_s1 = inlined_call_operand.hbm [shape: bf16[9,128,128], index: 1, kind: input, shape index: {}]   ;;  %s10357_s2 = inlined_call_operand.hbm [shape: bf16[2,16,16,128], index: 2, kind: output, shape index: {0}]   ;;  %s10358_s3 = inlined_call_operand.hbm [shape: f32[2,1,128], index: 3, kind: output, shape index: {1}]   ;;  %s10359_s4 = inlined_call_operand.hbm [shape: f32[2,1,128], index: 4, kind: output, shape index: {2}]  }
   0x1   :  { %12 = vsyncpa [#allocation4 + $0x1], 0 }
   0x2   :  { %13 = vsyncpa [#allocation7], 0 }
   0x3   :  { %14 = vsyncpa [#allocation5], 0 }
   0x4   :  { %16 = vsyncpa [#allocation5 + $0x1], 0 }
   0x5   :  { %17 = vsyncpa [#allocation10], 0 }
   0x6   :  { %19 = vsyncpa [#allocation10 + $0x1], 0  ;;  %s7741_s15 = smov 0   ;;  %s7743_s16 = smov 0  }
   0x7   :  { %s7745_s17 = smov 0   ;;  %s7747_s18 = smov 0  }
   0x8 LB: > { %s7762_s19 = sadd.s32 4294967295, %s7702_s18   ;;  %s6131_s20 = sadd.s32 4294967294, %s7702_s18   ;;  %s7702_s18 = sphi %s7747_s18, %s10616_s18   ;;  %s7698_s17 = sphi %s7745_s17, %s10615_s17   ;;  %s7694_s16 = sphi %s7743_s16, %s10614_s16   ;;  %s7690_s15 = sphi %s7741_s15, %s10613_s15  }
   0x9   : > { %p45_p0 = scmp.ne.s32.totalorder %s7694_s16, %s7690_s15  ;;  %p10360_p1 = scmp.eq.s32.totalorder %s7762_s19, 0 }
   0xa   : > { %p96_p3 = scmp.eq.s32.totalorder %s6131_s20, 1  ;;  %p6132_p5 = scmp.ge.s32.totalorder %s7702_s18, 1 }
   0xb   : > { %p7773_p4 = por %p10360_p1, %p45_p0  ;;  %p155_p7 = scmp.lt.s32.totalorder %s7702_s18, 3 }
   0xc   : > { %p7778_p6 = por %p96_p3, %p45_p0  ;;  %s7704_s24 = smov [#allocation6]  }
   0xd   : > { %s10383_s21 = scalar_select %p7773_p4, 1, 0 }
   0xe   : > { %s10384_s22 = scalar_select %p7778_p6, 1, 0 }
   0xf   : > { %p7783_p8 = pnand %p6132_p5, %p155_p7  ;;  %s167_s25 = sshll.u32 %s7704_s24, 4  ;;  %s168_s25 = int_to_ptr.vmem [resolvable:$true] %s167_s25 }
  0x10   : > { %s7797_s27 = sadd.s32 1, %s7702_s18   ;;  %s32_s28 = sadd.s32 1, %s7698_s17 }
  0x11   : > { %s10385_s23 = scalar_select %p7783_p8, 1, 0 }
  0x12   : > { %p7314_p9 = pneg %p7783_p8  ;;  %s29_s29 = ssub.s32 %s7702_s18, %s7797_s27 }
  0x13   : > { %s7535_s30 = scalar_lea.vmem %s168_s25, 9216  ;;  %p7543_p5 = scmp.lt.s32.totalorder %s168_s25, %s168_s25 }
  0x14   : > { %p7792_p11 = pnand %p7314_p9, %p10360_p1  ;;  %p7536_p13 = scmp.ne.s32.totalorder %s168_s25, %s7535_s30 }
  0x15   : > { %p7544_p7 = scmp.lt.s32.totalorder %s7535_s30, %s7535_s30 }
  0x16   : > { %p7526_p12 = pneg %p7792_p11 }
  0x17   : > { %p7545_p10 = por %p7544_p7, %p7543_p5 }
  0x18   : > { %p7538_p0 = pnand %p7536_p13, %p7526_p12 }
  0x1a   : > { %p7539_p3 = pneg %p7538_p0 }
  0x1c   : > { %p7546_p2 = pnand %p7545_p10, %p7539_p3 }
  0x1e   : > { %7549 = shalt.err (!%p7546_p2)
}
  0x1f   : > { %s7705_s5 = smov 64   ;;  %s7706_s6 = smov 4  }
  0x20   : > { %7317 = dma.hbm_to_vmem [thread:$0]  (!%p7792_p11), %s10356_s1, 9216, %s168_s25, [#allocation7], %s7705_s5, %s7705_s5, %s7706_s6  }
  0x21   : > { %p30_p9 = scmp.eq.s32.totalorder %s29_s29, 0  ;;  %p39_p12 = scmp.ne.s32.totalorder %s7698_s17, %s7694_s16 }
  0x22   : > { %p40_p10 = scmp.eq.s32.totalorder %s7702_s18, 0  ;;  %p7333_p2 = scmp.lt.s32.totalorder %s7702_s18, 2 }
  0x23   : > { %s7814_s9 = scalar_select %p30_p9, %s7698_s17, %s32_s28  }
  0x24   : > { %p41_p13 = por %p40_p10, %p39_p12  ;;  %p10387_p0 = scmp.eq.s32.totalorder %s7762_s19, 1 }
  0x25   : > { %s181_s11 = sand.u32 1, %s7698_s17   ;;  %s6477_s12 = sshll.u32 %s7702_s18, 12 }
  0x26   : > { %p7818_p3 = por %p10387_p0, %p39_p12  ;;  %s6135_s13 = sshll.u32 %s181_s11, 8 }
  0x27   : > { %s7827_s26 = scalar_lea.hbm %s10355_s0, %s6477_s12  ;;  %s185_s25 = scalar_lea.vmem [#allocation3], %s6135_s13 }
  0x28   : > { %s10388_s10 = scalar_select %p7818_p3, 1, 0 }
  0x29   : > { %s192_s28 = sshll.u32 %s185_s25, 4  ;;  %p7829_p11 = pnand %p7333_p2, %p41_p13  ;;  %s7833_s28 = int_to_ptr.vmem [resolvable:$true] %s192_s28 }
  0x2a   : > { %s7835_s30 = scalar_lea.sflag [#allocation4], %s181_s11  ;;  %s7550_s5 = scalar_lea.hbm %s7827_s26, 4096 }
  0x2b   : > { %p7551_p5 = scmp.ne.s32.totalorder %s7827_s26, %s7550_s5  ;;  %p7552_p7 = pneg %p7829_p11 }
  0x2c   : > { %s7555_s8 = scalar_lea.hbm %s10355_s0, 8192  ;;  %p7556_p10 = scmp.lt.s32.totalorder %s7827_s26, %s10355_s0 }
  0x2d   : > { %p7553_p9 = pnand %p7552_p7, %p7551_p5  ;;  %p7557_p2 = scmp.lt.s32.totalorder %s7555_s8, %s7550_s5 }
  0x2f   : > { %p7554_p12 = pneg %p7553_p9  ;;  %p7558_p13 = por %p7557_p2, %p7556_p10 }
  0x31   : > { %p7559_p0 = pnand %p7558_p13, %p7554_p12 }
  0x33   : > { %7562 = shalt.err (!%p7559_p0)
}
  0x34   : > { %s7563_s11 = scalar_lea.vmem %s7833_s28, 4096  ;;  %s7707_s14 = smov [#allocation3]  }
  0x35   : > { %p7564_p1 = scmp.ne.s32.totalorder %s7833_s28, %s7563_s11  ;;  %s7568_s24 = sshll.u32 %s7707_s14, 4  ;;  %s7569_s24 = int_to_ptr.vmem [resolvable:$false] %s7568_s24 }
  0x36   : > { %s7570_s25 = scalar_lea.vmem %s7569_s24, 8192  ;;  %p7571_p9 = scmp.lt.s32.totalorder %s7833_s28, %s7569_s24 }
  0x37   : > { %p7566_p6 = pnand %p7564_p1, %p7552_p7  ;;  %p7572_p3 = scmp.lt.s32.totalorder %s7570_s25, %s7563_s11 }
  0x39   : > { %p7567_p5 = pneg %p7566_p6  ;;  %p7573_p4 = por %p7572_p3, %p7571_p9 }
  0x3b   : > { %p7574_p8 = pnand %p7573_p4, %p7567_p5 }
  0x3d   : > { %7577 = shalt.err (!%p7574_p8)
}
  0x3e   : > { %s7708_s5 = smov 128   ;;  %s7709_s6 = smov 8  }
  0x3f   : > { %7321 = dma.hbm_to_vmem [thread:$0]  (!%p7829_p11), %s7827_s26, 4096, %s7833_s28, %s7835_s30, %s7708_s5, %s7708_s5, %s7709_s6  }
  0x40   : > { %p10390_p1 = scmp.ne.s32.totalorder %s10385_s23, 0 }
  0x42   : > { %204 = sbr.rel (%p10390_p1) target bundleno = 762 (0x2fa), region = 28 }
  0x47   : > { %s7859_s7 = sand.u32 1, %s7694_s16   ;;  %p10391_p4 = scmp.ne.s32.totalorder %s10383_s21, 0 }
  0x48   : > { %s6139_s8 = sshll.u32 %s7859_s7, 8  ;;  %s207_s12 = scalar_lea.sflag [#allocation4], %s7859_s7 }
  0x49   : > { %s7863_s13 = scalar_lea.vmem [#allocation3], %s6139_s8 }
  0x4a   : > { %7673 = dma.done.wait (%p10391_p4), %s207_s12, 4096  }
  0x4b   : > { %7675 = vsyncadd (%p10391_p4), %s207_s12, 4294963200  ;;  %p10392_p6 = scmp.eq.s32.totalorder %s7762_s19, 0 }
  0x4d   : > { %7677 = dma.done.wait (%p10392_p6), [#allocation7], 9216   ;;  %p10393_p8 = pmov %p10392_p6 }
  0x4e   : > { %v7710_v0 = vmov 0   ;;  %v7376_v1 = vld [vmem:[#allocation6 + $0x78] sm:$0xff]   ;;  %v7377_v2 = vld [vmem:[#allocation6 + $0x70] sm:$0xff]   ;;  %vm935_vm0 = vsmask.f32 3328  ;;  %v7378_v3 = vld [vmem:[#allocation6 + $0x68] sm:$0xff]  }
  0x4f   : > { %7679 = vsyncadd (%p10393_p8), [#allocation7], 4294958080  ;;  %248 = vst [vmem:[#allocation2] sm:$0xf] %v7710_v0  ;;  %6854 = vmatprep.subr.bf16.mxu0 %v7376_v1  ;;  %7286 = vmatprep.subr.bf16.mxu1 %v7376_v1  ;;  %vm936_vm1 = vsmask.f32 7440 }
  0x50   : > { %249 = vst [vmem:[#allocation2 + $0x4] sm:$0xf] %v7710_v0  ;;  %250 = vst [vmem:[#allocation2 + $0x8] sm:$0x1] %v7710_v0  ;;  %6855 = vmatpush3.bf16.msra.mxu0 %v7376_v1  ;;  %7294 = vmatpush3.bf16.msra.mxu1 %v7376_v1  ;;  %vm430_vm2 = vsmask.f32 256 }
  0x51   : > { %251 = vst [vmem:[#allocation2 + $0xc] sm:$0xf] %v7710_v0  ;;  %252 = vst [vmem:[#allocation2 + $0x10] sm:$0xf] %v7710_v0  ;;  %6856 = vmatprep.subr.bf16.mxu0 %v7377_v2  ;;  %7287 = vmatprep.subr.bf16.mxu1 %v7377_v2  ;;  %vm431_vm3 = vsmask.f32 4368 }
  0x52   : > { %253 = vst [vmem:[#allocation2 + $0x14] sm:$0x1] %v7710_v0  ;;  %254 = vst [vmem:[#allocation2 + $0x18] sm:$0xf] %v7710_v0  ;;  %vm755_vm4 = vsmask.f32 7938 }
  0x53   : > { %255 = vst [vmem:[#allocation2 + $0x1c] sm:$0xf] %v7710_v0  ;;  %256 = vst [vmem:[#allocation2 + $0x20] sm:$0x1] %v7710_v0  ;;  %v7379_v4 = vld [vmem:[#allocation6 + $0x60] sm:$0xff]   ;;  %vm754_vm5 = vcmask 1043456  }
  0x54   : > { %257 = vst [vmem:[#allocation2 + $0x24] sm:$0xf] %v7710_v0  ;;  %258 = vst [vmem:[#allocation2 + $0x28] sm:$0xf] %v7710_v0  ;;  %6857 = vmatpush3.bf16.msra.mxu0 %v7377_v2  ;;  %7295 = vmatpush3.bf16.msra.mxu1 %v7377_v2  ;;  %v316_v12 = vld [vmem:[%s7863_s13 + $0x70] sm:$0xff]  ;;  %v317_v13 = vld [vmem:[%s7863_s13 + $0x78] sm:$0xff] }
  0x55   : > { %259 = vst [vmem:[#allocation2 + $0x2c] sm:$0x1] %v7710_v0  ;;  %260 = vst [vmem:[#allocation2 + $0x30] sm:$0xf] %v7710_v0  ;;  %6858 = vmatprep.subr.bf16.mxu0 %v7378_v3  ;;  %7288 = vmatprep.subr.bf16.mxu1 %v7378_v3  ;;  %v6492_v15 = vpack.c.bf16 %v316_v12, %v316_v12  ;;  %v6493_v16 = vpack.c.bf16 %v317_v13, %v317_v13  ;;  %vm761_vm6 = vcmask 1040384   ;;  %v302_v21 = vld [vmem:[%s7863_s13] sm:$0xff] }
  0x56   : > { %261 = vst [vmem:[#allocation2 + $0x34] sm:$0xf] %v7710_v0  ;;  %262 = vst [vmem:[#allocation2 + $0x38] sm:$0x1] %v7710_v0  ;;  %v871_v5 = vld [vmem:[#allocation2] sm:$0xf]  ;;  %v6478_v33 = vpack.c.bf16 %v302_v21, %v302_v21 }
  0x57   : > { %263 = vst [vmem:[#allocation2 + $0x3c] sm:$0xf] %v7710_v0  ;;  %264 = vst [vmem:[#allocation2 + $0x40] sm:$0xf] %v7710_v0  ;;  %v872_v6 = vld [vmem:[#allocation2 + $0x4] sm:$0xf] }
  0x58   : > { %265 = vst [vmem:[#allocation2 + $0x44] sm:$0x1] %v7710_v0  ;;  %266 = vst [vmem:[#allocation2 + $0x48] sm:$0xf] %v7710_v0  ;;  %v919_v7 = vld [vmem:[#allocation2 + $0x8] sm:$0x1]  ;;  %6859 = vmatpush3.bf16.msra.mxu0 %v7378_v3  ;;  %7296 = vmatpush3.bf16.msra.mxu1 %v7378_v3 }
  0x59   : > { %267 = vst [vmem:[#allocation2 + $0x4c] sm:$0xf] %v7710_v0  ;;  %268 = vst [vmem:[#allocation2 + $0x50] sm:$0x1] %v7710_v0  ;;  %v939_v8 = vshrl.u32 %v871_v5, 16  ;;  %v942_v9 = vshll.u32 %v871_v5, 16  ;;  %6860 = vmatprep.subr.bf16.mxu0 %v7379_v4  ;;  %7289 = vmatprep.subr.bf16.mxu1 %v7379_v4 }
  0x5a   : > { %269 = vst [vmem:[#allocation2 + $0x54] sm:$0xf] %v7710_v0  ;;  %270 = vst [vmem:[#allocation2 + $0x58] sm:$0xf] %v7710_v0  ;;  %v948_v10 = vshll.u32 %v872_v6, 16  ;;  %v952_v11 = vshrl.u32 %v872_v6, 16 }
  0x5b   : > { %271 = vst [vmem:[#allocation2 + $0x5c] sm:$0x1] %v7710_v0  ;;  %272 = vst [vmem:[#allocation2 + $0x60] sm:$0xf] %v7710_v0  ;;  %v958_v14 = vshll.u32 %v919_v7, 16  ;;  %v941_v17 = vrot.slane %v939_v8, 4 }
  0x5c   : > { %273 = vst [vmem:[#allocation2 + $0x64] sm:$0xf] %v7710_v0  ;;  %274 = vst [vmem:[#allocation2 + $0x68] sm:$0x1] %v7710_v0  ;;  %v944_v18 = vrot.slane %v942_v9, 5  ;;  %v950_v19 = vrot.slane %v948_v10, 5  ;;  %6861 = vmatpush3.bf16.msra.mxu0 %v7379_v4  ;;  %7297 = vmatpush3.bf16.msra.mxu1 %v7379_v4 }
  0x5d   : > { %275 = vst [vmem:[#allocation2 + $0x6c] sm:$0xf] %v7710_v0  ;;  %276 = vst [vmem:[#allocation2 + $0x70] sm:$0xf] %v7710_v0  ;;  %v954_v20 = vrot.slane %v952_v11, 4  ;;  %v303_v22 = vld [vmem:[%s7863_s13 + $0x8] sm:$0xff] }
  0x5e   : > { %277 = vst [vmem:[#allocation2 + $0x74] sm:$0x1] %v7710_v0  ;;  %278 = vst [vmem:[#allocation2 + $0x78] sm:$0xf] %v7710_v0  ;;  %v7380_v23 = vld [vmem:[#allocation6 + $0x58] sm:$0xff]   ;;  %v960_v25 = vrot.slane %v958_v14, 5  ;;  %v945_v29 = vor.u32 %v944_v18, %v941_v17  ;;  %v6479_v40 = vpack.c.bf16 %v303_v22, %v303_v22 }
  0x5f   : > { %279 = vst [vmem:[#allocation2 + $0x7c] sm:$0xf] %v7710_v0  ;;  %280 = vst [vmem:[#allocation2 + $0x80] sm:$0x1] %v7710_v0  ;;  %v553_v26 = vshrl.u32 %v6492_v15, 16  ;;  %v556_v27 = vshll.u32 %v6492_v15, 16  ;;  %v955_v30 = vor.u32 %v954_v20, %v950_v19  ;;  %6862 = vmatprep.subr.bf16.mxu0 %v7380_v23  ;;  %7290 = vmatprep.subr.bf16.mxu1 %v7380_v23 }
  0x60   : > { %281 = vst [vmem:[#allocation2 + $0x84] sm:$0xf] %v7710_v0  ;;  %282 = vst [vmem:[#allocation2 + $0x88] sm:$0xf] %v7710_v0  ;;  %v561_v28 = vshrl.u32 %v6493_v16, 16  ;;  %v10396_v31 = vmov 0  ;;  %6863 = vmatpush3.bf16.msra.mxu0 %v7380_v23  ;;  %7298 = vmatpush3.bf16.msra.mxu1 %v7380_v23 }
  0x61   : > { %283 = vst [vmem:[#allocation2 + $0x8c] sm:$0x1] %v7710_v0  ;;  %284 = vst [vmem:[#allocation2 + $0x90] sm:$0xf] %v7710_v0  ;;  %v564_v32 = vshll.u32 %v6493_v16, 16  ;;  %v318_v34 = vld [vmem:[%s7863_s13 + $0x80] sm:$0xff] }
  0x62   : > { %285 = vst [vmem:[#allocation2 + $0x94] sm:$0xf] %v7710_v0  ;;  %286 = vst [vmem:[#allocation2 + $0x98] sm:$0x1] %v7710_v0  ;;  %v555_v35 = vrot.slane %v553_v26, 7  ;;  %v563_v36 = vrot.slane %v561_v28, 7  ;;  %v7896_v41 = vpack.c.bf16 %v318_v34, %v318_v34 }
  0x63   : > { %287 = vst [vmem:[#allocation2 + $0x9c] sm:$0xf] %v7710_v0  ;;  %288 = vst [vmem:[#allocation2 + $0xa0] sm:$0xf] %v7710_v0  ;;  %v10399_v37 = vmov 0  ;;  %v946_v42 = vrot.slane %v945_v29, 4 }
  0x64   : > { %289 = vst [vmem:[#allocation2 + $0xa4] sm:$0x1] %v7710_v0  ;;  %290 = vst [vmem:[#allocation2 + $0xa8] sm:$0xf] %v7710_v0  ;;  %v808_v38 = vld [vmem:[#allocation2 + $0x60] sm:$0xf]  ;;  %v558_v48 = vor.u32 %v556_v27, %v555_v35  ;;  %v566_v50 = vor.u32 %v564_v32, %v563_v36 }
  0x65   : > { %291 = vst [vmem:[#allocation2 + $0xac] sm:$0xf] %v7710_v0  ;;  %292 = vst [vmem:[#allocation2 + $0xb0] sm:$0x1] %v7710_v0  ;;  %v812_v39 = vld [vmem:[#allocation2 + $0x68] sm:$0x1] }
  0x66   : > { %293 = vst [vmem:[#allocation2 + $0xb4] sm:$0xf] %v7710_v0  ;;  %294 = vst [vmem:[#allocation2 + $0xb8] sm:$0xf] %v7710_v0  ;;  %v956_v43 = vrot.slane %v955_v30, 4  ;;  %v10402_v44 = vmov 0 }
  0x67   : > { %295 = vst [vmem:[#allocation2 + $0xbc] sm:$0x1] %v7710_v0  ;;  %296 = vst [vmem:[#allocation2 + $0xc0] sm:$0xf] %v7710_v0  ;;  %v434_v45 = vshrl.u32 %v6478_v33, 16  ;;  %v437_v46 = vshll.u32 %v6478_v33, 16 }
  0x68   : > { %297 = vst [vmem:[#allocation2 + $0xc4] sm:$0xf] %v7710_v0  ;;  %298 = vst [vmem:[#allocation2 + $0xc8] sm:$0x1] %v7710_v0  ;;  %v7381_v47 = vld [vmem:[#allocation6 + $0x50] sm:$0xff]   ;;  %v559_v49 = vrot.slane %v555_v35, 4 }
  0x69   : > { %299 = vst [vmem:[#allocation2 + $0xcc] sm:$0xf] %v7710_v0  ;;  %300 = vst [vmem:[#allocation2 + $0xd0] sm:$0xf] %v7710_v0  ;;  %v568_v51 = vrot.slane %v563_v36, 4  ;;  %v319_v53 = vld [vmem:[%s7863_s13 + $0x88] sm:$0xff]  ;;  %6864 = vmatprep.subr.bf16.mxu0 %v7381_v47  ;;  %7291 = vmatprep.subr.bf16.mxu1 %v7381_v47 }
  0x6a   : > { %301 = vst [vmem:[#allocation2 + $0xd4] sm:$0x1] %v7710_v0  ;;  %vm7879_vm7 = vmor %vm935_vm0, %vm936_vm1  ;;  %v757_v52 = vld [vmem:[#allocation2 + $0xc] sm:$0xf]  ;;  %v436_v56 = vrot.slane %v434_v45, 7  ;;  %v442_v57 = vshrl.u32 %v6479_v40, 16  ;;  %v6495_v4 = vpack.c.bf16 %v319_v53, %v319_v53  ;;  %6865 = vmatpush3.bf16.msra.mxu0 %v7381_v47  ;;  %7299 = vmatpush3.bf16.msra.mxu1 %v7381_v47 }
  0x6b   : > { %vm7885_vm8 = vmor %vm430_vm2, %vm431_vm3  ;;  %v951_v54 = vsel %vm7879_vm7, %v946_v42, %v950_v19  ;;  %v961_v55 = vsel %vm7879_vm7, %v956_v43, %v960_v25  ;;  %v763_v62 = vld [vmem:[#allocation2 + $0x14] sm:$0x1]  ;;  %v7382_v63 = vld [vmem:[#allocation6 + $0x48] sm:$0xff]   ;;  %v445_v3 = vshll.u32 %v6479_v40, 16  ;;  %v570_v5 = vshrl.u32 %v7896_v41, 16  ;;  %s6141_s21 = sshll.u32 %s7859_s7, 7 }
  0x6c   : > { %v10397_v31 = vsel %vm7885_vm8, 4294967295, %v10396_v31  ;;  %vm7892_vm9 = vmand %vm754_vm5, %vm755_vm4  ;;  %v6174_v58 = vcombine.low %v951_v54, %v961_v55  ;;  %v567_v59 = vsel %vm7885_vm8, %v559_v49, %v566_v50  ;;  %v439_v0 = vor.u32 %v437_v46, %v436_v56  ;;  %v304_v7 = vld [vmem:[%s7863_s13 + $0x10] sm:$0xff]  ;;  %v305_v8 = vld [vmem:[%s7863_s13 + $0x18] sm:$0xff]  ;;  %6866 = vmatprep.subr.bf16.mxu0 %v7382_v63  ;;  %7292 = vmatprep.subr.bf16.mxu1 %v7382_v63  ;;  %s10158_s23 = scalar_lea.vmem [#allocation8], %s6141_s21  ;;  %s6542_s26 = sshll.u32 %s7762_s19, 11 }
  0x6d   : > { %10398 = vst [vmem:[#allocation16_spill] sm:$0xff] %v10397_v31  ;;  %v10400_v37 = vsel %vm7892_vm9, 4294967295, %v10399_v37  ;;  %vm7900_vm10 = vmand %vm761_vm6, %vm430_vm2  ;;  %v809_v60 = vsel %vm7892_vm9, %v558_v48, %v808_v38  ;;  %v440_v1 = vrot.slane %v436_v56, 4  ;;  %v444_v2 = vrot.slane %v442_v57, 7  ;;  %v815_v19 = vld [vmem:[#allocation2 + $0x6c] sm:$0xf]  ;;  %s10240_s11 = scalar_lea.hbm %s10357_s2, %s6542_s26 }
  0x6e   : > { %10401 = vst [vmem:[#allocation17_spill] sm:$0xff] %v10400_v37  ;;  %v10403_v44 = vsel %vm7900_vm10, 4294967295, %v10402_v44  ;;  %v813_v61 = vsel %vm7900_vm10, %v568_v51, %v812_v39  ;;  %810 = vst [vmem:[#allocation2 + $0x60] sm:$0xf] %v809_v60  ;;  %v573_v6 = vshll.u32 %v7896_v41, 16  ;;  %6870 = vmatprep.mubr.bf16.mxu0 %v6174_v58  ;;  %v758_v11 = vsel %vm7892_vm9, %v439_v0, %v757_v52  ;;  %v320_v21 = vld [vmem:[%s7863_s13 + $0x90] sm:$0xff] }
  0x6f   : > { %10404 = vst [vmem:[#allocation18_spill] sm:$0xff] %v10403_v44  ;;  %811 = vst [vmem:[#allocation2 + $0x64] sm:$0xf] %v567_v59  ;;  %v447_v9 = vor.u32 %v445_v3, %v444_v2  ;;  %v449_v10 = vrot.slane %v444_v2, 4  ;;  %v7921_v12 = vpack.c.bf16 %v304_v7, %v304_v7  ;;  %v572_v13 = vrot.slane %v570_v5, 7  ;;  %v321_v22 = vld [vmem:[%s7863_s13 + $0x98] sm:$0xff]  ;;  %6867 = vmatpush3.bf16.msra.mxu0 %v7382_v63 }
  0x70   : > { %814 = vst [vmem:[#allocation2 + $0x68] sm:$0x1] %v813_v61  ;;  %759 = vst [vmem:[#allocation2 + $0xc] sm:$0xf] %v758_v11  ;;  %v578_v14 = vshrl.u32 %v6495_v4, 16  ;;  %v581_v15 = vshll.u32 %v6495_v4, 16  ;;  %v7923_v16 = vpack.c.bf16 %v305_v8, %v305_v8  ;;  %v7940_v41 = vpack.c.bf16 %v320_v21, %v320_v21  ;;  %7300 = vmatpush3.bf16.msra.mxu1 %v7382_v63 }
  0x71   : > { %v448_v17 = vsel %vm7885_vm8, %v440_v1, %v447_v9  ;;  %v764_v18 = vsel %vm7900_vm10, %v449_v10, %v763_v62  ;;  %v451_v20 = vshrl.u32 %v7921_v12, 16  ;;  %v7383_v23 = vld [vmem:[#allocation6 + $0x40] sm:$0xff]   ;;  %v575_v25 = vor.u32 %v573_v6, %v572_v13  ;;  %v819_v28 = vld [vmem:[#allocation2 + $0x74] sm:$0x1]  ;;  %v307_v48 = vld [vmem:[%s7863_s13 + $0x28] sm:$0xff]  ;;  %s5969_s28 = sshll.u32 %s10158_s23, 4  ;;  %s10242_s28 = int_to_ptr.vmem [resolvable:$true] %s5969_s28 }
  0x72   : > { %760 = vst [vmem:[#allocation2 + $0x10] sm:$0xf] %v448_v17  ;;  %765 = vst [vmem:[#allocation2 + $0x14] sm:$0x1] %v764_v18  ;;  %v576_v26 = vrot.slane %v572_v13, 4  ;;  %v580_v27 = vrot.slane %v578_v14, 7  ;;  %v7942_v42 = vpack.c.bf16 %v321_v22, %v321_v22  ;;  %6868 = vmatprep.subr.bf16.mxu0 %v7383_v23  ;;  %7293 = vmatprep.subr.bf16.mxu1 %v7383_v23 }
  0x73   : > { %v7932_v29 = vrot.slane %v451_v20, 7  ;;  %v454_v30 = vshll.u32 %v7921_v12, 16  ;;  %v459_v32 = vshrl.u32 %v7923_v16, 16  ;;  %v462_v33 = vshll.u32 %v7923_v16, 16  ;;  %v306_v34 = vld [vmem:[%s7863_s13 + $0x20] sm:$0xff]  ;;  %v7947_v52 = vld [vmem:[#allocation6 + $0x38] sm:$0xff]   ;;  %6869 = vmatpush3.bf16.msra.mxu0 %v7383_v23 }
  0x74   : > { %v583_v39 = vor.u32 %v581_v15, %v580_v27  ;;  %v816_v40 = vsel %vm7892_vm9, %v575_v25, %v815_v19  ;;  %v585_v51 = vrot.slane %v580_v27, 4  ;;  %v7949_v53 = vld [vmem:[#allocation6 + $0xb8] sm:$0xff]   ;;  %v7951_v54 = vpack.c.bf16 %v306_v34, %v306_v34  ;;  %7301 = vmatpush3.bf16.msra.mxu1 %v7383_v23  ;;  %v766_v25 = vld [vmem:[#allocation2 + $0x18] sm:$0xf]  ;;  %s5948_s14 = scalar_lea.sflag [#allocation5], %s7859_s7  ;;  %s7578_s24 = scalar_lea.vmem %s10242_s28, 2048 }
  0x75   : > { %v887_v35 = vld [vmem:[#allocation2 + $0x60] sm:$0xf]  ;;  %817 = vst [vmem:[#allocation2 + $0x6c] sm:$0xf] %v816_v40  ;;  %v7955_v63 = vpack.c.bf16 %v307_v48, %v307_v48  ;;  %v456_v5 = vor.u32 %v454_v30, %v7932_v29  ;;  %6902 = vmatprep.subr.bf16.mxu1 %v7947_v52  ;;  %6950 = vmatprep.subr.bf16.mxu0 %v7949_v53  ;;  %v457_v13 = vrot.slane %v7932_v29, 4  ;;  %v461_v19 = vrot.slane %v459_v32, 7  ;;  %p7579_p3 = scmp.ne.s32.totalorder %s10242_s28, %s7578_s24 }
  0x76   : > { %v888_v36 = vld [vmem:[#allocation2 + $0x64] sm:$0xf]  ;;  %v1131_v43 = vshrl.u32 %v887_v35, 16  ;;  %v1134_v45 = vshll.u32 %v887_v35, 16  ;;  %v584_v50 = vsel %vm7885_vm8, %v576_v26, %v583_v39  ;;  %v820_v62 = vsel %vm7900_vm10, %v585_v51, %v819_v28  ;;  %v770_v26 = vld [vmem:[#allocation2 + $0x20] sm:$0x1] }
  0x77   : > { %v927_v38 = vld [vmem:[#allocation2 + $0x68] sm:$0x1]  ;;  %v1140_v46 = vshll.u32 %v888_v36, 16  ;;  %v1144_v47 = vshrl.u32 %v888_v36, 16  ;;  %v873_v59 = vld [vmem:[#allocation2 + $0xc] sm:$0xf]  ;;  %v464_v32 = vor.u32 %v462_v33, %v461_v19  ;;  %v767_v16 = vsel %vm7892_vm9, %v456_v5, %v766_v25 }
  0x78   : > { %v1150_v49 = vshll.u32 %v927_v38, 16  ;;  %v1133_v55 = vrot.slane %v1131_v43, 4  ;;  %v1136_v56 = vrot.slane %v1134_v45, 5  ;;  %818 = vst [vmem:[#allocation2 + $0x70] sm:$0xf] %v584_v50  ;;  %v963_v60 = vshrl.u32 %v873_v59, 16 }
  0x79   : > { %v1142_v57 = vrot.slane %v1140_v46, 5  ;;  %v1146_v58 = vrot.slane %v1144_v47, 4  ;;  %v966_v61 = vshll.u32 %v873_v59, 16  ;;  %v874_v3 = vld [vmem:[#allocation2 + $0x10] sm:$0xf]  ;;  %v466_v46 = vrot.slane %v461_v19, 4 }
  0x7a   : > { %v1137_v0 = vor.u32 %v1136_v56, %v1133_v55  ;;  %v1152_v2 = vrot.slane %v1150_v49, 5  ;;  %v920_v4 = vld [vmem:[#allocation2 + $0x14] sm:$0x1]  ;;  %821 = vst [vmem:[#allocation2 + $0x74] sm:$0x1] %v820_v62  ;;  %v965_v6 = vrot.slane %v963_v60, 4  ;;  %v465_v50 = vsel %vm7885_vm8, %v457_v13, %v464_v32 }
  0x7b   : > { %v1147_v1 = vor.u32 %v1146_v58, %v1142_v57  ;;  %v968_v7 = vrot.slane %v966_v61, 5  ;;  %v972_v8 = vshll.u32 %v874_v3, 16  ;;  %v976_v9 = vshrl.u32 %v874_v3, 16  ;;  %769 = vst [vmem:[#allocation2 + $0x1c] sm:$0xf] %v465_v50  ;;  %v7387_v59 = vld [vmem:[#allocation6 + $0xb0] sm:$0xff]  }
  0x7c   : > { %v1138_v10 = vrot.slane %v1137_v0, 4  ;;  %v982_v12 = vshll.u32 %v920_v4, 16  ;;  %v889_v18 = vld [vmem:[#allocation2 + $0x6c] sm:$0xf]  ;;  %v771_v33 = vsel %vm7900_vm10, %v466_v46, %v770_v26  ;;  %768 = vst [vmem:[#allocation2 + $0x18] sm:$0xf] %v767_v16 }
  0x7d   : > { %v1148_v11 = vrot.slane %v1147_v1, 4  ;;  %v969_v14 = vor.u32 %v968_v7, %v965_v6  ;;  %v974_v15 = vrot.slane %v972_v8, 5  ;;  %v978_v17 = vrot.slane %v976_v9, 4  ;;  %772 = vst [vmem:[#allocation2 + $0x20] sm:$0x1] %v771_v33  ;;  %v323_v26 = vld [vmem:[%s7863_s13 + $0xa8] sm:$0xff] }
  0x7e   : > { %v1143_v20 = vsel %vm7879_vm7, %v1138_v10, %v1142_v57  ;;  %v984_v22 = vrot.slane %v982_v12, 5  ;;  %v1155_v23 = vshrl.u32 %v889_v18, 16  ;;  %v1158_v29 = vshll.u32 %v889_v18, 16  ;;  %v822_v4 = vld [vmem:[#allocation2 + $0x78] sm:$0xf]  ;;  %v7386_v12 = vld [vmem:[#allocation6 + $0x30] sm:$0xff]  }
  0x7f   : > { %v1153_v21 = vsel %vm7879_vm7, %v1148_v11, %v1152_v2  ;;  %v970_v28 = vrot.slane %v969_v14, 4  ;;  %v979_v30 = vor.u32 %v978_v17, %v974_v15  ;;  %v890_v34 = vld [vmem:[#allocation2 + $0x70] sm:$0xf]  ;;  %v587_v60 = vshrl.u32 %v7940_v41, 16  ;;  %v826_v9 = vld [vmem:[#allocation2 + $0x80] sm:$0x1] }
  0x80   : > { %v6182_v27 = vcombine.low %v1143_v20, %v1153_v21  ;;  %v1157_v35 = vrot.slane %v1155_v23, 4  ;;  %v1164_v36 = vshll.u32 %v890_v34, 16  ;;  %v1168_v38 = vshrl.u32 %v890_v34, 16  ;;  %v7389_v17 = vld [vmem:[#allocation6 + $0xa8] sm:$0xff]   ;;  %v777_v25 = vld [vmem:[#allocation2 + $0x2c] sm:$0x1] }
  0x81   : > { %v975_v39 = vsel %vm7879_vm7, %v970_v28, %v974_v15  ;;  %v980_v40 = vrot.slane %v979_v30, 4  ;;  %v928_v43 = vld [vmem:[#allocation2 + $0x74] sm:$0x1]  ;;  %v1160_v45 = vrot.slane %v1158_v29, 5  ;;  %v590_v62 = vshll.u32 %v7940_v41, 16  ;;  %v7391_v28 = vld [vmem:[#allocation6 + $0xa0] sm:$0xff]  }
  0x82   : > { %6886 = vmatprep.mubr.bf16.mxu1 %v6182_v27  ;;  %v1166_v47 = vrot.slane %v1164_v36, 5  ;;  %v1170_v48 = vrot.slane %v1168_v38, 4  ;;  %v1174_v49 = vshll.u32 %v928_v43, 16  ;;  %v595_v0 = vshrl.u32 %v7942_v42, 16  ;;  %v773_v15 = vld [vmem:[#allocation2 + $0x24] sm:$0xf] }
  0x83   : > { %v985_v51 = vsel %vm7879_vm7, %v980_v40, %v984_v22  ;;  %v1161_v55 = vor.u32 %v1160_v45, %v1157_v35  ;;  %v598_v1 = vshll.u32 %v7942_v42, 16  ;;  %v589_v3 = vrot.slane %v587_v60, 7  ;;  %v322_v42 = vld [vmem:[%s7863_s13 + $0xa0] sm:$0xff]  ;;  %v7388_v32 = vld [vmem:[#allocation6 + $0x28] sm:$0xff]   ;;  %v308_v46 = vld [vmem:[%s7863_s13 + $0x30] sm:$0xff]  ;;  %p10610_p11 = scmp.ne.s32.totalorder %s10388_s10, 0 }
  0x84   : > { %v6175_v56 = vcombine.low %v975_v39, %v985_v51  ;;  %v1171_v57 = vor.u32 %v1170_v48, %v1166_v47  ;;  %v1176_v58 = vrot.slane %v1174_v49, 5  ;;  %v468_v5 = vshrl.u32 %v7951_v54, 16  ;;  %v876_v21 = vld [vmem:[#allocation2 + $0x1c] sm:$0xf]  ;;  %v875_v30 = vld [vmem:[#allocation2 + $0x18] sm:$0xf] }
  0x85   : > { %v1162_v61 = vrot.slane %v1161_v55, 4  ;;  %v471_v6 = vshll.u32 %v7951_v54, 16  ;;  %v597_v8 = vrot.slane %v595_v0, 7  ;;  %v476_v41 = vshrl.u32 %v7955_v63, 16  ;;  %v921_v34 = vld [vmem:[#allocation2 + $0x20] sm:$0x1]  ;;  %p7580_p7 = pnand %p7579_p3, %p10610_p11 }
  0x86   : > { %6871 = vmatmul.mubr.bf16.vlgmr.msra.gmra.mxu0 %v6175_v56  ;;  %v1172_v2 = vrot.slane %v1171_v57, 4  ;;  %v479_v10 = vshll.u32 %v7955_v63, 16  ;;  %v592_v13 = vor.u32 %v590_v62, %v589_v3  ;;  %v593_v54 = vrot.slane %v589_v3, 4  ;;  %v309_v51 = vld [vmem:[%s7863_s13 + $0x38] sm:$0xff]  ;;  %s7711_s25 = smov [#allocation8]  }
  0x87   : > { %v1167_v7 = vsel %vm7879_vm7, %v1162_v61, %v1166_v47  ;;  %6951 = vmatpush3.bf16.msra.mxu0 %v7949_v53  ;;  %v470_v14 = vrot.slane %v468_v5, 7  ;;  %v600_v53 = vor.u32 %v598_v1, %v597_v8  ;;  %v602_v19 = vrot.slane %v597_v8, 4  ;;  %v7393_v1 = vld [vmem:[#allocation6 + $0x98] sm:$0xff]   ;;  %p7581_p12 = pneg %p7580_p7  ;;  %s7582_s5 = sshll.u32 %s7711_s25, 4  ;;  %s7583_s5 = int_to_ptr.vmem [resolvable:$false] %s7582_s5 }
  0x88   : > { %v1177_v11 = vsel %vm7879_vm7, %v1172_v2, %v1176_v58  ;;  %6952 = vmatprep.subr.bf16.mxu0 %v7387_v59  ;;  %v478_v20 = vrot.slane %v476_v41, 7  ;;  %v823_v63 = vsel %vm7892_vm9, %v592_v13, %v822_v4  ;;  %v7994_v27 = vpack.c.bf16 %v322_v42, %v322_v42  ;;  %s7584_s6 = scalar_lea.vmem %s7583_s5, 4096  ;;  %p7585_p10 = scmp.lt.s32.totalorder %s10242_s28, %s7583_s5 }
  0x89   : > { %v6183_v18 = vcombine.low %v1167_v7, %v1177_v11  ;;  %v473_v22 = vor.u32 %v471_v6, %v470_v14  ;;  %v474_v23 = vrot.slane %v470_v14, 4  ;;  %v996_v29 = vshll.u32 %v876_v21, 16  ;;  %824 = vst [vmem:[#allocation2 + $0x78] sm:$0xf] %v823_v63  ;;  %v7390_v6 = vld [vmem:[#allocation6 + $0x20] sm:$0xff]   ;;  %p7586_p2 = scmp.lt.s32.totalorder %s7584_s6, %s7578_s24 }
  0x8a   : > { %v1000_v35 = vshrl.u32 %v876_v21, 16  ;;  %v601_v36 = vsel %vm7885_vm8, %v593_v54, %v600_v53  ;;  %v827_v38 = vsel %vm7900_vm10, %v602_v19, %v826_v9  ;;  %v987_v39 = vshrl.u32 %v875_v30, 16  ;;  %v7395_v19 = vld [vmem:[#allocation6 + $0x90] sm:$0xff]  }
  0x8b   : > { %6887 = vmatmul.mubr.bf16.vlgmr.msra.gmra.mxu1 %v6183_v18  ;;  %6953 = vmatpush3.bf16.msra.mxu0 %v7387_v59  ;;  %v990_v40 = vshll.u32 %v875_v30, 16  ;;  %v1006_v43 = vshll.u32 %v921_v34, 16  ;;  %825 = vst [vmem:[#allocation2 + $0x7c] sm:$0xf] %v601_v36  ;;  %828 = vst [vmem:[#allocation2 + $0x80] sm:$0x1] %v827_v38  ;;  %v481_v45 = vor.u32 %v479_v10, %v478_v20  ;;  %p7587_p13 = por %p7586_p2, %p7585_p10 }
  0x8c   : > { %6903 = vmatpush3.bf16.msra.mxu1 %v7947_v52  ;;  %6954 = vmatprep.subr.bf16.mxu0 %v7389_v17  ;;  %v998_v47 = vrot.slane %v996_v29, 5  ;;  %v1002_v48 = vrot.slane %v1000_v35, 4  ;;  %v483_v49 = vrot.slane %v478_v20, 4  ;;  %v774_v50 = vsel %vm7892_vm9, %v473_v22, %v773_v15  ;;  %v829_v29 = vld [vmem:[#allocation2 + $0x84] sm:$0xf] }
  0x8d   : > { %6904 = vmatprep.subr.bf16.mxu1 %v7386_v12  ;;  %v989_v55 = vrot.slane %v987_v39, 4  ;;  %v992_v16 = vrot.slane %v990_v40, 5  ;;  %v1008_v33 = vrot.slane %v1006_v43, 5  ;;  %v482_v52 = vsel %vm7885_vm8, %v474_v23, %v481_v45  ;;  %775 = vst [vmem:[#allocation2 + $0x24] sm:$0xf] %v774_v50  ;;  %p7588_p0 = pnand %p7587_p13, %p7581_p12 }
  0x8e   : > { %v1003_v56 = vor.u32 %v1002_v48, %v998_v47  ;;  %776 = vst [vmem:[#allocation2 + $0x28] sm:$0xf] %v482_v52  ;;  %v778_v57 = vsel %vm7900_vm10, %v483_v49, %v777_v25  ;;  %v8009_v58 = vpack.c.bf16 %v323_v26, %v323_v26  ;;  %v604_v59 = vshrl.u32 %v7994_v27, 16  ;;  %v7392_v25 = vld [vmem:[#allocation6 + $0x18] sm:$0xff]  }
  0x8f   : > { %6955 = vmatpush3.bf16.msra.mxu0 %v7389_v17  ;;  %v993_v60 = vor.u32 %v992_v16, %v989_v55  ;;  %779 = vst [vmem:[#allocation2 + $0x2c] sm:$0x1] %v778_v57  ;;  %v607_v61 = vshll.u32 %v7994_v27, 16  ;;  %v8013_v62 = vpack.c.bf16 %v308_v46, %v308_v46  ;;  %v8015_v0 = vpack.c.bf16 %v309_v51, %v309_v51  ;;  %v7394_v55 = vld [vmem:[#allocation6 + $0x10] sm:$0xff]  }
  0x90   : > { %6905 = vmatpush3.bf16.msra.mxu1 %v7386_v12  ;;  %6956 = vmatprep.subr.bf16.mxu0 %v7391_v28  ;;  %v1004_v2 = vrot.slane %v1003_v56, 4  ;;  %v8017_v3 = vrot.slane %v604_v59, 7  ;;  %v612_v4 = vshrl.u32 %v8009_v58, 16  ;;  %v615_v5 = vshll.u32 %v8009_v58, 16  ;;  %v891_v8 = vld [vmem:[#allocation2 + $0x78] sm:$0xf] }
  0x91   : > { %6906 = vmatprep.subr.bf16.mxu1 %v7388_v32  ;;  %v994_v7 = vrot.slane %v993_v60, 4  ;;  %v485_v9 = vshrl.u32 %v8013_v62, 16  ;;  %v488_v41 = vshll.u32 %v8013_v62, 16  ;;  %v493_v10 = vshrl.u32 %v8015_v0, 16  ;;  %v324_v57 = vld [vmem:[%s7863_s13 + $0xb0] sm:$0xff]  ;;  %v7397_v58 = vld [vmem:[#allocation6 + $0x88] sm:$0xff]  }
  0x92   : > { %v1009_v42 = vsel %vm7879_vm7, %v1004_v2, %v1008_v33  ;;  %v892_v11 = vld [vmem:[#allocation2 + $0x7c] sm:$0xf]  ;;  %v929_v12 = vld [vmem:[#allocation2 + $0x80] sm:$0x1]  ;;  %v1179_v13 = vshrl.u32 %v891_v8, 16  ;;  %v1182_v54 = vshll.u32 %v891_v8, 16  ;;  %v609_v14 = vor.u32 %v607_v61, %v8017_v3 }
  0x93   : > { %6957 = vmatpush3.bf16.msra.mxu0 %v7391_v28  ;;  %v999_v15 = vsel %vm7879_vm7, %v994_v7, %v998_v47  ;;  %v1188_v17 = vshll.u32 %v892_v11, 16  ;;  %v1192_v18 = vshrl.u32 %v892_v11, 16  ;;  %v1198_v53 = vshll.u32 %v929_v12, 16  ;;  %v833_v47 = vld [vmem:[#allocation2 + $0x8c] sm:$0x1] }
  0x94   : > { %6907 = vmatpush3.bf16.msra.mxu1 %v7388_v32  ;;  %6958 = vmatprep.subr.bf16.mxu0 %v7393_v1  ;;  %v6176_v20 = vcombine.low %v999_v15, %v1009_v42  ;;  %v1181_v21 = vrot.slane %v1179_v13, 4  ;;  %v1184_v63 = vrot.slane %v1182_v54, 5  ;;  %v877_v22 = vld [vmem:[#allocation2 + $0x24] sm:$0xf]  ;;  %v610_v23 = vrot.slane %v8017_v3, 4  ;;  %v325_v3 = vld [vmem:[%s7863_s13 + $0xb8] sm:$0xff] }
  0x95   : > { %6908 = vmatprep.subr.bf16.mxu1 %v7390_v6  ;;  %v1190_v26 = vrot.slane %v1188_v17, 5  ;;  %v1194_v27 = vrot.slane %v1192_v18, 4  ;;  %v1200_v28 = vrot.slane %v1198_v53, 5  ;;  %v8030_v30 = vld [vmem:[#allocation2 + $0x28] sm:$0xf]  ;;  %v1011_v34 = vshrl.u32 %v877_v22, 16 }
  0x96   : > { %6874 = vmatprep.mubr.bf16.mxu0 %v6176_v20  ;;  %v1185_v35 = vor.u32 %v1184_v63, %v1181_v21  ;;  %v922_v36 = vld [vmem:[#allocation2 + $0x2c] sm:$0x1]  ;;  %v1014_v38 = vshll.u32 %v877_v22, 16  ;;  %v1020_v32 = vshll.u32 %v8030_v30, 16  ;;  %v1024_v39 = vshrl.u32 %v8030_v30, 16  ;;  %v7396_v42 = vld [vmem:[#allocation6 + $0x8] sm:$0xff]  }
  0x97   : > { %6959 = vmatpush3.bf16.msra.mxu0 %v7393_v1  ;;  %v1195_v40 = vor.u32 %v1194_v27, %v1190_v26  ;;  %v1013_v43 = vrot.slane %v1011_v34, 4  ;;  %v1030_v45 = vshll.u32 %v922_v36, 16  ;;  %v614_v46 = vrot.slane %v612_v4, 7  ;;  %v780_v2 = vld [vmem:[#allocation2 + $0x30] sm:$0xf]  ;;  %v311_v15 = vld [vmem:[%s7863_s13 + $0x48] sm:$0xff] }
  0x98   : > { %6909 = vmatpush3.bf16.msra.mxu1 %v7390_v6  ;;  %6960 = vmatprep.subr.bf16.mxu0 %v7395_v19  ;;  %v1186_v48 = vrot.slane %v1185_v35, 4  ;;  %v1016_v49 = vrot.slane %v1014_v38, 5  ;;  %v1022_v50 = vrot.slane %v1020_v32, 5  ;;  %v1026_v51 = vrot.slane %v1024_v39, 4  ;;  %v784_v8 = vld [vmem:[#allocation2 + $0x38] sm:$0x1] }
  0x99   : > { %6910 = vmatprep.subr.bf16.mxu1 %v7392_v25  ;;  %v1196_v16 = vrot.slane %v1195_v40, 4  ;;  %v1032_v33 = vrot.slane %v1030_v45, 5  ;;  %v617_v52 = vor.u32 %v615_v5, %v614_v46  ;;  %v619_v56 = vrot.slane %v614_v46, 4  ;;  %v7399_v17 = vld [vmem:[#allocation6 + $0x80] sm:$0xff]   ;;  %v313_v27 = vld [vmem:[%s7863_s13 + $0x58] sm:$0xff] }
  0x9a   : > { %v1191_v59 = vsel %vm7879_vm7, %v1186_v48, %v1190_v26  ;;  %v1017_v60 = vor.u32 %v1016_v49, %v1013_v43  ;;  %v1027_v61 = vor.u32 %v1026_v51, %v1022_v50  ;;  %v830_v1 = vsel %vm7892_vm9, %v609_v14, %v829_v29  ;;  %v310_v14 = vld [vmem:[%s7863_s13 + $0x40] sm:$0xff]  ;;  %v312_v26 = vld [vmem:[%s7863_s13 + $0x50] sm:$0xff]  ;;  %v836_v40 = vld [vmem:[#allocation2 + $0x90] sm:$0xf] }
  0x9b   : > { %6961 = vmatpush3.bf16.msra.mxu0 %v7395_v19  ;;  %v1201_v4 = vsel %vm7879_vm7, %v1196_v16, %v1200_v28  ;;  %v618_v5 = vsel %vm7885_vm8, %v610_v23, %v617_v52  ;;  %831 = vst [vmem:[#allocation2 + $0x84] sm:$0xf] %v830_v1  ;;  %v834_v6 = vsel %vm7900_vm10, %v619_v56, %v833_v47  ;;  %v487_v7 = vrot.slane %v485_v9, 7  ;;  %v326_v20 = vld [vmem:[%s7863_s13 + $0xc0] sm:$0xff]  ;;  %v327_v23 = vld [vmem:[%s7863_s13 + $0xc8] sm:$0xff]  ;;  %v8065_v28 = vld [vmem:[#allocation6 + $0x138] sm:$0xff]  }
  0x9c   : > { %6911 = vmatpush3.bf16.msra.mxu1 %v7392_v25  ;;  %6962 = vmatprep.subr.bf16.mxu0 %v7397_v58  ;;  %v6184_v11 = vcombine.low %v1191_v59, %v1201_v4  ;;  %v1018_v12 = vrot.slane %v1017_v60, 4  ;;  %v1028_v13 = vrot.slane %v1027_v61, 4  ;;  %832 = vst [vmem:[#allocation2 + $0x88] sm:$0xf] %v618_v5  ;;  %835 = vst [vmem:[#allocation2 + $0x8c] sm:$0x1] %v834_v6 }
  0x9d   : > { %v495_v54 = vrot.slane %v493_v10, 7  ;;  %6912 = vmatprep.subr.bf16.mxu1 %v7394_v55  ;;  %v490_v9 = vor.u32 %v488_v41, %v487_v7  ;;  %v491_v18 = vrot.slane %v487_v7, 4  ;;  %v496_v53 = vshll.u32 %v8015_v0, 16  ;;  %v7398_v38 = vld [vmem:[#allocation6] sm:$0xff]   ;;  %v8086_v1 = vld [vmem:[#allocation6 + $0xf8] sm:$0xff]  }
  0x9e   : > { %v6500_v19 = vpack.c.bf16 %v324_v57, %v324_v57  ;;  %6890 = vmatprep.mubr.bf16.mxu1 %v6184_v11  ;;  %v1023_v21 = vsel %vm7879_vm7, %v1018_v12, %v1022_v50  ;;  %v1033_v10 = vsel %vm7879_vm7, %v1028_v13, %v1032_v33  ;;  %v6501_v22 = vpack.c.bf16 %v325_v3, %v325_v3  ;;  %v840_v48 = vld [vmem:[#allocation2 + $0x98] sm:$0x1] }
  0x9f   : > { %v500_v63 = vrot.slane %v495_v54, 4  ;;  %6963 = vmatpush3.bf16.msra.mxu0 %v7397_v58  ;;  %v6177_v62 = vcombine.low %v1023_v21, %v1033_v10  ;;  %v498_v41 = vor.u32 %v496_v53, %v495_v54  ;;  %v781_v25 = vsel %vm7892_vm9, %v490_v9, %v780_v2 }
  0xa0   : > { %v621_v0 = vshrl.u32 %v6500_v19, 16  ;;  %6913 = vmatpush3.bf16.msra.mxu1 %v7394_v55  ;;  %6964 = vmatprep.subr.bf16.mxu0 %v7399_v17  ;;  %782 = vst [vmem:[#allocation2 + $0x30] sm:$0xf] %v781_v25  ;;  %v624_v29 = vshll.u32 %v6500_v19, 16  ;;  %v629_v35 = vshrl.u32 %v6501_v22, 16  ;;  %v632_v36 = vshll.u32 %v6501_v22, 16 }
  0xa1   : > { %v785_v34 = vsel %vm7900_vm10, %v500_v63, %v784_v8  ;;  %6914 = vmatprep.subr.bf16.mxu1 %v7396_v42  ;;  %6875 = vmatmul.mubr.bf16.gmra.mxu0 %v6177_v62  ;;  %v499_v32 = vsel %vm7885_vm8, %v491_v18, %v498_v41  ;;  %v6486_v43 = vpack.c.bf16 %v310_v14, %v310_v14  ;;  %vm1965_vm11 = vcmask 1042432  }
  0xa2   : > { %786 = vst [vmem:[#allocation2 + $0x38] sm:$0x1] %v785_v34  ;;  %v623_v39 = vrot.slane %v621_v0, 7  ;;  %v8071_v45 = vpack.c.bf16 %v311_v15, %v311_v15  ;;  %v893_v46 = vld [vmem:[#allocation2 + $0x84] sm:$0xf]  ;;  %v631_v47 = vrot.slane %v629_v35, 7  ;;  %v8073_v49 = vpack.c.bf16 %v326_v20, %v326_v20 }
  0xa3   : > { %783 = vst [vmem:[#allocation2 + $0x34] sm:$0xf] %v499_v32  ;;  %v8075_v50 = vpack.c.bf16 %v327_v23, %v327_v23  ;;  %v8077_v51 = vpack.c.bf16 %v312_v26, %v312_v26  ;;  %6965 = vmatpush3.bf16.msra.mxu0 %v7399_v17  ;;  %v8079_v55 = vld [vmem:[#allocation2 + $0x88] sm:$0xf]  ;;  %v930_v16 = vld [vmem:[#allocation2 + $0x8c] sm:$0x1]  ;;  %v8081_v57 = vpack.c.bf16 %v313_v27, %v313_v27 }
  0xa4   : > { %v1203_v33 = vshrl.u32 %v893_v46, 16  ;;  %v1206_v52 = vshll.u32 %v893_v46, 16  ;;  %v626_v56 = vor.u32 %v624_v29, %v623_v39  ;;  %6915 = vmatpush3.bf16.msra.mxu1 %v7396_v42  ;;  %7046 = vmatprep.subr.bf16.mxu0 %v8065_v28  ;;  %v1212_v58 = vshll.u32 %v8079_v55, 16  ;;  %v787_v34 = vld [vmem:[#allocation2 + $0x3c] sm:$0xf] }
  0xa5   : > { %v1216_v59 = vshrl.u32 %v8079_v55, 16  ;;  %v1222_v60 = vshll.u32 %v930_v16, 16  ;;  %v627_v61 = vrot.slane %v623_v39, 4  ;;  %6916 = vmatprep.subr.bf16.mxu1 %v7398_v38  ;;  %v634_v4 = vor.u32 %v632_v36, %v631_v47 }
  0xa6   : > { %v1205_v2 = vrot.slane %v1203_v33, 4  ;;  %v1208_v3 = vrot.slane %v1206_v52, 5  ;;  %v636_v5 = vrot.slane %v631_v47, 4  ;;  %v1214_v6 = vrot.slane %v1212_v58, 5 }
  0xa7   : > { %v1218_v7 = vrot.slane %v1216_v59, 4  ;;  %v1224_v8 = vrot.slane %v1222_v60, 5  ;;  %v837_v42 = vsel %vm7892_vm9, %v626_v56, %v836_v40  ;;  %v8090_v12 = vld [vmem:[#allocation2 + $0x30] sm:$0xf]  ;;  %v635_v13 = vsel %vm7885_vm8, %v627_v61, %v634_v4  ;;  %v791_v61 = vld [vmem:[#allocation2 + $0x44] sm:$0x1] }
  0xa8   : > { %v1209_v11 = vor.u32 %v1208_v3, %v1205_v2  ;;  %838 = vst [vmem:[#allocation2 + $0x90] sm:$0xf] %v837_v42  ;;  %v841_v54 = vsel %vm7900_vm10, %v636_v5, %v840_v48  ;;  %v502_v14 = vshrl.u32 %v6486_v43, 16  ;;  %6917 = vmatpush3.bf16.msra.mxu1 %v7398_v38  ;;  %v1035_v9 = vshrl.u32 %v8090_v12, 16  ;;  %839 = vst [vmem:[#allocation2 + $0x94] sm:$0xf] %v635_v13 }
  0xa9   : > { %v1219_v15 = vor.u32 %v1218_v7, %v1214_v6  ;;  %v8096_v17 = vld [vmem:[#allocation2 + $0x38] sm:$0x1]  ;;  %v1038_v18 = vshll.u32 %v8090_v12, 16  ;;  %842 = vst [vmem:[#allocation2 + $0x98] sm:$0x1] %v841_v54  ;;  %v505_v53 = vshll.u32 %v6486_v43, 16  ;;  %6998 = vmatprep.subr.bf16.mxu1 %v8086_v1 }
  0xaa   : > { %v1210_v19 = vrot.slane %v1209_v11, 4  ;;  %v8101_v20 = vld [vmem:[#allocation2 + $0x34] sm:$0xf]  ;;  %v1054_v21 = vshll.u32 %v8096_v17, 16  ;;  %v504_v10 = vrot.slane %v502_v14, 7  ;;  %v510_v63 = vshrl.u32 %v8071_v45, 16 }
  0xab   : > { %v1220_v22 = vrot.slane %v1219_v15, 4  ;;  %v1037_v23 = vrot.slane %v1035_v9, 4  ;;  %v1040_v62 = vrot.slane %v1038_v18, 5  ;;  %v1044_v41 = vshll.u32 %v8101_v20, 16 }
  0xac   : > { %v1215_v25 = vsel %vm7879_vm7, %v1210_v19, %v1214_v6  ;;  %v1048_v0 = vshrl.u32 %v8101_v20, 16  ;;  %v1056_v26 = vrot.slane %v1054_v21, 5  ;;  %v507_v27 = vor.u32 %v505_v53, %v504_v10 }
  0xad   : > { %v1225_v29 = vsel %vm7879_vm7, %v1220_v22, %v1224_v8  ;;  %v1041_v35 = vor.u32 %v1040_v62, %v1037_v23  ;;  %v1046_v36 = vrot.slane %v1044_v41, 5  ;;  %v508_v38 = vrot.slane %v504_v10, 4 }
  0xae   : > { %v6185_v32 = vcombine.low %v1215_v25, %v1225_v29  ;;  %v1050_v39 = vrot.slane %v1048_v0, 4  ;;  %v512_v40 = vrot.slane %v510_v63, 7  ;;  %v513_v43 = vshll.u32 %v8071_v45, 16  ;;  %v843_v63 = vld [vmem:[#allocation2 + $0x9c] sm:$0xf] }
  0xaf   : > { %v1042_v46 = vrot.slane %v1041_v35, 4  ;;  %v8112_v47 = vld [vmem:[#allocation2 + $0x90] sm:$0xf]  ;;  %v788_v48 = vsel %vm7892_vm9, %v507_v27, %v787_v34  ;;  %v638_v16 = vshrl.u32 %v8073_v49, 16  ;;  %v641_v33 = vshll.u32 %v8073_v49, 16 }
  0xb0   : > { %6891 = vmatmul.mubr.bf16.gmra.mxu1 %v6185_v32  ;;  %v1051_v52 = vor.u32 %v1050_v39, %v1046_v36  ;;  %v8118_v56 = vld [vmem:[#allocation2 + $0x94] sm:$0xf]  ;;  %v8120_v58 = vld [vmem:[#allocation2 + $0x98] sm:$0x1]  ;;  %v1227_v59 = vshrl.u32 %v8112_v47, 16  ;;  %v1230_v45 = vshll.u32 %v8112_v47, 16  ;;  %v515_v60 = vor.u32 %v513_v43, %v512_v40 }
  0xb1   : > { %789 = vst [vmem:[#allocation2 + $0x3c] sm:$0xf] %v788_v48  ;;  %v1047_v2 = vsel %vm7879_vm7, %v1042_v46, %v1046_v36  ;;  %v1236_v3 = vshll.u32 %v8118_v56, 16  ;;  %v1240_v49 = vshrl.u32 %v8118_v56, 16  ;;  %v1246_v4 = vshll.u32 %v8120_v58, 16 }
  0xb2   : > { %v1052_v5 = vrot.slane %v1051_v52, 4  ;;  %v1229_v6 = vrot.slane %v1227_v59, 4  ;;  %v1232_v7 = vrot.slane %v1230_v45, 5  ;;  %v516_v8 = vsel %vm7885_vm8, %v508_v38, %v515_v60  ;;  %v847_v25 = vld [vmem:[#allocation2 + $0xa4] sm:$0x1]  ;;  %v328_v59 = vld [vmem:[%s7863_s13 + $0xd0] sm:$0xff] }
  0xb3   : > { %v1238_v42 = vrot.slane %v1236_v3, 5  ;;  %v1242_v11 = vrot.slane %v1240_v49, 4  ;;  %v1248_v13 = vrot.slane %v1246_v4, 5  ;;  %v517_v54 = vrot.slane %v512_v40, 4  ;;  %790 = vst [vmem:[#allocation2 + $0x40] sm:$0xf] %v516_v8 }
  0xb4   : > { %v1057_v14 = vsel %vm7879_vm7, %v1052_v5, %v1056_v26  ;;  %v1233_v15 = vor.u32 %v1232_v7, %v1229_v6  ;;  %v640_v9 = vrot.slane %v638_v16, 7  ;;  %v646_v18 = vshrl.u32 %v8075_v50, 16  ;;  %v794_v32 = vld [vmem:[#allocation2 + $0x48] sm:$0xf]  ;;  %v798_v3 = vld [vmem:[#allocation2 + $0x50] sm:$0x1] }
  0xb5   : > { %v6178_v53 = vcombine.low %v1047_v2, %v1057_v14  ;;  %v1243_v19 = vor.u32 %v1242_v11, %v1238_v42  ;;  %v792_v21 = vsel %vm7900_vm10, %v517_v54, %v791_v61  ;;  %v649_v10 = vshll.u32 %v8075_v50, 16  ;;  %v329_v7 = vld [vmem:[%s7863_s13 + $0xd8] sm:$0xff] }
  0xb6   : > { %v1234_v22 = vrot.slane %v1233_v15, 4  ;;  %793 = vst [vmem:[#allocation2 + $0x44] sm:$0x1] %v792_v21  ;;  %v643_v23 = vor.u32 %v641_v33, %v640_v9  ;;  %v644_v62 = vrot.slane %v640_v9, 4  ;;  %v648_v41 = vrot.slane %v646_v18, 7 }
  0xb7   : > { %6878 = vmatprep.mubr.bf16.mxu0 %v6178_v53  ;;  %v1244_v0 = vrot.slane %v1243_v19, 4  ;;  %v519_v27 = vshrl.u32 %v8077_v51, 16  ;;  %v522_v34 = vshll.u32 %v8077_v51, 16  ;;  %v527_v29 = vshrl.u32 %v8081_v57, 16 }
  0xb8   : > { %v8137_v26 = vld [vmem:[#allocation2 + $0x3c] sm:$0xf]  ;;  %v1239_v50 = vsel %vm7879_vm7, %v1234_v22, %v1238_v42  ;;  %v651_v38 = vor.u32 %v649_v10, %v648_v41  ;;  %v653_v40 = vrot.slane %v648_v41, 4  ;;  %v844_v43 = vsel %vm7892_vm9, %v643_v23, %v843_v63  ;;  %v315_v63 = vld [vmem:[%s7863_s13 + $0x68] sm:$0xff] }
  0xb9   : > { %v1059_v35 = vshrl.u32 %v8137_v26, 16  ;;  %v1062_v36 = vshll.u32 %v8137_v26, 16  ;;  %v1249_v39 = vsel %vm7879_vm7, %v1244_v0, %v1248_v13  ;;  %v521_v51 = vrot.slane %v519_v27, 7  ;;  %845 = vst [vmem:[#allocation2 + $0x9c] sm:$0xf] %v844_v43  ;;  %v314_v10 = vld [vmem:[%s7863_s13 + $0x60] sm:$0xff] }
  0xba   : > { %v6186_v46 = vcombine.low %v1239_v50, %v1249_v39  ;;  %v8150_v48 = vld [vmem:[#allocation2 + $0x40] sm:$0xf]  ;;  %v652_v52 = vsel %vm7885_vm8, %v644_v62, %v651_v38  ;;  %v848_v61 = vsel %vm7900_vm10, %v653_v40, %v847_v25  ;;  %v529_v5 = vrot.slane %v527_v29, 7  ;;  %v850_v38 = vld [vmem:[#allocation2 + $0xa8] sm:$0xf] }
  0xbb   : > { %v1061_v16 = vrot.slane %v1059_v35, 4  ;;  %v1064_v33 = vrot.slane %v1062_v36, 5  ;;  %v1068_v45 = vshll.u32 %v8150_v48, 16  ;;  %v1072_v60 = vshrl.u32 %v8150_v48, 16  ;;  %846 = vst [vmem:[#allocation2 + $0xa0] sm:$0xf] %v652_v52 }
  0xbc   : > { %v524_v2 = vor.u32 %v522_v34, %v521_v51  ;;  %6894 = vmatprep.mubr.bf16.mxu1 %v6186_v46  ;;  %849 = vst [vmem:[#allocation2 + $0xa4] sm:$0x1] %v848_v61  ;;  %v525_v4 = vrot.slane %v521_v51, 4  ;;  %v530_v6 = vshll.u32 %v8081_v57, 16  ;;  %v6504_v54 = vpack.c.bf16 %v328_v59, %v328_v59  ;;  %v331_v61 = vld [vmem:[%s7863_s13 + $0xe8] sm:$0xff] }
  0xbd   : > { %v1065_v49 = vor.u32 %v1064_v33, %v1061_v16  ;;  %v8161_v8 = vld [vmem:[#allocation2 + $0x44] sm:$0x1]  ;;  %v1070_v42 = vrot.slane %v1068_v45, 5  ;;  %v1074_v11 = vrot.slane %v1072_v60, 4  ;;  %v534_v18 = vrot.slane %v529_v5, 4  ;;  %v330_v33 = vld [vmem:[%s7863_s13 + $0xe0] sm:$0xff] }
  0xbe   : > { %v795_v13 = vsel %vm7892_vm9, %v524_v2, %v794_v32  ;;  %v1078_v15 = vshll.u32 %v8161_v8, 16  ;;  %v532_v9 = vor.u32 %v530_v6, %v529_v5  ;;  %v6505_v19 = vpack.c.bf16 %v329_v7, %v329_v7 }
  0xbf   : > { %v1066_v14 = vrot.slane %v1065_v49, 4  ;;  %796 = vst [vmem:[#allocation2 + $0x48] sm:$0xf] %v795_v13  ;;  %v1075_v53 = vor.u32 %v1074_v11, %v1070_v42  ;;  %v655_v57 = vshrl.u32 %v6504_v54, 16  ;;  %v658_v21 = vshll.u32 %v6504_v54, 16 }
  0xc0   : > { %v1080_v23 = vrot.slane %v1078_v15, 5  ;;  %v533_v62 = vsel %vm7885_vm8, %v525_v4, %v532_v9  ;;  %v799_v41 = vsel %vm7900_vm10, %v534_v18, %v798_v3  ;;  %v8174_v0 = vld [vmem:[#allocation2 + $0x9c] sm:$0xf]  ;;  %v663_v34 = vshrl.u32 %v6505_v19, 16  ;;  %v854_v13 = vld [vmem:[#allocation2 + $0xb0] sm:$0x1] }
  0xc1   : > { %v1071_v22 = vsel %vm7879_vm7, %v1066_v14, %v1070_v42  ;;  %v1076_v25 = vrot.slane %v1075_v53, 4  ;;  %10405 = vst [vmem:[#allocation19_spill] sm:$0xff] %v8174_v0  ;;  %797 = vst [vmem:[#allocation2 + $0x4c] sm:$0xf] %v533_v62  ;;  %v657_v27 = vrot.slane %v655_v57, 7  ;;  %v666_v29 = vshll.u32 %v6505_v19, 16 }
  0xc2   : > { %800 = vst [vmem:[#allocation2 + $0x50] sm:$0x1] %v799_v41  ;;  %v8176_v50 = vld [vmem:[#allocation2 + $0xa0] sm:$0xf]  ;;  %v1251_v35 = vshrl.u32 %v8174_v0, 16  ;;  %v1254_v36 = vshll.u32 %v8174_v0, 16  ;;  %v8180_v32 = vpack.c.bf16 %v314_v10, %v314_v10  ;;  %v8182_v39 = vpack.c.bf16 %v315_v63, %v315_v63 }
  0xc3   : > { %10406 = vst [vmem:[#allocation20_spill] sm:$0xff] %v8176_v50  ;;  %v1081_v40 = vsel %vm7879_vm7, %v1076_v25, %v1080_v23  ;;  %v8186_v43 = vld [vmem:[#allocation2 + $0xa4] sm:$0x1]  ;;  %v1260_v51 = vshll.u32 %v8176_v50, 16  ;;  %v1264_v46 = vshrl.u32 %v8176_v50, 16  ;;  %v660_v16 = vor.u32 %v658_v21, %v657_v27 }
  0xc4   : > { %v6179_v52 = vcombine.low %v1071_v22, %v1081_v40  ;;  %v1253_v59 = vrot.slane %v1251_v35, 4  ;;  %v1256_v45 = vrot.slane %v1254_v36, 5  ;;  %v1270_v60 = vshll.u32 %v8186_v43, 16 }
  0xc5   : > { %v1262_v2 = vrot.slane %v1260_v51, 5  ;;  %v1266_v3 = vrot.slane %v1264_v46, 4  ;;  %v661_v4 = vrot.slane %v657_v27, 4  ;;  %v665_v5 = vrot.slane %v663_v34, 7 }
  0xc6   : > { %v8193_v49 = vld [vmem:[#allocation2 + $0x48] sm:$0xf]  ;;  %6879 = vmatmul.mubr.bf16.gmra.mxu0 %v6179_v52  ;;  %v1257_v6 = vor.u32 %v1256_v45, %v1253_v59  ;;  %v1272_v7 = vrot.slane %v1270_v60, 5  ;;  %v851_v9 = vsel %vm7892_vm9, %v660_v16, %v850_v38  ;;  %v6506_v21 = vpack.c.bf16 %v330_v33, %v330_v33  ;;  %v801_v60 = vld [vmem:[#allocation2 + $0x54] sm:$0xf] }
  0xc7   : > { %v1083_v42 = vshrl.u32 %v8193_v49, 16  ;;  %v1086_v11 = vshll.u32 %v8193_v49, 16  ;;  %v1267_v54 = vor.u32 %v1266_v3, %v1262_v2  ;;  %v668_v14 = vor.u32 %v666_v29, %v665_v5  ;;  %852 = vst [vmem:[#allocation2 + $0xa8] sm:$0xf] %v851_v9 }
  0xc8   : > { %v670_v15 = vrot.slane %v665_v5, 4  ;;  %v1258_v18 = vrot.slane %v1257_v6, 4  ;;  %v8199_v53 = vld [vmem:[#allocation2 + $0x4c] sm:$0xf]  ;;  %v8203_v10 = vpack.c.bf16 %v331_v61, %v331_v61  ;;  %v536_v46 = vshrl.u32 %v8180_v32, 16 }
  0xc9   : > { %v8201_v19 = vld [vmem:[#allocation2 + $0x50] sm:$0x1]  ;;  %v1085_v57 = vrot.slane %v1083_v42, 4  ;;  %v1268_v63 = vrot.slane %v1267_v54, 4  ;;  %v1088_v22 = vrot.slane %v1086_v11, 5  ;;  %v1092_v23 = vshll.u32 %v8199_v53, 16 }
  0xca   : > { %v1096_v62 = vshrl.u32 %v8199_v53, 16  ;;  %v1263_v41 = vsel %vm7879_vm7, %v1258_v18, %v1262_v2  ;;  %v1102_v25 = vshll.u32 %v8201_v19, 16  ;;  %v669_v27 = vsel %vm7885_vm8, %v661_v4, %v668_v14  ;;  %v805_v18 = vld [vmem:[#allocation2 + $0x5c] sm:$0x1] }
  0xcb   : > { %v855_v34 = vsel %vm7900_vm10, %v670_v15, %v854_v13  ;;  %v1273_v29 = vsel %vm7879_vm7, %v1268_v63, %v1272_v7  ;;  %v1089_v35 = vor.u32 %v1088_v22, %v1085_v57  ;;  %v1094_v36 = vrot.slane %v1092_v23, 5  ;;  %853 = vst [vmem:[#allocation2 + $0xac] sm:$0xf] %v669_v27 }
  0xcc   : > { %v1098_v38 = vrot.slane %v1096_v62, 4  ;;  %856 = vst [vmem:[#allocation2 + $0xb0] sm:$0x1] %v855_v34  ;;  %v6187_v40 = vcombine.low %v1263_v41, %v1273_v29  ;;  %v1104_v51 = vrot.slane %v1102_v25, 5  ;;  %v539_v16 = vshll.u32 %v8180_v32, 16 }
  0xcd   : > { %v1090_v33 = vrot.slane %v1089_v35, 4  ;;  %v544_v59 = vshrl.u32 %v8182_v39, 16  ;;  %v547_v45 = vshll.u32 %v8182_v39, 16  ;;  %v538_v61 = vrot.slane %v536_v46, 7  ;;  %v857_v29 = vld [vmem:[#allocation2 + $0xb4] sm:$0xf] }
  0xce   : > { %v1099_v52 = vor.u32 %v1098_v38, %v1094_v36  ;;  %6895 = vmatmul.mubr.bf16.gmra.mxu1 %v6187_v40  ;;  %v672_v2 = vshrl.u32 %v6506_v21, 16  ;;  %v675_v3 = vshll.u32 %v6506_v21, 16  ;;  %v680_v4 = vshrl.u32 %v8203_v10, 16  ;;  %v8223_v7 = vld [vmem:[#allocation2 + $0xa8] sm:$0xf] }
  0xcf   : > { %v1095_v5 = vsel %vm7879_vm7, %v1090_v33, %v1094_v36  ;;  %10407 = vst [vmem:[#allocation21_spill] sm:$0xff] %v8223_v7  ;;  %v546_v32 = vrot.slane %v544_v59, 7  ;;  %v683_v42 = vshll.u32 %v8203_v10, 16  ;;  %v1275_v11 = vshrl.u32 %v8223_v7, 16  ;;  %v861_v40 = vld [vmem:[#allocation2 + $0xbc] sm:$0x1] }
  0xd0   : > { %v1100_v6 = vrot.slane %v1099_v52, 4  ;;  %v1278_v39 = vshll.u32 %v8223_v7, 16  ;;  %v541_v13 = vor.u32 %v539_v16, %v538_v61  ;;  %v542_v54 = vrot.slane %v538_v61, 4  ;;  %v7496_v52 = vld [vmem:[#allocation2 + $0x8] sm:$0x1] }
  0xd1   : > { %v549_v15 = vor.u32 %v547_v45, %v546_v32  ;;  %v551_v9 = vrot.slane %v546_v32, 4  ;;  %v674_v57 = vrot.slane %v672_v2, 7  ;;  %v1277_v23 = vrot.slane %v1275_v11, 4  ;;  %v1917_v61 = vld [vmem:[#allocation2] sm:$0xe] }
  0xd2   : > { %v1105_v14 = vsel %vm7879_vm7, %v1100_v6, %v1104_v51  ;;  %v8230_v63 = vld [vmem:[#allocation2 + $0xac] sm:$0xf]  ;;  %v1280_v10 = vrot.slane %v1278_v39, 5  ;;  %v802_v62 = vsel %vm7892_vm9, %v541_v13, %v801_v60  ;;  %v682_v33 = vrot.slane %v680_v4, 7  ;;  %v8245_v11 = vld [vmem:[#allocation2 + $0x14] sm:$0x1] }
  0xd3   : > { %v6180_v21 = vcombine.low %v1095_v5, %v1105_v14  ;;  %10408 = vst [vmem:[#allocation22_spill] sm:$0xff] %v8230_v63  ;;  %v8232_v22 = vld [vmem:[#allocation2 + $0xb0] sm:$0x1]  ;;  %v1284_v41 = vshll.u32 %v8230_v63, 16  ;;  %v1288_v25 = vshrl.u32 %v8230_v63, 16  ;;  %v550_v34 = vsel %vm7885_vm8, %v542_v54, %v549_v15 }
  0xd4   : > { %v1294_v27 = vshll.u32 %v8232_v22, 16  ;;  %803 = vst [vmem:[#allocation2 + $0x54] sm:$0xf] %v802_v62  ;;  %v1281_v35 = vor.u32 %v1280_v10, %v1277_v23  ;;  %804 = vst [vmem:[#allocation2 + $0x58] sm:$0xf] %v550_v34  ;;  %v806_v36 = vsel %vm7900_vm10, %v551_v9, %v805_v18  ;;  %v677_v38 = vor.u32 %v675_v3, %v674_v57 }
  0xd5   : > { %6882 = vmatprep.mubr.bf16.mxu0 %v6180_v21  ;;  %v1286_v51 = vrot.slane %v1284_v41, 5  ;;  %v1290_v46 = vrot.slane %v1288_v25, 4  ;;  %807 = vst [vmem:[#allocation2 + $0x5c] sm:$0x1] %v806_v36  ;;  %v678_v16 = vrot.slane %v674_v57, 4  ;;  %v1973_v59 = vrot.slane %v7496_v52, 5 }
  0xd6   : > { %v1282_v45 = vrot.slane %v1281_v35, 4  ;;  %v858_v60 = vsel %vm7892_vm9, %v677_v38, %v857_v29  ;;  %v1296_v5 = vrot.slane %v1294_v27, 5  ;;  %v685_v6 = vor.u32 %v683_v42, %v682_v33  ;;  %v8248_v39 = vld [vmem:[#allocation2 + $0x4] sm:$0xf]  ;;  %v1918_v57 = vld [vmem:[#allocation2 + $0xc] sm:$0xe] }
  0xd7   : > { %v1291_v2 = vor.u32 %v1290_v46, %v1286_v51  ;;  %v687_v32 = vrot.slane %v682_v33, 4  ;;  %859 = vst [vmem:[#allocation2 + $0xb4] sm:$0xf] %v858_v60  ;;  %vm1966_vm12 = vcmask 1046532   ;;  %v1970_v4 = vrot.slane %v8248_v39, 5 }
  0xd8   : > { %v1287_v13 = vsel %vm7879_vm7, %v1282_v45, %v1286_v51  ;;  %v686_v14 = vsel %vm7885_vm8, %v678_v16, %v685_v6  ;;  %v6222_v9 = vrot.slane %v1917_v61, 9  ;;  %vm8267_vm13 = vmor %vm1965_vm11, %vm1966_vm12  ;;  %v8275_v35 = vld [vmem:[#allocation2 + $0x10] sm:$0xf]  ;;  %v6223_v46 = vrot.slane %v1918_v57, 9  ;;  %v1919_v16 = vld [vmem:[#allocation2 + $0x18] sm:$0xe] }
  0xd9   : > { %v1292_v54 = vrot.slane %v1291_v2, 4  ;;  %v862_v42 = vsel %vm7900_vm10, %v687_v32, %v861_v40  ;;  %860 = vst [vmem:[#allocation2 + $0xb8] sm:$0xf] %v686_v14  ;;  %v1972_v18 = vrot.slane %v1970_v4, 4  ;;  %v1977_v36 = vrot.slane %v8275_v35, 5 }
  0xda   : > { %863 = vst [vmem:[#allocation2 + $0xbc] sm:$0x1] %v862_v42  ;;  %v1971_v60 = vsel %vm8267_vm13, %v6222_v9, %v1970_v4  ;;  %v8287_v32 = vld [vmem:[#allocation2 + $0x1c] sm:$0xf]  ;;  %v6224_v57 = vrot.slane %v1919_v16, 9  ;;  %v10412_v44 = vrot.slane %v8245_v11, 5 }
  0xdb   : > { %v8257_v15 = vld [vmem:[#allocation2 + $0x54] sm:$0xf]  ;;  %v1297_v21 = vsel %vm7879_vm7, %v1292_v54, %v1296_v5  ;;  %v8261_v23 = vld [vmem:[#allocation2 + $0x58] sm:$0xf]  ;;  %v1974_v61 = vsel %vm8267_vm13, %v1972_v18, %v1973_v59  ;;  %v1979_v42 = vrot.slane %v1977_v36, 4  ;;  %v2064_v11 = vrot.slane %v8186_v43, 5 }
  0xdc   : > { %v1107_v10 = vshrl.u32 %v8257_v15, 16  ;;  %v1110_v62 = vshll.u32 %v8257_v15, 16  ;;  %v6188_v25 = vcombine.low %v1287_v13, %v1297_v21  ;;  %v8271_v27 = vld [vmem:[#allocation2 + $0x5c] sm:$0x1]  ;;  %v1116_v34 = vshll.u32 %v8261_v23, 16 }
  0xdd   : > { %v1120_v29 = vshrl.u32 %v8261_v23, 16  ;;  %v1126_v51 = vshll.u32 %v8271_v27, 16  ;;  %v1984_v13 = vrot.slane %v8287_v32, 5  ;;  %v7501_v59 = vld [vmem:[#allocation2] sm:$0xf] }
  0xde   : > { %v1109_v38 = vrot.slane %v1107_v10, 4  ;;  %v1112_v40 = vrot.slane %v1110_v62, 5  ;;  %6898 = vmatprep.mubr.bf16.mxu1 %v6188_v25  ;;  %v1118_v33 = vrot.slane %v1116_v34, 5  ;;  %v8279_v45 = vld [vmem:[#allocation2 + $0xb4] sm:$0xf]  ;;  %v6198_v18 = vcombine.low %v7501_v59, %v8248_v39 }
  0xdf   : > { %v1122_v52 = vrot.slane %v1120_v29, 4  ;;  %10411 = vst [vmem:[#allocation23_spill] sm:$0xff] %v8279_v45  ;;  %v1299_v5 = vshrl.u32 %v8279_v45, 16  ;;  %v1302_v6 = vshll.u32 %v8279_v45, 16  ;;  %v1128_v14 = vrot.slane %v1126_v51, 5 }
  0xe0   : > { %v1113_v2 = vor.u32 %v1112_v40, %v1109_v38  ;;  %v8290_v10 = vld [vmem:[#allocation2 + $0xb8] sm:$0xf]  ;;  %v6238_v62 = vcombine.low %v1971_v60, %v1974_v61  ;;  %v1920_v40 = vld [vmem:[#allocation2 + $0x24] sm:$0xe]  ;;  %v1921_v51 = vld [vmem:[#allocation2 + $0x30] sm:$0xe]  ;;  %v1978_v59 = vsel %vm8267_vm13, %v6223_v46, %v1977_v36 }
  0xe1   : > { %v1123_v54 = vor.u32 %v1122_v52, %v1118_v33  ;;  %v8292_v4 = vld [vmem:[#allocation2 + $0xbc] sm:$0x1]  ;;  %v1301_v9 = vrot.slane %v1299_v5, 4  ;;  %v1304_v34 = vrot.slane %v1302_v6, 5  ;;  %v1308_v29 = vshll.u32 %v8290_v10, 16 }
  0xe2   : > { %v1114_v21 = vrot.slane %v1113_v2, 4  ;;  %v1312_v38 = vshrl.u32 %v8290_v10, 16  ;;  %v1318_v52 = vshll.u32 %v8292_v4, 16  ;;  %v1986_v2 = vrot.slane %v1984_v13, 4  ;;  %v7502_v3 = vld [vmem:[#allocation2 + $0x20] sm:$0x1] }
  0xe3   : > { %v1124_v25 = vrot.slane %v1123_v54, 4  ;;  %v1987_v5 = vrot.slane %v7502_v3, 5  ;;  %v1305_v60 = vor.u32 %v1304_v34, %v1301_v9  ;;  %v1310_v61 = vrot.slane %v1308_v29, 5  ;;  %v1922_v9 = vld [vmem:[#allocation2 + $0x3c] sm:$0xe] }
  0xe4   : > { %v1119_v16 = vsel %vm7879_vm7, %v1114_v21, %v1118_v33  ;;  %v1314_v6 = vrot.slane %v1312_v38, 4  ;;  %v1981_v33 = vsel %vm8267_vm13, %v1979_v42, %v10412_v44  ;;  %v1991_v21 = vrot.slane %v8030_v30, 5 }
  0xe5   : > { %v1129_v39 = vsel %vm7879_vm7, %v1124_v25, %v1128_v14  ;;  %v1306_v31 = vrot.slane %v1305_v60, 4  ;;  %v1320_v3 = vrot.slane %v1318_v52, 5  ;;  %v1985_v14 = vsel %vm8267_vm13, %v6224_v57, %v1984_v13  ;;  %v7503_v57 = vld [vmem:[#allocation2 + $0x2c] sm:$0x1] }
  0xe6   : > { %v6181_v54 = vcombine.low %v1119_v16, %v1129_v39  ;;  %v1315_v37 = vor.u32 %v1314_v6, %v1310_v61  ;;  %v1988_v25 = vsel %vm8267_vm13, %v1986_v2, %v1987_v5  ;;  %v6225_v34 = vrot.slane %v1920_v40, 9  ;;  %v1923_v16 = vld [vmem:[#allocation2 + $0x48] sm:$0xe]  ;;  %v7504_v6 = vld [vmem:[#allocation2 + $0x68] sm:$0x1] }
  0xe7   : > { %v6226_v36 = vrot.slane %v1921_v51, 9  ;;  %v1311_v44 = vsel %vm7879_vm7, %v1306_v31, %v1310_v61  ;;  %v1998_v46 = vrot.slane %v8101_v20, 5  ;;  %v2001_v42 = vrot.slane %v8096_v17, 5 }
  0xe8   : > { %6883 = vmatmul.mubr.bf16.gmra.mxu0 %v6181_v54  ;;  %v1316_v30 = vrot.slane %v1315_v37, 4  ;;  %v1993_v13 = vrot.slane %v1991_v21, 4  ;;  %v1994_v29 = vrot.slane %v7503_v57, 5  ;;  %v2005_v40 = vrot.slane %v8150_v48, 5 }
  0xe9   : > { %6966 = vmatprep.mubr.bf16.mxu0 %v6238_v62  ;;  %v8326_v31 = vsel %vm8267_vm13, %v6226_v36, %v1998_v46  ;;  %v2000_v37 = vrot.slane %v1998_v46, 4  ;;  %v6227_v62 = vrot.slane %v1922_v9, 9  ;;  %v6239_v17 = vcombine.low %v1978_v59, %v1981_v33  ;;  %v1924_v36 = vld [vmem:[#allocation2 + $0x54] sm:$0xe]  ;;  %v7505_v59 = vld [vmem:[#allocation2 + $0xc] sm:$0xf] }
  0xea   : > { %v1321_v51 = vsel %vm7879_vm7, %v1316_v30, %v1320_v3  ;;  %v2007_v2 = vrot.slane %v2005_v40, 4  ;;  %v2008_v5 = vrot.slane %v8161_v8, 5  ;;  %v6240_v39 = vcombine.low %v1985_v14, %v1988_v25  ;;  %v7407_v3 = vld [vmem:[#allocation6 + $0x130] sm:$0xff]  }
  0xeb   : > { %v6189_v52 = vcombine.low %v1311_v44, %v1321_v51  ;;  %v8331_v60 = vsel %vm8267_vm13, %v2000_v37, %v2001_v42  ;;  %v2012_v61 = vrot.slane %v8199_v53, 5  ;;  %v2029_v54 = vrot.slane %v7504_v6, 5  ;;  %v1925_v44 = vld [vmem:[#allocation2 + $0x60] sm:$0xe]  ;;  %v1926_v30 = vld [vmem:[#allocation2 + $0x6c] sm:$0xe] }
  0xec   : > { %v6242_v9 = vcombine.low %v8326_v31, %v8331_v60  ;;  %v6199_v33 = vcombine.low %v7505_v59, %v8275_v35  ;;  %v1992_v8 = vsel %vm8267_vm13, %v6225_v34, %v1991_v21  ;;  %v1995_v14 = vsel %vm8267_vm13, %v1993_v13, %v1994_v29  ;;  %v7411_v21 = vld [vmem:[#allocation6 + $0x128] sm:$0xff]   ;;  %v7406_v59 = vld [vmem:[#allocation6 + $0xf0] sm:$0xff]   ;;  %v7414_v31 = vld [vmem:[#allocation6 + $0xe0] sm:$0xff]  }
  0xed   : > { %6899 = vmatmul.mubr.bf16.gmra.mxu1 %v6189_v52  ;;  %v8343_v25 = vsel %vm8267_vm13, %v6227_v62, %v2005_v40  ;;  %v8347_v46 = vsel %vm8267_vm13, %v2007_v2, %v2008_v5  ;;  %v2015_v35 = vrot.slane %v8201_v19, 5  ;;  %v2019_v42 = vrot.slane %v8261_v23, 5  ;;  %v8353_v29 = vld [vmem:[#allocation2 + $0x64] sm:$0xf]  ;;  %v7508_v52 = vld [vmem:[#allocation2 + $0x18] sm:$0xf] }
  0xee   : > { %6918 = vmatprep.mubr.bf16.mxu1 %v6198_v18  ;;  %v6228_v18 = vrot.slane %v1923_v16, 9  ;;  %v2014_v34 = vrot.slane %v2012_v61, 4  ;;  %v6229_v13 = vrot.slane %v1924_v36, 9  ;;  %v2022_v57 = vrot.slane %v8271_v27, 5  ;;  %v8356_v16 = vld [vmem:[#allocation2 + $0x70] sm:$0xf] }
  0xef   : > { %v2026_v40 = vrot.slane %v8353_v29, 5  ;;  %v2021_v51 = vrot.slane %v2019_v42, 4  ;;  %v6230_v37 = vrot.slane %v1925_v44, 9  ;;  %v6231_v62 = vrot.slane %v1926_v30, 9  ;;  %v8362_v2 = vld [vmem:[#allocation2 + $0x28] sm:$0xf] }
  0xf0   : > { %6967 = vmatmul.mubr.bf16.vlgmr.msra.gmra.mxu0 %v6239_v17  ;;  %v2033_v19 = vrot.slane %v8356_v16, 5  ;;  %v8360_v17 = vld [vmem:[#allocation2 + $0x24] sm:$0xf]  ;;  %v6241_v36 = vcombine.low %v1992_v8, %v1995_v14  ;;  %v8382_v8 = vsel %vm8267_vm13, %v6229_v13, %v2019_v42  ;;  %v1927_v14 = vld [vmem:[#allocation2 + $0x78] sm:$0xe] }
  0xf1   : > { %7047 = vmatpush3.bf16.msra.mxu0 %v8065_v28  ;;  %6970 = vmatprep.mubr.bf16.mxu0 %v6240_v39  ;;  %v6200_v28 = vcombine.low %v7508_v52, %v8287_v32  ;;  %v2028_v5 = vrot.slane %v2026_v40, 4  ;;  %v7511_v39 = vld [vmem:[#allocation2 + $0x74] sm:$0x1]  ;;  %v8374_v52 = vsel %vm8267_vm13, %v6228_v18, %v2012_v61  ;;  %v7415_v30 = vld [vmem:[#allocation6 + $0x120] sm:$0xff]   ;;  %v8390_v61 = vsel %vm8267_vm13, %v6230_v37, %v2026_v40  ;;  %v7410_v40 = vld [vmem:[#allocation6 + $0xe8] sm:$0xff]  }
  0xf2   : > { %7048 = vmatprep.subr.bf16.mxu0 %v7407_v3  ;;  %v2036_v6 = vrot.slane %v7511_v39, 5  ;;  %v2035_v38 = vrot.slane %v2033_v19, 4  ;;  %v8378_v39 = vsel %vm8267_vm13, %v2014_v34, %v2015_v35  ;;  %v8396_v35 = vld [vmem:[#allocation2 + $0x7c] sm:$0xf]  ;;  %v8406_v13 = vsel %vm8267_vm13, %v6231_v62, %v2033_v19  ;;  %v7516_v37 = vld [vmem:[#allocation2 + $0x80] sm:$0x1] }
  0xf3   : > { %v8394_v18 = vsel %vm8267_vm13, %v2028_v5, %v2029_v54  ;;  %v2040_v42 = vrot.slane %v8396_v35, 5  ;;  %v1930_v19 = vld [vmem:[#allocation2 + $0x9c] sm:$0xe]  ;;  %v2043_v34 = vrot.slane %v7516_v37, 5  ;;  %v8431_v44 = vld [vmem:[#allocation2 + $0x84] sm:$0xf] }
  0xf4   : > { %v8410_v54 = vsel %vm8267_vm13, %v2035_v38, %v2036_v6  ;;  %v6232_v38 = vrot.slane %v1927_v14, 9  ;;  %v8435_v62 = vld [vmem:[#allocation2 + $0x90] sm:$0xe]  ;;  %v7518_v37 = vld [vmem:[#allocation2 + $0x88] sm:$0xf]  ;;  %v6235_v32 = vrot.slane %v1930_v19, 9 }
  0xf5   : > { %7049 = vmatpush3.bf16.msra.mxu0 %v7407_v3  ;;  %6919 = vmatmul.mubr.bf16.vlgmr.msra.gmra.mxu1 %v6199_v33  ;;  %v8386_v3 = vsel %vm8267_vm13, %v2021_v51, %v2022_v57  ;;  %v8400_v33 = vld [vmem:[#allocation2 + $0x60] sm:$0xf]  ;;  %v8412_v57 = vld [vmem:[#allocation2 + $0x84] sm:$0xe]  ;;  %v8416_v51 = vld [vmem:[#allocation2 + $0x6c] sm:$0xf] }
  0xf6   : > { %7050 = vmatprep.subr.bf16.mxu0 %v7411_v21  ;;  %6999 = vmatpush3.bf16.msra.mxu1 %v8086_v1  ;;  %v1931_v1 = vld [vmem:[#allocation2 + $0xa8] sm:$0xe]  ;;  %v2047_v5 = vrot.slane %v7518_v37, 5  ;;  %v2061_v14 = vrot.slane %v8176_v50, 5  ;;  %v8446_v27 = vsel %vm8267_vm13, %v6232_v38, %v2040_v42  ;;  %v8448_v60 = vld [vmem:[#allocation2 + $0x8c] sm:$0x1]  ;;  %v10413_v50 = vcombine.low %v8360_v17, %v8362_v2 }
  0xf7   : > { %6922 = vmatprep.mubr.bf16.mxu1 %v6200_v28  ;;  %7000 = vmatprep.subr.bf16.mxu1 %v7406_v59  ;;  %v8420_v28 = vld [vmem:[#allocation2 + $0x78] sm:$0xf]  ;;  %v2788_v38 = vld [vmem:[#allocation2 + $0xc] sm:$0xf]  ;;  %v2071_v6 = vrot.slane %v8232_v22, 5 }
  0xf8   : > { %6971 = vmatmul.mubr.bf16.gmra.mxu0 %v6241_v36  ;;  %v7419_v36 = vld [vmem:[#allocation6 + $0x118] sm:$0xff]   ;;  %v8457_v43 = vsel %vm8267_vm13, %v6235_v32, %v2061_v14  ;;  %v2063_v37 = vrot.slane %v2061_v14, 4  ;;  %v10414_v14 = vcombine.low %v8090_v12, %v8101_v20  ;;  %v2791_v32 = vld [vmem:[#allocation2 + $0x18] sm:$0xf]  ;;  %v10415_v12 = vcombine.low %v8343_v25, %v8347_v46 }
  0xf9   : > { %6974 = vmatprep.mubr.bf16.mxu0 %v6242_v9  ;;  %7051 = vmatpush3.bf16.msra.mxu0 %v7411_v21  ;;  %v2042_v9 = vrot.slane %v2040_v42, 4  ;;  %v6233_v21 = vrot.slane %v8412_v57, 9  ;;  %v2068_v42 = vrot.slane %v8230_v63, 5  ;;  %v7423_v57 = vld [vmem:[#allocation6 + $0x110] sm:$0xff]   ;;  %v2789_v19 = vld [vmem:[#allocation2 + $0x10] sm:$0xf] }
  0xfa   : > { %7052 = vmatprep.subr.bf16.mxu0 %v7415_v30  ;;  %7001 = vmatpush3.bf16.msra.mxu1 %v7406_v59  ;;  %v6236_v59 = vrot.slane %v1931_v1, 9  ;;  %v6234_v1 = vrot.slane %v8435_v62, 9  ;;  %v7418_v63 = vld [vmem:[#allocation6 + $0xd8] sm:$0xff]   ;;  %v8477_v17 = vsel %vm8267_vm13, %v2063_v37, %v2064_v11  ;;  %v2840_v37 = vshll.u32 %v2788_v38, 16 }
  0xfb   : > { %7002 = vmatprep.subr.bf16.mxu1 %v7410_v40  ;;  %v2070_v2 = vrot.slane %v2068_v42, 4  ;;  %v2790_v62 = vld [vmem:[#allocation2 + $0x14] sm:$0x1]  ;;  %v8488_v20 = vsel %vm8267_vm13, %v6233_v21, %v2047_v5  ;;  %v8499_v46 = vld [vmem:[#allocation2 + $0xb4] sm:$0xe]  ;;  %v2846_v21 = vshll.u32 %v2789_v19, 16 }
  0xfc   : > { %v8481_v22 = vsel %vm8267_vm13, %v6236_v59, %v2068_v42  ;;  %v10416_v59 = vcombine.low %v8374_v52, %v8378_v39  ;;  %v2850_v42 = vshrl.u32 %v2789_v19, 16  ;;  %v2794_v39 = vld [vmem:[#allocation2 + $0x24] sm:$0xf]  ;;  %v8508_v19 = vld [vmem:[#allocation2 + $0x20] sm:$0x1]  ;;  %v2856_v45 = vshll.u32 %v2790_v62, 16 }
  0xfd   : > { %7053 = vmatpush3.bf16.msra.mxu0 %v7415_v30  ;;  %6923 = vmatmul.mubr.bf16.gmra.mxu1 %v10413_v50  ;;  %v2054_v30 = vrot.slane %v8118_v56, 5  ;;  %v8473_v50 = vsel %vm8267_vm13, %v2042_v9, %v2043_v34  ;;  %v2049_v34 = vrot.slane %v2047_v5, 4  ;;  %v2792_v9 = vld [vmem:[#allocation2 + $0x1c] sm:$0xf]  ;;  %v8497_v25 = vsel %vm8267_vm13, %v2070_v2, %v2071_v6 }
  0xfe   : > { %7054 = vmatprep.subr.bf16.mxu0 %v7419_v36  ;;  %6926 = vmatprep.mubr.bf16.mxu1 %v10414_v14  ;;  %10417 = vst [vmem:[#allocation24_spill] sm:$0xff] %v8497_v25  ;;  %v2057_v14 = vrot.slane %v8120_v58, 5  ;;  %v6248_v6 = vcombine.low %v8446_v27, %v8473_v50  ;;  %v2842_v2 = vrot.slane %v2840_v37, 5  ;;  %v2075_v58 = vrot.slane %v8290_v10, 5  ;;  %v8695_v27 = vld [vmem:[#allocation2 + $0x70] sm:$0xf] }
  0xff   : > { %7003 = vmatpush3.bf16.msra.mxu1 %v7410_v40  ;;  %v2837_v40 = vshrl.u32 %v2788_v38, 16  ;;  %v2056_v5 = vrot.slane %v2054_v30, 4  ;;  %v2852_v38 = vrot.slane %v2850_v42, 4  ;;  %v2861_v7 = vshrl.u32 %v2791_v32, 16 }
 0x100   : > { %6975 = vmatmul.mubr.bf16.gmra.mxu0 %v10415_v12  ;;  %7004 = vmatprep.subr.bf16.mxu1 %v7414_v31  ;;  %v7427_v12 = vld [vmem:[#allocation6 + $0x108] sm:$0xff]   ;;  %v2864_v0 = vshll.u32 %v2791_v32, 16  ;;  %v2870_v11 = vshll.u32 %v2792_v9, 16  ;;  %v2874_v25 = vshrl.u32 %v2792_v9, 16  ;;  %v10418_v37 = vcombine.low %v8137_v26, %v8150_v48  ;;  %v7431_v26 = vld [vmem:[#allocation6 + $0x100] sm:$0xff]  }
 0x101   : > { %6978 = vmatprep.mubr.bf16.mxu0 %v10416_v59  ;;  %7055 = vmatpush3.bf16.msra.mxu0 %v7419_v36  ;;  %v2839_v52 = vrot.slane %v2837_v40, 4  ;;  %v7422_v36 = vld [vmem:[#allocation6 + $0xd0] sm:$0xff]   ;;  %v8506_v59 = vrot.slane %v2846_v21, 5  ;;  %v10419_v21 = vrot.slane %v8448_v60, 5  ;;  %v8523_v62 = vsel %vm8267_vm13, %v6234_v1, %v2054_v30  ;;  %v7426_v32 = vld [vmem:[#allocation6 + $0xc8] sm:$0xff]  }
 0x102   : > { %7056 = vmatprep.subr.bf16.mxu0 %v7423_v57  ;;  %v6237_v9 = vrot.slane %v8499_v46, 9  ;;  %v8530_v48 = vld [vmem:[#allocation2 + $0x28] sm:$0xf]  ;;  %v10420_v60 = vcombine.low %v8193_v49, %v8199_v53  ;;  %v2863_v1 = vrot.slane %v2861_v7, 4  ;;  %v2866_v30 = vrot.slane %v2864_v0, 5 }
 0x103   : > { %7005 = vmatpush3.bf16.msra.mxu1 %v7414_v31  ;;  %v2843_v40 = vor.u32 %v2842_v2, %v2839_v52  ;;  %v2853_v31 = vor.u32 %v2852_v38, %v8506_v59  ;;  %v8519_v42 = vsel %vm8267_vm13, %v2049_v34, %v10419_v21  ;;  %v2078_v34 = vrot.slane %v8292_v4, 5  ;;  %v2797_v2 = vld [vmem:[#allocation2 + $0x30] sm:$0xf]  ;;  %v8540_v21 = vld [vmem:[#allocation2 + $0x34] sm:$0xf] }
 0x104   : > { %7006 = vmatprep.subr.bf16.mxu1 %v7418_v63  ;;  %v2885_v52 = vshrl.u32 %v2794_v39, 16  ;;  %v2077_v46 = vrot.slane %v2075_v58, 4  ;;  %v2880_v38 = vshll.u32 %v8508_v19, 16  ;;  %v10422_v49 = vcombine.low %v8390_v61, %v8394_v18  ;;  %v7430_v18 = vld [vmem:[#allocation6 + $0xc0] sm:$0xff]  }
 0x105   : > { %7057 = vmatpush3.bf16.msra.mxu0 %v7423_v57  ;;  %6927 = vmatmul.mubr.bf16.gmra.mxu1 %v10418_v37  ;;  %v8527_v57 = vsel %vm8267_vm13, %v2056_v5, %v2057_v14  ;;  %v10421_v5 = vcombine.low %v8382_v8, %v8386_v3  ;;  %v2858_v14 = vrot.slane %v2856_v45, 5  ;;  %v2888_v37 = vshll.u32 %v2794_v39, 16  ;;  %v8551_v8 = vld [vmem:[#allocation6 + $0x1b8] sm:$0xff]  }
 0x106   : > { %7058 = vmatprep.subr.bf16.mxu0 %v7427_v12  ;;  %6930 = vmatprep.mubr.bf16.mxu1 %v10420_v60  ;;  %v2844_v0 = vrot.slane %v2843_v40, 4  ;;  %v2854_v53 = vrot.slane %v2853_v31, 4  ;;  %v8545_v7 = vrot.slane %v2870_v11, 5  ;;  %v6249_v4 = vcombine.low %v8488_v20, %v8519_v42  ;;  %v8563_v31 = vld [vmem:[#allocation2 + $0x2c] sm:$0x1] }
 0x107   : > { %7007 = vmatpush3.bf16.msra.mxu1 %v7418_v63  ;;  %v2876_v63 = vrot.slane %v2874_v25, 4  ;;  %v6250_v45 = vcombine.low %v8523_v62, %v8527_v57  ;;  %v2894_v3 = vshll.u32 %v8530_v48, 16  ;;  %v2898_v61 = vshrl.u32 %v8530_v48, 16 }
 0x108   : > { %6979 = vmatmul.mubr.bf16.gmra.mxu0 %v10421_v5  ;;  %7008 = vmatprep.subr.bf16.mxu1 %v7422_v36  ;;  %v2887_v39 = vrot.slane %v2885_v52, 4  ;;  %v2890_v11 = vrot.slane %v2888_v37, 5  ;;  %v2909_v19 = vshrl.u32 %v2797_v2, 16  ;;  %v8557_v25 = vsel %vm8267_vm13, %v6237_v9, %v2075_v58  ;;  %v8589_v37 = vld [vmem:[#allocation6 + $0x178] sm:$0xff]  }
 0x109   : > { %6982 = vmatprep.mubr.bf16.mxu0 %v10422_v49  ;;  %7059 = vmatpush3.bf16.msra.mxu0 %v7427_v12  ;;  %v2867_v12 = vor.u32 %v2866_v30, %v2863_v1  ;;  %v8561_v40 = vsel %vm8267_vm13, %v2077_v46, %v2078_v34  ;;  %v2912_v60 = vshll.u32 %v2797_v2, 16  ;;  %v2918_v5 = vshll.u32 %v8540_v21, 16  ;;  %v8566_v49 = vld [vmem:[#allocation2 + $0x40] sm:$0xf]  ;;  %v8576_v30 = vld [vmem:[#allocation2 + $0x38] sm:$0x1] }
 0x10a   : > { %7060 = vmatprep.subr.bf16.mxu0 %v7431_v26  ;;  %v2849_v1 = vsel %vm7879_vm7, %v2844_v0, %v8506_v59  ;;  %v2859_v58 = vsel %vm7879_vm7, %v2854_v53, %v2858_v14  ;;  %v2877_v9 = vor.u32 %v2876_v63, %v8545_v7  ;;  %v8574_v34 = vrot.slane %v2880_v38, 5 }
 0x10b   : > { %7009 = vmatpush3.bf16.msra.mxu1 %v7422_v36  ;;  %v2800_v36 = vld [vmem:[#allocation2 + $0x3c] sm:$0xf]  ;;  %v10423_v52 = vcombine.low %v8257_v15, %v8261_v23  ;;  %v2900_v2 = vrot.slane %v2898_v61, 4  ;;  %v2911_v46 = vrot.slane %v2909_v19, 4  ;;  %v2914_v59 = vrot.slane %v2912_v60, 5 }
 0x10c   : > { %7010 = vmatprep.subr.bf16.mxu1 %v7426_v32  ;;  %v10424_v14 = vcombine.low %v8400_v33, %v8353_v29  ;;  %v8587_v38 = vrot.slane %v2867_v12, 4  ;;  %v2891_v0 = vor.u32 %v2890_v11, %v2887_v39  ;;  %v2922_v15 = vshrl.u32 %v8540_v21, 16 }
 0x10d   : > { %7061 = vmatpush3.bf16.msra.mxu0 %v7431_v26  ;;  %6931 = vmatmul.mubr.bf16.gmra.mxu1 %v10423_v52  ;;  %v8582_v26 = vrot.slane %v2894_v3, 5  ;;  %v2933_v23 = vshrl.u32 %v2800_v36, 16  ;;  %v10425_v53 = vcombine.low %v8406_v13, %v8410_v54  ;;  %v8597_v3 = vcombine.low %v2849_v1, %v2859_v58  ;;  %v2803_v54 = vld [vmem:[#allocation2 + $0x48] sm:$0xf]  ;;  %v8621_v58 = vld [vmem:[#allocation2 + $0x44] sm:$0x1] }
 0x10e   : > { %7142 = vmatprep.subr.bf16.mxu0 %v8551_v8  ;;  %6934 = vmatprep.mubr.bf16.mxu1 %v10424_v14  ;;  %v8599_v29 = vrot.slane %v2918_v5, 5  ;;  %v2936_v33 = vshll.u32 %v2800_v36, 16  ;;  %v2924_v61 = vrot.slane %v2922_v15, 4  ;;  %v2942_v13 = vshll.u32 %v8566_v49, 16  ;;  %v8608_v5 = vld [vmem:[#allocation2 + $0x4c] sm:$0xf] }
 0x10f   : > { %7011 = vmatpush3.bf16.msra.mxu1 %v7426_v32  ;;  %v2904_v32 = vshll.u32 %v8563_v31, 16  ;;  %v2935_v12 = vrot.slane %v2933_v23, 4  ;;  %v2901_v39 = vor.u32 %v2900_v2, %v8582_v26  ;;  %v2915_v11 = vor.u32 %v2914_v59, %v2911_v46  ;;  %v2806_v46 = vld [vmem:[#allocation2 + $0x54] sm:$0xf]  ;;  %v8628_v15 = vld [vmem:[#allocation2 + $0x58] sm:$0xf] }
 0x110   : > { %6983 = vmatmul.mubr.bf16.gmra.mxu0 %v10425_v53  ;;  %7012 = vmatprep.subr.bf16.mxu1 %v7430_v18  ;;  %v2928_v19 = vshll.u32 %v8576_v30, 16  ;;  %v2938_v60 = vrot.slane %v2936_v33, 5  ;;  %v8614_v50 = vrot.slane %v2877_v9, 4  ;;  %v2946_v36 = vshrl.u32 %v8566_v49, 16  ;;  %10426 = vst [vmem:[#allocation25_spill] sm:$0xff] %v8628_v15 }
 0x111   : > { %6986 = vmatprep.mubr.bf16.mxu0 %v6248_v6  ;;  %v8616_v6 = vrot.slane %v2891_v0, 4  ;;  %v2925_v1 = vor.u32 %v2924_v61, %v8599_v29  ;;  %v2957_v2 = vshrl.u32 %v2803_v54, 16  ;;  %v8623_v59 = vrot.slane %v2904_v32, 5 }
 0x112   : > { %v2939_v52 = vor.u32 %v2938_v60, %v2935_v12  ;;  %v8625_v14 = vrot.slane %v2942_v13, 5  ;;  %v2948_v9 = vrot.slane %v2946_v36, 4  ;;  %v2966_v0 = vshll.u32 %v8608_v5, 16  ;;  %v2809_v12 = vld [vmem:[#allocation2 + $0x60] sm:$0xf] }
 0x113   : > { %7013 = vmatpush3.bf16.msra.mxu1 %v7430_v18  ;;  %v2960_v18 = vshll.u32 %v2803_v54, 16  ;;  %v10427_v23 = vcombine.low %v8416_v51, %v8356_v16  ;;  %v8633_v53 = vrot.slane %v2901_v39, 4  ;;  %v8635_v33 = vrot.slane %v2915_v11, 4  ;;  %v8652_v39 = vld [vmem:[#allocation2 + $0x50] sm:$0x1] }
 0x114   : > { %7094 = vmatprep.subr.bf16.mxu1 %v8589_v37  ;;  %v8637_v61 = vrot.slane %v2928_v19, 5  ;;  %v2970_v32 = vshrl.u32 %v8608_v5, 16  ;;  %v10428_v13 = vcombine.low %v8420_v28, %v8396_v35  ;;  %v2952_v51 = vshll.u32 %v8621_v58, 16 }
 0x115   : > { %6935 = vmatmul.mubr.bf16.gmra.mxu1 %v10427_v23  ;;  %v2981_v11 = vshrl.u32 %v2806_v46, 16  ;;  %v8657_v35 = vrot.slane %v2925_v1, 4  ;;  %v8659_v28 = vrot.slane %v2939_v52, 4  ;;  %v2959_v19 = vrot.slane %v2957_v2, 4  ;;  %v8681_v1 = vld [vmem:[#allocation2 + $0x68] sm:$0x1] }
 0x116   : > { %6938 = vmatprep.mubr.bf16.mxu1 %v10428_v13  ;;  %v2962_v60 = vrot.slane %v2960_v18, 5  ;;  %v2949_v36 = vor.u32 %v2948_v9, %v8625_v14  ;;  %v8665_v23 = vrot.slane %v2966_v0, 5  ;;  %v2972_v13 = vrot.slane %v2970_v32, 4  ;;  %10430 = vst [vmem:[#allocation27_spill] sm:$0xff] %v8681_v1  ;;  %v2812_v9 = vld [vmem:[#allocation2 + $0x6c] sm:$0xf] }
 0x117   : > { %v2984_v63 = vshll.u32 %v2806_v46, 16  ;;  %v2990_v62 = vshll.u32 %v8628_v15, 16  ;;  %v2994_v57 = vshrl.u32 %v8628_v15, 16  ;;  %v2954_v52 = vrot.slane %v2952_v51, 5 }
 0x118   : > { %6987 = vmatmul.mubr.bf16.gmra.mxu0 %v6249_v4  ;;  %v8675_v4 = vld [vmem:[#allocation2 + $0x5c] sm:$0x1]  ;;  %v2983_v2 = vrot.slane %v2981_v11, 4  ;;  %v3005_v46 = vshrl.u32 %v2809_v12, 16  ;;  %v2931_v0 = vsel %vm7879_vm7, %v8657_v35, %v8637_v61  ;;  %v2945_v32 = vsel %vm7879_vm7, %v8659_v28, %v8625_v14 }
 0x119   : > { %6990 = vmatprep.mubr.bf16.mxu0 %v6250_v45  ;;  %v8679_v45 = vld [vmem:[#allocation2 + $0x64] sm:$0xf]  ;;  %v2986_v18 = vrot.slane %v2984_v63, 5  ;;  %v2976_v42 = vshll.u32 %v8652_v39, 16  ;;  %v8692_v16 = vrot.slane %v2990_v62, 5  ;;  %v2950_v20 = vrot.slane %v2949_v36, 4 }
 0x11a   : > { %10429 = vst [vmem:[#allocation26_spill] sm:$0xff] %v8679_v45  ;;  %v2963_v51 = vor.u32 %v2962_v60, %v2959_v19  ;;  %v2973_v63 = vor.u32 %v2972_v13, %v8665_v23  ;;  %v2996_v11 = vrot.slane %v2994_v57, 4  ;;  %v10431_v54 = vcombine.low %v8431_v44, %v8079_v55  ;;  %v8708_v62 = vld [vmem:[#allocation2 + $0x74] sm:$0x1] }
 0x11b   : > { %v3007_v61 = vrot.slane %v3005_v46, 4  ;;  %v3008_v35 = vshll.u32 %v2809_v12, 16  ;;  %v3014_v15 = vshll.u32 %v8679_v45, 16  ;;  %v3018_v14 = vshrl.u32 %v8679_v45, 16 }
 0x11c   : > { %v10432_v28 = vcombine.low %v8112_v47, %v8118_v56  ;;  %v2987_v19 = vor.u32 %v2986_v18, %v2983_v2  ;;  %v2997_v60 = vor.u32 %v2996_v11, %v8692_v16  ;;  %v3000_v36 = vshll.u32 %v8675_v4, 16  ;;  %v10434_v47 = vld [vmem:[#allocation24_spill] sm:$0xff] }
 0x11d   : > { %6939 = vmatmul.mubr.bf16.gmra.mxu1 %v10431_v54  ;;  %v3024_v13 = vshll.u32 %v8681_v1, 16  ;;  %v10433_v55 = vcombine.low %v8457_v43, %v8477_v17  ;;  %v3010_v44 = vrot.slane %v3008_v35, 5  ;;  %v8713_v12 = vrot.slane %v3014_v15, 5  ;;  %v2815_v15 = vld [vmem:[#allocation2 + $0x78] sm:$0xf] }
 0x11e   : > { %6942 = vmatprep.mubr.bf16.mxu1 %v10432_v28  ;;  %v3020_v54 = vrot.slane %v3018_v14, 4  ;;  %v3029_v57 = vshrl.u32 %v2812_v9, 16  ;;  %v10435_v56 = vcombine.low %v8481_v22, %v10434_v47  ;;  %v2955_v2 = vsel %vm7879_vm7, %v2950_v20, %v2954_v52  ;;  %v8724_v52 = vld [vmem:[#allocation2 + $0x7c] sm:$0xf] }
 0x11f   : > { %v2964_v18 = vrot.slane %v2963_v51, 4  ;;  %v2978_v46 = vrot.slane %v2976_v42, 5  ;;  %v3032_v11 = vshll.u32 %v2812_v9, 16  ;;  %v2974_v28 = vrot.slane %v2973_v63, 4 }
 0x120   : > { %6991 = vmatmul.mubr.bf16.gmra.mxu0 %v10433_v55  ;;  %v3011_v1 = vor.u32 %v3010_v44, %v3007_v61  ;;  %v3021_v43 = vor.u32 %v3020_v54, %v8713_v12  ;;  %v3038_v17 = vshll.u32 %v8695_v27, 16  ;;  %v3002_v35 = vrot.slane %v3000_v36, 5  ;;  %v10436_v61 = vld [vmem:[#allocation19_spill] sm:$0xff]  ;;  %v10437_v44 = vld [vmem:[#allocation20_spill] sm:$0xff] }
 0x121   : > { %6994 = vmatprep.mubr.bf16.mxu0 %v10435_v56  ;;  %v3031_v14 = vrot.slane %v3029_v57, 4  ;;  %v3034_v55 = vrot.slane %v3032_v11, 5  ;;  %v3042_v45 = vshrl.u32 %v8695_v27, 16  ;;  %v2988_v22 = vrot.slane %v2987_v19, 4  ;;  %v10441_v57 = vld [vmem:[#allocation21_spill] sm:$0xff] }
 0x122   : > { %v2998_v47 = vrot.slane %v2997_v60, 4  ;;  %v3026_v56 = vrot.slane %v3024_v13, 5  ;;  %v3048_v20 = vshll.u32 %v8708_v62, 16  ;;  %v3012_v42 = vrot.slane %v3011_v1, 4 }
 0x123   : > { %v8726_v9 = vrot.slane %v3038_v17, 5  ;;  %v3044_v51 = vrot.slane %v3042_v45, 4  ;;  %v3053_v63 = vshrl.u32 %v2815_v15, 16  ;;  %v10438_v54 = vcombine.low %v10436_v61, %v10437_v44  ;;  %v10442_v45 = vld [vmem:[#allocation22_spill] sm:$0xff]  ;;  %v8763_v61 = vld [vmem:[#allocation2 + $0x80] sm:$0x1] }
 0x124   : > { %v10439_v19 = vsel %vm7879_vm7, %v8614_v50, %v8574_v34  ;;  %v10440_v60 = vsel %vm7879_vm7, %v8587_v38, %v8545_v7  ;;  %v3022_v1 = vrot.slane %v3021_v43, 4  ;;  %v3056_v13 = vshll.u32 %v2815_v15, 16  ;;  %v7439_v44 = vld [vmem:[#allocation6 + $0x1b0] sm:$0xff]  }
 0x125   : > { %6943 = vmatmul.mubr.bf16.gmra.mxu1 %v10438_v54  ;;  %v6287_v36 = vcombine.low %v10440_v60, %v10439_v19  ;;  %v10443_v11 = vcombine.low %v10441_v57, %v10442_v45  ;;  %v10444_v17 = vsel %vm7879_vm7, %v8633_v53, %v8623_v59  ;;  %v10445_v34 = vsel %vm7879_vm7, %v8616_v6, %v8582_v26  ;;  %v10448_v60 = vld [vmem:[#allocation23_spill] sm:$0xff]  ;;  %v8807_v45 = vld [vmem:[#allocation2 + $0x8c] sm:$0x1] }
 0x126   : > { %v6288_v50 = vcombine.low %v10445_v34, %v10444_v17  ;;  %v10446_v7 = vsel %vm7879_vm7, %v8635_v33, %v8599_v29  ;;  %v8761_v43 = vcombine.low %v2945_v32, %v2955_v2  ;;  %v3035_v15 = vor.u32 %v3034_v55, %v3031_v14  ;;  %v2818_v33 = vld [vmem:[#allocation2 + $0x84] sm:$0xf]  ;;  %v8780_v2 = vld [vmem:[#allocation2 + $0x88] sm:$0xf]  ;;  %v8789_v14 = vld [vmem:[#allocation2 + $0x94] sm:$0xf] }
 0x127   : > { %6946 = vmatprep.mubr.bf16.mxu1 %v10443_v11  ;;  %v8759_v38 = vcombine.low %v10446_v7, %v2931_v0  ;;  %v10447_v59 = vcombine.low %v8557_v25, %v8561_v40  ;;  %v2969_v26 = vsel %vm7879_vm7, %v2964_v18, %v8665_v23  ;;  %v2979_v6 = vsel %vm7879_vm7, %v2974_v28, %v2978_v46  ;;  %v2821_v23 = vld [vmem:[#allocation2 + $0x90] sm:$0xf]  ;;  %v2824_v34 = vld [vmem:[#allocation2 + $0x9c] sm:$0xf] }
 0x128   : > { %v3055_v53 = vrot.slane %v3053_v63, 4  ;;  %v3058_v29 = vrot.slane %v3056_v13, 5  ;;  %v2993_v0 = vsel %vm7879_vm7, %v2988_v22, %v8692_v16  ;;  %v3045_v32 = vor.u32 %v3044_v51, %v8726_v9  ;;  %v7432_v18 = vld [vmem:[#allocation2 + $0xc] sm:$0xff]  }
 0x129   : > { %6995 = vmatmul.mubr.bf16.gmra.mxu0 %v10447_v59  ;;  %v3062_v25 = vshll.u32 %v8724_v52, 16  ;;  %v3066_v40 = vshrl.u32 %v8724_v52, 16  ;;  %v3003_v46 = vsel %vm7879_vm7, %v2998_v47, %v3002_v35  ;;  %v3027_v16 = vsel %vm7879_vm7, %v3022_v1, %v3026_v56 }
 0x12a   : > { %7062 = vmatprep.mubr.bf16.mxu0 %v8597_v3  ;;  %v3017_v3 = vsel %vm7879_vm7, %v3012_v42, %v8713_v12  ;;  %v3050_v28 = vrot.slane %v3048_v20, 5  ;;  %v3036_v55 = vrot.slane %v3035_v15, 4  ;;  %v3072_v22 = vshll.u32 %v8763_v61, 16 }
 0x12b   : > { %v3077_v51 = vshrl.u32 %v2818_v33, 16  ;;  %v3080_v63 = vshll.u32 %v2818_v33, 16  ;;  %v8792_v54 = vcombine.low %v2969_v26, %v2979_v6  ;;  %v3059_v19 = vor.u32 %v3058_v29, %v3055_v53  ;;  %v8815_v26 = vld [vmem:[#allocation2 + $0x98] sm:$0x1]  ;;  %v8817_v6 = vld [vmem:[#allocation2 + $0xa0] sm:$0xf] }
 0x12c   : > { %v3086_v35 = vshll.u32 %v8780_v2, 16  ;;  %v3090_v47 = vshrl.u32 %v8780_v2, 16  ;;  %v3046_v12 = vrot.slane %v3045_v32, 4  ;;  %v8796_v42 = vrot.slane %v3062_v25, 5  ;;  %v7433_v53 = vld [vmem:[#allocation2 + $0x18] sm:$0xff]   ;;  %v7443_v29 = vld [vmem:[#allocation6 + $0x1a8] sm:$0xff]  }
 0x12d   : > { %v8798_v56 = vrot.slane %v3066_v40, 4  ;;  %v3101_v20 = vshrl.u32 %v2821_v23, 16  ;;  %v10449_v1 = vcombine.low %v10448_v60, %v8290_v10  ;;  %v8803_v13 = vcombine.low %v2993_v0, %v3003_v46  ;;  %v2827_v46 = vld [vmem:[#allocation2 + $0xa8] sm:$0xf]  ;;  %v8844_v60 = vld [vmem:[#allocation2 + $0xa4] sm:$0x1] }
 0x12e   : > { %v8805_v57 = vcombine.low %v3017_v3, %v3027_v16  ;;  %v3104_v11 = vshll.u32 %v2821_v23, 16  ;;  %v3110_v17 = vshll.u32 %v8789_v14, 16  ;;  %v3041_v7 = vsel %vm7879_vm7, %v3036_v55, %v8726_v9  ;;  %v7436_v9 = vld [vmem:[#allocation2 + $0x24] sm:$0xff]   ;;  %10451 = vst [vmem:[#allocation19_spill] sm:$0xff] %v8844_v60 }
 0x12f   : > { %6947 = vmatmul.mubr.bf16.gmra.mxu1 %v10449_v1  ;;  %v8813_v15 = vrot.slane %v3072_v22, 5  ;;  %v3079_v59 = vrot.slane %v3077_v51, 4  ;;  %v3082_v10 = vrot.slane %v3080_v63, 5  ;;  %v8819_v33 = vrot.slane %v3059_v19, 4  ;;  %v8831_v51 = vld [vmem:[#allocation2 + $0xac] sm:$0xf] }
 0x130   : > { %7014 = vmatprep.mubr.bf16.mxu1 %v7432_v18  ;;  %v8821_v0 = vrot.slane %v3086_v35, 5  ;;  %v3092_v32 = vrot.slane %v3090_v47, 4  ;;  %v3114_v25 = vshrl.u32 %v8789_v14, 16  ;;  %v3051_v40 = vsel %vm7879_vm7, %v3046_v12, %v3050_v28  ;;  %10450 = vst [vmem:[#allocation24_spill] sm:$0xff] %v8831_v51  ;;  %v7447_v35 = vld [vmem:[#allocation6 + $0x1a0] sm:$0xff]  }
 0x131   : > { %7063 = vmatmul.mubr.bf16.vlgmr.msra.gmra.mxu0 %v6287_v36  ;;  %v3069_v23 = vor.u32 %v8798_v56, %v8796_v42  ;;  %v3103_v18 = vrot.slane %v3101_v20, 4  ;;  %v3106_v36 = vrot.slane %v3104_v11, 5  ;;  %v8829_v3 = vrot.slane %v3110_v17, 5  ;;  %v2830_v12 = vld [vmem:[#allocation2 + $0xb4] sm:$0xf] }
 0x132   : > { %7143 = vmatpush3.bf16.msra.mxu0 %v8551_v8  ;;  %7066 = vmatprep.mubr.bf16.mxu0 %v6288_v50  ;;  %v3116_v16 = vrot.slane %v3114_v25, 4  ;;  %v3125_v55 = vshrl.u32 %v2824_v34, 16  ;;  %v3128_v22 = vshll.u32 %v2824_v34, 16  ;;  %v7438_v8 = vld [vmem:[#allocation6 + $0x170] sm:$0xff]   ;;  %v3083_v63 = vor.u32 %v3082_v10, %v3079_v59 }
 0x133   : > { %7144 = vmatprep.subr.bf16.mxu0 %v7439_v44  ;;  %v3096_v50 = vshll.u32 %v8807_v45, 16  ;;  %v3134_v28 = vshll.u32 %v8817_v6, 16  ;;  %v3138_v19 = vshrl.u32 %v8817_v6, 16  ;;  %v8836_v47 = vcombine.low %v3041_v7, %v3051_v40  ;;  %v7442_v7 = vld [vmem:[#allocation6 + $0x168] sm:$0xff]  }
 0x134   : > { %v3093_v56 = vor.u32 %v3092_v32, %v8821_v0  ;;  %v3120_v20 = vshll.u32 %v8815_v26, 16  ;;  %v3127_v1 = vrot.slane %v3125_v55, 4  ;;  %v3130_v11 = vrot.slane %v3128_v22, 5 }
 0x135   : > { %v8846_v17 = vrot.slane %v3134_v28, 5  ;;  %v3140_v34 = vrot.slane %v3138_v19, 4  ;;  %v3107_v59 = vor.u32 %v3106_v36, %v3103_v18  ;;  %v3117_v10 = vor.u32 %v3116_v16, %v8829_v3  ;;  %v7451_v18 = vld [vmem:[#allocation6 + $0x198] sm:$0xff]   ;;  %v8868_v19 = vld [vmem:[#allocation2 + $0xb8] sm:$0xf] }
 0x136   : > { %7145 = vmatpush3.bf16.msra.mxu0 %v7439_v44  ;;  %v3149_v25 = vshrl.u32 %v2827_v46, 16  ;;  %v3152_v40 = vshll.u32 %v2827_v46, 16  ;;  %v8850_v32 = vrot.slane %v3069_v23, 4  ;;  %v8852_v44 = vrot.slane %v3083_v63, 4  ;;  %v8864_v28 = vld [vmem:[#allocation2 + $0xb0] sm:$0x1] }
 0x137   : > { %7015 = vmatmul.mubr.bf16.vlgmr.msra.gmra.mxu1 %v7433_v53  ;;  %7146 = vmatprep.subr.bf16.mxu0 %v7443_v29  ;;  %v8854_v55 = vrot.slane %v3096_v50, 5  ;;  %v3158_v22 = vshll.u32 %v8831_v51, 16  ;;  %v7437_v53 = vld [vmem:[#allocation2 + $0x30] sm:$0xff]   ;;  %v8858_v36 = vrot.slane %v3093_v56, 4  ;;  %v3131_v23 = vor.u32 %v3130_v11, %v3127_v1  ;;  %10452 = vst [vmem:[#allocation20_spill] sm:$0xff] %v8864_v28  ;;  %10453 = vst [vmem:[#allocation21_spill] sm:$0xff] %v8868_v19 }
 0x138   : > { %7095 = vmatpush3.bf16.msra.mxu1 %v8589_v37  ;;  %7018 = vmatprep.mubr.bf16.mxu1 %v7436_v9  ;;  %v3151_v46 = vrot.slane %v3149_v25, 4  ;;  %v3154_v16 = vrot.slane %v3152_v40, 5  ;;  %v3162_v37 = vshrl.u32 %v8831_v51, 16  ;;  %v7440_v9 = vld [vmem:[#allocation2 + $0x3c] sm:$0xff]   ;;  %v3141_v63 = vor.u32 %v3140_v34, %v8846_v17  ;;  %v332_v56 = vld [vmem:[%s7863_s13 + $0xf0] sm:$0xff] }
 0x139   : > { %7067 = vmatmul.mubr.bf16.gmra.mxu0 %v8759_v38  ;;  %7096 = vmatprep.subr.bf16.mxu1 %v7438_v8  ;;  %v3144_v50 = vshll.u32 %v8844_v60, 16  ;;  %v8866_v38 = vrot.slane %v3158_v22, 5  ;;  %v7446_v25 = vld [vmem:[#allocation6 + $0x160] sm:$0xff]   ;;  %v8871_v40 = vrot.slane %v3107_v59, 4  ;;  %v8873_v51 = vrot.slane %v3117_v10, 4 }
 0x13a   : > { %7070 = vmatprep.mubr.bf16.mxu0 %v8761_v43  ;;  %7147 = vmatpush3.bf16.msra.mxu0 %v7443_v29  ;;  %v8875_v43 = vrot.slane %v3120_v20, 5  ;;  %v3164_v29 = vrot.slane %v3162_v37, 4  ;;  %v3075_v1 = vsel %vm7879_vm7, %v8850_v32, %v8813_v15  ;;  %v3155_v11 = vor.u32 %v3154_v16, %v3151_v46  ;;  %v333_v37 = vld [vmem:[%s7863_s13 + $0xf8] sm:$0xff] }
 0x13b   : > { %7148 = vmatprep.subr.bf16.mxu0 %v7447_v35  ;;  %v3173_v34 = vshrl.u32 %v2830_v12, 16  ;;  %v3176_v22 = vshll.u32 %v2830_v12, 16  ;;  %v3089_v59 = vsel %vm7879_vm7, %v8852_v44, %v8821_v0  ;;  %v3099_v20 = vsel %vm7879_vm7, %v8858_v36, %v8854_v55  ;;  %v7455_v55 = vld [vmem:[#allocation6 + $0x190] sm:$0xff]   ;;  %v8901_v36 = vld [vmem:[#allocation2 + $0xbc] sm:$0x1] }
 0x13c   : > { %7097 = vmatpush3.bf16.msra.mxu1 %v7438_v8  ;;  %v3165_v8 = vor.u32 %v3164_v29, %v8866_v38  ;;  %v3168_v10 = vshll.u32 %v8864_v28, 16  ;;  %v3132_v15 = vrot.slane %v3131_v23, 4  ;;  %v3142_v32 = vrot.slane %v3141_v63, 4  ;;  %10454 = vst [vmem:[#allocation22_spill] sm:$0xff] %v8901_v36  ;;  %v7441_v28 = vld [vmem:[#allocation2 + $0x48] sm:$0xff]  }
 0x13d   : > { %7098 = vmatprep.subr.bf16.mxu1 %v7442_v7  ;;  %v3146_v12 = vrot.slane %v3144_v50, 5  ;;  %v3182_v46 = vshll.u32 %v8868_v19, 16  ;;  %v3113_v0 = vsel %vm7879_vm7, %v8871_v40, %v8829_v3  ;;  %v3123_v44 = vsel %vm7879_vm7, %v8873_v51, %v8875_v43  ;;  %v8905_v51 = vld [vmem:[#allocation6 + $0x188] sm:$0xff]  }
 0x13e   : > { %7149 = vmatpush3.bf16.msra.mxu0 %v7447_v35  ;;  %v3186_v35 = vshrl.u32 %v8868_v19, 16  ;;  %v6508_v16 = vpack.c.bf16 %v332_v56, %v332_v56  ;;  %v3156_v23 = vrot.slane %v3155_v11, 4  ;;  %v3175_v63 = vrot.slane %v3173_v34, 4  ;;  %v864_v11 = vld [vmem:[#allocation2 + $0xc0] sm:$0xf] }
 0x13f   : > { %7019 = vmatmul.mubr.bf16.gmra.mxu1 %v7437_v53  ;;  %7150 = vmatprep.subr.bf16.mxu0 %v7451_v18  ;;  %v7450_v53 = vld [vmem:[#allocation6 + $0x158] sm:$0xff]   ;;  %v3178_v50 = vrot.slane %v3176_v22, 5  ;;  %v6509_v29 = vpack.c.bf16 %v333_v37, %v333_v37  ;;  %v3166_v3 = vrot.slane %v3165_v8, 4  ;;  %v3170_v40 = vrot.slane %v3168_v10, 5  ;;  %v8915_v34 = vld [vmem:[#allocation2 + $0xc] sm:$0xe] }
 0x140   : > { %7022 = vmatprep.mubr.bf16.mxu1 %v7440_v9  ;;  %7099 = vmatpush3.bf16.msra.mxu1 %v7442_v7  ;;  %v689_v43 = vshrl.u32 %v6508_v16, 16  ;;  %v692_v60 = vshll.u32 %v6508_v16, 16  ;;  %v3137_v7 = vsel %vm7879_vm7, %v3132_v15, %v8846_v17  ;;  %v3147_v9 = vsel %vm7879_vm7, %v3142_v32, %v3146_v12  ;;  %v7444_v37 = vld [vmem:[#allocation2 + $0x54] sm:$0xff]   ;;  %v3544_v16 = vld [vmem:[#allocation2 + $0x24] sm:$0xe] }
 0x141   : > { %7071 = vmatmul.mubr.bf16.gmra.mxu0 %v8792_v54  ;;  %7100 = vmatprep.subr.bf16.mxu1 %v7446_v25  ;;  %v8913_v56 = vrot.slane %v3182_v46, 5  ;;  %v697_v54 = vshrl.u32 %v6509_v29, 16  ;;  %v3188_v22 = vrot.slane %v3186_v35, 4  ;;  %v3192_v8 = vshll.u32 %v8901_v36, 16  ;;  %v7454_v35 = vld [vmem:[#allocation6 + $0x150] sm:$0xff]  }
 0x142   : > { %7074 = vmatprep.mubr.bf16.mxu0 %v8803_v13  ;;  %7151 = vmatpush3.bf16.msra.mxu0 %v7451_v18  ;;  %v691_v10 = vrot.slane %v689_v43, 7  ;;  %v700_v13 = vshll.u32 %v6509_v29, 16  ;;  %v868_v18 = vld [vmem:[#allocation2 + $0xc8] sm:$0x1]  ;;  %v10455_v17 = vsel %vm7879_vm7, %v8819_v33, %v8796_v42  ;;  %v8925_v32 = vcombine.low %v3089_v59, %v3099_v20  ;;  %v3545_v19 = vld [vmem:[#allocation2 + $0x30] sm:$0xe] }
 0x143   : > { %7152 = vmatprep.subr.bf16.mxu0 %v7455_v55  ;;  %v8923_v15 = vcombine.low %v10455_v17, %v3075_v1  ;;  %v3179_v12 = vor.u32 %v3178_v50, %v3175_v63  ;;  %v699_v46 = vrot.slane %v697_v54, 7  ;;  %v3161_v29 = vsel %vm7879_vm7, %v3156_v23, %v8866_v38  ;;  %v7463_v20 = vld [vmem:[#allocation6 + $0x180] sm:$0xff]   ;;  %v3547_v54 = vld [vmem:[#allocation2 + $0x48] sm:$0xe] }
 0x144   : > { %7101 = vmatpush3.bf16.msra.mxu1 %v7446_v25  ;;  %v3171_v25 = vsel %vm7879_vm7, %v3166_v3, %v3170_v40  ;;  %v694_v43 = vor.u32 %v692_v60, %v691_v10  ;;  %v695_v36 = vrot.slane %v691_v10, 4  ;;  %v8932_v42 = vcombine.low %v3113_v0, %v3123_v44  ;;  %v3546_v0 = vld [vmem:[#allocation2 + $0x3c] sm:$0xe] }
 0x145   : > { %7102 = vmatprep.subr.bf16.mxu1 %v7450_v53  ;;  %v8934_v33 = vcombine.low %v3137_v7, %v3147_v9  ;;  %v702_v1 = vor.u32 %v700_v13, %v699_v46  ;;  %v704_v59 = vrot.slane %v699_v46, 4  ;;  %v3189_v63 = vor.u32 %v3188_v22, %v8913_v56  ;;  %v7445_v22 = vld [vmem:[#allocation2 + $0x60] sm:$0xff]   ;;  %v8959_v13 = vld [vmem:[#allocation2 + $0x14] sm:$0x1] }
 0x146   : > { %7153 = vmatpush3.bf16.msra.mxu0 %v7455_v55  ;;  %v8938_v38 = vrot.slane %v3192_v8, 5  ;;  %v865_v60 = vsel %vm7892_vm9, %v694_v43, %v864_v11  ;;  %v6310_v50 = vrot.slane %v8915_v34, 9  ;;  %v8943_v44 = vcombine.low %v3161_v29, %v3171_v25  ;;  %v7458_v55 = vld [vmem:[#allocation6 + $0x148] sm:$0xff]   ;;  %v8966_v46 = vld [vmem:[#allocation6 + $0x238] sm:$0xff]   ;;  %v7462_v25 = vld [vmem:[#allocation6 + $0x140] sm:$0xff]  }
 0x147   : > { %7023 = vmatmul.mubr.bf16.gmra.mxu1 %v7441_v28  ;;  %7154 = vmatprep.subr.bf16.mxu0 %v8905_v51  ;;  %v8945_v3 = vrot.slane %v3179_v12, 4  ;;  %v703_v40 = vsel %vm7885_vm8, %v695_v36, %v702_v1  ;;  %866 = vst [vmem:[#allocation2 + $0xc0] sm:$0xf] %v865_v60  ;;  %v869_v9 = vsel %vm7900_vm10, %v704_v59, %v868_v18  ;;  %v6312_v8 = vrot.slane %v3544_v16, 9  ;;  %v7448_v16 = vld [vmem:[#allocation2 + $0x6c] sm:$0xff]   ;;  %v7465_v34 = vld [vmem:[#allocation2 + $0x24] sm:$0xff]  }
 0x148   : > { %7026 = vmatprep.mubr.bf16.mxu1 %v7444_v37  ;;  %7103 = vmatpush3.bf16.msra.mxu1 %v7450_v53  ;;  %867 = vst [vmem:[#allocation2 + $0xc4] sm:$0xf] %v703_v40  ;;  %870 = vst [vmem:[#allocation2 + $0xc8] sm:$0x1] %v869_v9  ;;  %v8952_v53 = vld [vmem:[#allocation2 + $0x10] sm:$0xf] }
 0x149   : > { %7075 = vmatmul.mubr.bf16.gmra.mxu0 %v8805_v57  ;;  %7104 = vmatprep.subr.bf16.mxu1 %v7454_v35  ;;  %v3608_v11 = vrot.slane %v8952_v53, 5  ;;  %v3622_v10 = vrot.slane %v8530_v48, 5  ;;  %v3625_v36 = vrot.slane %v8563_v31, 5  ;;  %v3611_v57 = vrot.slane %v8959_v13, 5  ;;  %v3549_v7 = vld [vmem:[#allocation2 + $0x60] sm:$0xe] }
 0x14a   : > { %7078 = vmatprep.mubr.bf16.mxu0 %v8836_v47  ;;  %7155 = vmatpush3.bf16.msra.mxu0 %v8905_v51  ;;  %v6313_v18 = vrot.slane %v3545_v19, 9  ;;  %v3629_v37 = vrot.slane %v8540_v21, 5  ;;  %v3632_v17 = vrot.slane %v8576_v30, 5  ;;  %v8964_v12 = vrot.slane %v3189_v63, 4  ;;  %v3548_v51 = vld [vmem:[#allocation2 + $0x54] sm:$0xe] }
 0x14b   : > { %7156 = vmatprep.subr.bf16.mxu0 %v7463_v20  ;;  %v8970_v48 = vsel %vm8267_vm13, %v6312_v8, %v3622_v10  ;;  %v3624_v31 = vrot.slane %v3622_v10, 4  ;;  %v6314_v47 = vrot.slane %v3546_v0, 9  ;;  %v3636_v30 = vrot.slane %v8566_v49, 5  ;;  %v9020_v8 = vld [vmem:[#allocation6 + $0x1f8] sm:$0xff]   ;;  %v7523_v53 = vld [vmem:[#allocation2 + $0x20] sm:$0x1] }
 0x14c   : > { %7105 = vmatpush3.bf16.msra.mxu1 %v7454_v35  ;;  %v8974_v19 = vsel %vm8267_vm13, %v6313_v18, %v3629_v37  ;;  %v3631_v21 = vrot.slane %v3629_v37, 4  ;;  %v3639_v29 = vrot.slane %v8621_v58, 5  ;;  %v6315_v1 = vrot.slane %v3547_v54, 9 }
 0x14d   : > { %7106 = vmatprep.subr.bf16.mxu1 %v7458_v55  ;;  %v8980_v43 = vsel %vm8267_vm13, %v3624_v31, %v3625_v36  ;;  %v3643_v59 = vrot.slane %v8608_v5, 5  ;;  %v3646_v35 = vrot.slane %v8652_v39, 5  ;;  %v8992_v58 = vsel %vm8267_vm13, %v6314_v47, %v3636_v30  ;;  %v3550_v36 = vld [vmem:[#allocation2 + $0x6c] sm:$0xe]  ;;  %v7449_v31 = vld [vmem:[#allocation2 + $0x78] sm:$0xff]  }
 0x14e   : > { %7157 = vmatpush3.bf16.msra.mxu0 %v7463_v20  ;;  %v6328_v63 = vcombine.low %v8970_v48, %v8980_v43  ;;  %v8988_v49 = vsel %vm8267_vm13, %v3631_v21, %v3632_v17  ;;  %v3638_v23 = vrot.slane %v3636_v30, 4  ;;  %v3185_v5 = vsel %vm7879_vm7, %v8945_v3, %v8913_v56  ;;  %v2833_v20 = vld [vmem:[#allocation2 + $0xc0] sm:$0xf]  ;;  %v10459_v17 = vld [vmem:[#allocation25_spill] sm:$0xff]  ;;  %v7477_v21 = vld [vmem:[#allocation2 + $0x6c] sm:$0xff]  }
 0x14f   : > { %7027 = vmatmul.mubr.bf16.gmra.mxu1 %v7445_v22  ;;  %v3195_v39 = vsel %vm7879_vm7, %v8964_v12, %v8938_v38  ;;  %7238 = vmatprep.subr.bf16.mxu0 %v8966_v46  ;;  %v6329_v60 = vcombine.low %v8974_v19, %v8988_v49  ;;  %v3645_v0 = vrot.slane %v3643_v59, 4  ;;  %v9005_v28 = vld [vmem:[#allocation2 + $0xc4] sm:$0xf]  ;;  %v3197_v40 = vshrl.u32 %v2833_v20, 16  ;;  %v9016_v9 = vld [vmem:[#allocation2 + $0xc8] sm:$0x1] }
 0x150   : > { %7030 = vmatprep.mubr.bf16.mxu1 %v7448_v16  ;;  %7107 = vmatpush3.bf16.msra.mxu1 %v7458_v55  ;;  %v9009_v56 = vsel %vm8267_vm13, %v3638_v23, %v3639_v29  ;;  %v9013_v3 = vsel %vm8267_vm13, %v6315_v1, %v3643_v59  ;;  %v6316_v38 = vrot.slane %v3548_v51, 9  ;;  %v3200_v54 = vshll.u32 %v2833_v20, 16  ;;  %v7452_v30 = vld [vmem:[#allocation2 + $0x84] sm:$0xff]   ;;  %v7482_v49 = vld [vmem:[#allocation6 + $0x1d8] sm:$0xff]  }
 0x151   : > { %7079 = vmatmul.mubr.bf16.gmra.mxu0 %v8923_v15  ;;  %v3206_v55 = vshll.u32 %v9005_v28, 16  ;;  %v3210_v22 = vshrl.u32 %v9005_v28, 16  ;;  %7108 = vmatprep.subr.bf16.mxu1 %v7462_v25  ;;  %v6330_v10 = vcombine.low %v8992_v58, %v9009_v56  ;;  %v3199_v18 = vrot.slane %v3197_v40, 4 }
 0x152   : > { %7082 = vmatprep.mubr.bf16.mxu0 %v8925_v32  ;;  %v3216_v37 = vshll.u32 %v9016_v9, 16  ;;  %v9028_v15 = vsel %vm8267_vm13, %v3645_v0, %v3646_v35  ;;  %v3650_v12 = vrot.slane %v10459_v17, 5  ;;  %v3202_v47 = vrot.slane %v3200_v54, 5  ;;  %v10460_v0 = vld [vmem:[#allocation26_spill] sm:$0xff] }
 0x153   : > { %v9031_v51 = vrot.slane %v3206_v55, 5  ;;  %v3212_v16 = vrot.slane %v3210_v22, 4  ;;  %v3653_v59 = vrot.slane %v8675_v4, 5  ;;  %v6317_v20 = vrot.slane %v3549_v7, 9 }
 0x154   : > { %v9035_v29 = vrot.slane %v3216_v37, 5  ;;  %7109 = vmatpush3.bf16.msra.mxu1 %v7462_v25  ;;  %v9039_v32 = vsel %vm8267_vm13, %v6316_v38, %v3650_v12  ;;  %v3652_v1 = vrot.slane %v3650_v12, 4  ;;  %v3203_v35 = vor.u32 %v3202_v47, %v3199_v18  ;;  %v10461_v25 = vld [vmem:[#allocation27_spill] sm:$0xff] }
 0x155   : > { %v3213_v23 = vor.u32 %v3212_v16, %v9031_v51  ;;  %7190 = vmatprep.subr.bf16.mxu1 %v9020_v8  ;;  %v3657_v40 = vrot.slane %v10460_v0, 5  ;;  %v3660_v55 = vrot.slane %v10461_v25, 5  ;;  %v6318_v22 = vrot.slane %v3550_v36, 9  ;;  %v3551_v37 = vld [vmem:[#allocation2 + $0x78] sm:$0xe] }
 0x156   : > { %v9047_v54 = vsel %vm8267_vm13, %v3652_v1, %v3653_v59  ;;  %v3664_v38 = vrot.slane %v8695_v27, 5  ;;  %v9051_v4 = vrot.slane %v3203_v35, 4  ;;  %v6300_v47 = vcombine.low %v3185_v5, %v3195_v39  ;;  %v3553_v35 = vld [vmem:[#allocation2 + $0x90] sm:$0xe] }
 0x157   : > { %7031 = vmatmul.mubr.bf16.gmra.mxu1 %v7449_v31  ;;  %v9053_v18 = vrot.slane %v3213_v23, 4  ;;  %v9059_v17 = vsel %vm8267_vm13, %v6317_v20, %v3657_v40  ;;  %v3659_v12 = vrot.slane %v3657_v40, 4  ;;  %v3667_v31 = vrot.slane %v8708_v62, 5  ;;  %v7456_v23 = vld [vmem:[#allocation2 + $0x9c] sm:$0xff]  }
 0x158   : > { %7034 = vmatprep.mubr.bf16.mxu1 %v7452_v30  ;;  %v9063_v36 = vsel %vm8267_vm13, %v6318_v22, %v3664_v38  ;;  %v3666_v27 = vrot.slane %v3664_v38, 4  ;;  %v3209_v16 = vsel %vm7879_vm7, %v9051_v4, %v9031_v51  ;;  %v6319_v1 = vrot.slane %v3551_v37, 9  ;;  %v3552_v30 = vld [vmem:[#allocation2 + $0x84] sm:$0xe]  ;;  %v7453_v51 = vld [vmem:[#allocation2 + $0x90] sm:$0xff]  }
 0x159   : > { %7083 = vmatmul.mubr.bf16.gmra.mxu0 %v8932_v42  ;;  %v3671_v59 = vrot.slane %v8724_v52, 5  ;;  %v3219_v62 = vsel %vm7879_vm7, %v9053_v18, %v9035_v29  ;;  %v9079_v42 = vsel %vm8267_vm13, %v3659_v12, %v3660_v55  ;;  %v3674_v39 = vrot.slane %v8763_v61, 5  ;;  %v3554_v52 = vld [vmem:[#allocation2 + $0x9c] sm:$0xe]  ;;  %v3555_v22 = vld [vmem:[#allocation2 + $0xa8] sm:$0xe] }
 0x15a   : > { %7086 = vmatprep.mubr.bf16.mxu0 %v8934_v33  ;;  %v9083_v5 = vsel %vm8267_vm13, %v3666_v27, %v3667_v31  ;;  %v6320_v40 = vrot.slane %v3552_v30, 9  ;;  %v3678_v25 = vrot.slane %v8780_v2, 5  ;;  %v3681_v55 = vrot.slane %v8807_v45, 5  ;;  %v3556_v31 = vld [vmem:[#allocation2 + $0xb4] sm:$0xe]  ;;  %v7476_v12 = vld [vmem:[#allocation2 + $0x60] sm:$0xff]  }
 0x15b   : > { %v9092_v29 = vsel %vm8267_vm13, %v6319_v1, %v3671_v59  ;;  %v3673_v0 = vrot.slane %v3671_v59, 4  ;;  %v6321_v61 = vrot.slane %v3553_v35, 9  ;;  %v3685_v37 = vrot.slane %v8789_v14, 5  ;;  %v10462_v59 = vld [vmem:[#allocation19_spill] sm:$0xff]  ;;  %v5182_v33 = vld [vmem:[#allocation2 + $0x24] sm:$0xe] }
 0x15c   : > { %v3688_v4 = vrot.slane %v8815_v26, 5  ;;  %v6322_v18 = vrot.slane %v3554_v52, 9  ;;  %v9106_v27 = vsel %vm8267_vm13, %v6320_v40, %v3678_v25  ;;  %v3680_v2 = vrot.slane %v3678_v25, 4  ;;  %v10463_v52 = vld [vmem:[#allocation24_spill] sm:$0xff] }
 0x15d   : > { %v9098_v38 = vsel %vm8267_vm13, %v3673_v0, %v3674_v39  ;;  %v3692_v45 = vrot.slane %v8817_v6, 5  ;;  %v9111_v1 = vsel %vm8267_vm13, %v6321_v61, %v3685_v37  ;;  %v3687_v14 = vrot.slane %v3685_v37, 4  ;;  %v3557_v0 = vld [vmem:[#allocation2 + $0xc0] sm:$0xe] }
 0x15e   : > { %v3695_v26 = vrot.slane %v10462_v59, 5  ;;  %v6323_v30 = vrot.slane %v3555_v22, 9  ;;  %v9116_v35 = vsel %vm8267_vm13, %v3680_v2, %v3681_v55  ;;  %v10464_v25 = vld [vmem:[#allocation20_spill] sm:$0xff]  ;;  %v6324_v61 = vrot.slane %v3556_v31, 9  ;;  %v7457_v2 = vld [vmem:[#allocation2 + $0xa8] sm:$0xff]  }
 0x15f   : > { %7035 = vmatmul.mubr.bf16.gmra.mxu1 %v7453_v51  ;;  %v9120_v39 = vsel %vm8267_vm13, %v6322_v18, %v3692_v45  ;;  %v3694_v6 = vrot.slane %v3692_v45, 4  ;;  %v3699_v51 = vrot.slane %v10463_v52, 5  ;;  %v3702_v55 = vrot.slane %v10464_v25, 5  ;;  %v10465_v45 = vld [vmem:[#allocation21_spill] sm:$0xff]  ;;  %v10466_v31 = vld [vmem:[#allocation22_spill] sm:$0xff]  ;;  %v7460_v52 = vld [vmem:[#allocation2 + $0xb4] sm:$0xff]  }
 0x160   : > { %7038 = vmatprep.mubr.bf16.mxu1 %v7456_v23  ;;  %v9128_v23 = vsel %vm8267_vm13, %v3687_v14, %v3688_v4  ;;  %v3706_v14 = vrot.slane %v10465_v45, 5  ;;  %v6325_v59 = vrot.slane %v3557_v0, 9  ;;  %v3610_v25 = vrot.slane %v3608_v11, 4 }
 0x161   : > { %7087 = vmatmul.mubr.bf16.gmra.mxu0 %v8943_v44  ;;  %v9135_v37 = vsel %vm8267_vm13, %v3694_v6, %v3695_v26  ;;  %v9139_v44 = vsel %vm8267_vm13, %v6323_v30, %v3699_v51  ;;  %v3701_v18 = vrot.slane %v3699_v51, 4  ;;  %v3713_v30 = vrot.slane %v9005_v28, 5 }
 0x162   : > { %7090 = vmatprep.mubr.bf16.mxu0 %v6300_v47  ;;  %v3709_v47 = vrot.slane %v10466_v31, 5  ;;  %v3716_v6 = vrot.slane %v9016_v9, 5  ;;  %v6301_v51 = vcombine.low %v3209_v16, %v3219_v62  ;;  %v9157_v45 = vsel %vm8267_vm13, %v6324_v61, %v3706_v14  ;;  %v7464_v31 = vld [vmem:[#allocation2 + $0x18] sm:$0xff]  }
 0x163   : > { %v9149_v26 = vsel %vm8267_vm13, %v3701_v18, %v3702_v55  ;;  %v3708_v0 = vrot.slane %v3706_v14, 4  ;;  %v9161_v22 = vsel %vm8267_vm13, %v6325_v59, %v3713_v30  ;;  %v3715_v55 = vrot.slane %v3713_v30, 4  ;;  %v7522_v9 = vld [vmem:[#allocation2 + $0x1c] sm:$0xf]  ;;  %v3543_v14 = vld [vmem:[#allocation2 + $0x18] sm:$0xe] }
 0x164   : > { %10467 = vst [vmem:[#allocation23_spill] sm:$0xff] %v9161_v22  ;;  %v3615_v16 = vrot.slane %v7522_v9, 5  ;;  %v3609_v18 = vsel %vm8267_vm13, %v6310_v50, %v3608_v11  ;;  %v7461_v59 = vld [vmem:[#allocation2 + $0xc0] sm:$0xff]   ;;  %v6311_v30 = vrot.slane %v3543_v14, 9  ;;  %v7471_v50 = vld [vmem:[#allocation6 + $0x230] sm:$0xff]  }
 0x165   : > { %v9165_v28 = vsel %vm8267_vm13, %v3708_v0, %v3709_v47  ;;  %v9171_v61 = vsel %vm8267_vm13, %v3715_v55, %v3716_v6  ;;  %v4427_v0 = vld [vmem:[#allocation2 + $0x18] sm:$0xf]  ;;  %v7468_v55 = vld [vmem:[#allocation2 + $0x30] sm:$0xff]  }
 0x166   : > { %10468 = vst [vmem:[#allocation17_spill] sm:$0xff] %v9171_v61  ;;  %v3617_v6 = vrot.slane %v3615_v16, 4  ;;  %v3616_v11 = vsel %vm8267_vm13, %v6311_v30, %v3615_v16  ;;  %v7470_v16 = vld [vmem:[#allocation6 + $0x1f0] sm:$0xff]  }
 0x167   : > { %7039 = vmatmul.mubr.bf16.gmra.mxu1 %v7457_v2  ;;  %v3612_v2 = vsel %vm8267_vm13, %v3610_v25, %v3611_v57  ;;  %v4476_v57 = vshrl.u32 %v4427_v0, 16  ;;  %v4479_v25 = vshll.u32 %v4427_v0, 16  ;;  %v4429_v0 = vld [vmem:[#allocation2 + $0x20] sm:$0x1]  ;;  %v9286_v61 = vld [vmem:[#allocation2 + $0x4c] sm:$0xf] }
 0x168   : > { %7042 = vmatprep.mubr.bf16.mxu1 %v7460_v52  ;;  %v6326_v52 = vcombine.low %v3609_v18, %v3612_v2  ;;  %v7475_v18 = vld [vmem:[#allocation6 + $0x228] sm:$0xff]  }
 0x169   : > { %7091 = vmatmul.mubr.bf16.gmra.mxu0 %v6301_v51  ;;  %v3618_v51 = vrot.slane %v7523_v53, 5  ;;  %v4478_v2 = vrot.slane %v4476_v57, 4  ;;  %v4481_v14 = vrot.slane %v4479_v25, 5  ;;  %v4430_v53 = vld [vmem:[#allocation2 + $0x24] sm:$0xf] }
 0x16a   : > { %7158 = vmatprep.mubr.bf16.mxu0 %v7464_v31  ;;  %v9189_v31 = vld [vmem:[#allocation2 + $0x1c] sm:$0xf]  ;;  %v5181_v57 = vld [vmem:[#allocation2 + $0x18] sm:$0xe]  ;;  %v4503_v47 = vshll.u32 %v4430_v53, 16 }
 0x16b   : > { %v3619_v13 = vsel %vm8267_vm13, %v3617_v6, %v3618_v51  ;;  %v4489_v30 = vshrl.u32 %v9189_v31, 16  ;;  %v7472_v6 = vld [vmem:[#allocation2 + $0x48] sm:$0xff]   ;;  %v7479_v51 = vld [vmem:[#allocation6 + $0x220] sm:$0xff]   ;;  %v5247_v25 = vrot.slane %v9189_v31, 5 }
 0x16c   : > { %v6327_v9 = vcombine.low %v3616_v11, %v3619_v13  ;;  %v4505_v40 = vrot.slane %v4503_v47, 5 }
 0x16d   : > { %v4491_v13 = vrot.slane %v4489_v30, 4  ;;  %v9209_v30 = vld [vmem:[#allocation2 + $0x34] sm:$0xf]  ;;  %v5249_v62 = vrot.slane %v5247_v25, 4 }
 0x16e   : > { %v4533_v47 = vshll.u32 %v9209_v30, 16 }
 0x16f   : > { %7043 = vmatmul.mubr.bf16.gmra.mxu1 %v7461_v59  ;;  %v4485_v59 = vshll.u32 %v9189_v31, 16  ;;  %v7473_v31 = vld [vmem:[#allocation2 + $0x54] sm:$0xff]  }
 0x170   : > { %7110 = vmatprep.mubr.bf16.mxu1 %v6326_v52  ;;  %v7469_v52 = vld [vmem:[#allocation2 + $0x3c] sm:$0xff]  }
 0x171   : > { %7159 = vmatmul.mubr.bf16.vlgmr.msra.gmra.mxu0 %v7465_v34  ;;  %v9194_v34 = vld [vmem:[#allocation2 + $0x28] sm:$0xf]  ;;  %v9200_v11 = vrot.slane %v4485_v59, 5  ;;  %v6398_v59 = vrot.slane %v5181_v57, 9  ;;  %v9221_v57 = vpop.f32.mrf.mxu1 }
 0x172   : > { %7239 = vmatpush3.bf16.msra.mxu0 %v8966_v46  ;;  %7162 = vmatprep.mubr.bf16.mxu0 %v7468_v55  ;;  %v7474_v46 = vld [vmem:[#allocation6 + $0x1e8] sm:$0xff]   ;;  %v4482_v55 = vor.u32 %v4481_v14, %v4478_v2  ;;  %v4509_v48 = vshll.u32 %v9194_v34, 16  ;;  %v4513_v43 = vshrl.u32 %v9194_v34, 16  ;;  %v4495_v14 = vshll.u32 %v4429_v0, 16  ;;  %10471 = vst [vmem:[#allocation25_spill] sm:$0xff] %v9221_v57  ;;  %v7486_v57 = vld [vmem:[#allocation6 + $0x1d0] sm:$0xff]  }
 0x173   : > { %7240 = vmatprep.subr.bf16.mxu0 %v7471_v50  ;;  %v9232_v19 = vsel %vm8267_vm13, %v6398_v59, %v5247_v25  ;;  %v5254_v59 = vrot.slane %v9194_v34, 5  ;;  %v7480_v34 = vld [vmem:[#allocation2 + $0x78] sm:$0xff]  }
 0x174   : > { %v9207_v2 = vrot.slane %v4482_v55, 4  ;;  %v9214_v55 = vld [vmem:[#allocation2 + $0x2c] sm:$0x1]  ;;  %v9216_v20 = vrot.slane %v4509_v48, 5 }
 0x176   : > { %7241 = vmatpush3.bf16.msra.mxu0 %v7471_v50  ;;  %v9202_v50 = vpop.f32.mrf.mxu0 }
 0x177   : > { %7111 = vmatmul.mubr.bf16.vlgmr.msra.gmra.mxu1 %v6327_v9  ;;  %7242 = vmatprep.subr.bf16.mxu0 %v7475_v18  ;;  %10469 = vst [vmem:[#allocation16_spill] sm:$0xff] %v9202_v50  ;;  %v4500_v9 = vshrl.u32 %v4430_v53, 16  ;;  %v7478_v53 = vld [vmem:[#allocation6 + $0x1e0] sm:$0xff]   ;;  %v4439_v50 = vld [vmem:[#allocation2 + $0x48] sm:$0xf] }
 0x178   : > { %7191 = vmatpush3.bf16.msra.mxu1 %v9020_v8  ;;  %7114 = vmatprep.mubr.bf16.mxu1 %v6328_v63  ;;  %v7483_v63 = vld [vmem:[#allocation6 + $0x218] sm:$0xff]  }
 0x179   : > { %7163 = vmatmul.mubr.bf16.gmra.mxu0 %v7469_v52  ;;  %7192 = vmatprep.subr.bf16.mxu1 %v7470_v16  ;;  %v4433_v8 = vld [vmem:[#allocation2 + $0x30] sm:$0xf]  ;;  %v5250_v52 = vrot.slane %v4429_v0, 5  ;;  %v4502_v4 = vrot.slane %v4500_v9, 4  ;;  %v4515_v0 = vrot.slane %v4513_v43, 4  ;;  %v9228_v9 = vrot.slane %v4495_v14, 5 }
 0x17a   : > { %7166 = vmatprep.mubr.bf16.mxu0 %v7472_v6  ;;  %7243 = vmatpush3.bf16.msra.mxu0 %v7475_v18  ;;  %v9211_v6 = vpop.f32.mrf.mxu0  ;;  %v4492_v18 = vor.u32 %v4491_v13, %v9200_v11  ;;  %v4524_v13 = vshrl.u32 %v4433_v8, 16  ;;  %v4527_v7 = vshll.u32 %v4433_v8, 16  ;;  %v4519_v8 = vshll.u32 %v9214_v55, 16 }
 0x17b   : > { %7244 = vmatprep.subr.bf16.mxu0 %v7479_v51  ;;  %10470 = vst [vmem:[#allocation18_spill] sm:$0xff] %v9211_v6  ;;  %v9244_v58 = vsel %vm8267_vm13, %v5249_v62, %v5250_v52  ;;  %v4506_v56 = vor.u32 %v4505_v40, %v4502_v4  ;;  %v4516_v25 = vor.u32 %v4515_v0, %v9216_v20  ;;  %v6399_v14 = vrot.slane %v5182_v33, 9  ;;  %v9255_v4 = vld [vmem:[#allocation2 + $0x38] sm:$0x1] }
 0x17c   : > { %7193 = vmatpush3.bf16.msra.mxu1 %v7470_v16  ;;  %v7487_v16 = vld [vmem:[#allocation6 + $0x210] sm:$0xff]   ;;  %v9240_v43 = vrot.slane %v4492_v18, 4  ;;  %v7491_v18 = vld [vmem:[#allocation6 + $0x208] sm:$0xff]   ;;  %v4526_v48 = vrot.slane %v4524_v13, 4  ;;  %v4529_v62 = vrot.slane %v4527_v7, 5  ;;  %v9253_v52 = vrot.slane %v4533_v47, 5 }
 0x17d   : > { %7194 = vmatprep.subr.bf16.mxu1 %v7474_v46  ;;  %v9267_v13 = vrot.slane %v4506_v56, 4  ;;  %v5261_v47 = vrot.slane %v9209_v30, 5  ;;  %v5257_v6 = vrot.slane %v9214_v55, 5  ;;  %v5183_v7 = vld [vmem:[#allocation2 + $0x30] sm:$0xe]  ;;  %v10477_v55 = vcombine.low %v9039_v32, %v9047_v54 }
 0x17e   : > { %7245 = vmatpush3.bf16.msra.mxu0 %v7479_v51  ;;  %v4537_v51 = vshrl.u32 %v9209_v30, 16  ;;  %v5256_v30 = vrot.slane %v5254_v59, 4  ;;  %v6400_v32 = vrot.slane %v5183_v7, 9  ;;  %v7481_v7 = vld [vmem:[#allocation2 + $0x84] sm:$0xff]  }
 0x17f   : > { %7115 = vmatmul.mubr.bf16.gmra.mxu1 %v6329_v60  ;;  %7246 = vmatprep.subr.bf16.mxu0 %v7483_v63  ;;  %v9234_v60 = vpop.f32.mrf.mxu0  ;;  %v5263_v54 = vrot.slane %v5261_v47, 4 }
 0x180   : > { %7118 = vmatprep.mubr.bf16.mxu1 %v6330_v10  ;;  %7195 = vmatpush3.bf16.msra.mxu1 %v7474_v46  ;;  %10472 = vst [vmem:[#allocation26_spill] sm:$0xff] %v9234_v60  ;;  %v4436_v10 = vld [vmem:[#allocation2 + $0x3c] sm:$0xf]  ;;  %v9246_v46 = vld [vmem:[#allocation2 + $0x40] sm:$0xf]  ;;  %v4539_v40 = vrot.slane %v4537_v51, 4 }
 0x181   : > { %7167 = vmatmul.mubr.bf16.gmra.mxu0 %v7473_v31  ;;  %7196 = vmatprep.subr.bf16.mxu1 %v7478_v53  ;;  %v9251_v31 = vpop.f32.mrf.mxu1  ;;  %v4557_v0 = vshll.u32 %v9246_v46, 16  ;;  %v4561_v33 = vshrl.u32 %v9246_v46, 16  ;;  %v7495_v51 = vld [vmem:[#allocation6 + $0x200] sm:$0xff]   ;;  %v9272_v60 = vrot.slane %v4519_v8, 5  ;;  %v4543_v8 = vshll.u32 %v9255_v4, 16 }
 0x182   : > { %7170 = vmatprep.mubr.bf16.mxu0 %v7476_v12  ;;  %7247 = vmatpush3.bf16.msra.mxu0 %v7483_v63  ;;  %10473 = vst [vmem:[#allocation27_spill] sm:$0xff] %v9251_v31  ;;  %v4548_v12 = vshrl.u32 %v4436_v10, 16  ;;  %v4551_v63 = vshll.u32 %v4436_v10, 16  ;;  %v9259_v31 = vpop.f32.mrf.mxu0  ;;  %v9270_v10 = vrot.slane %v4516_v25, 4  ;;  %v4540_v25 = vor.u32 %v4539_v40, %v9253_v52 }
 0x183   : > { %7248 = vmatprep.subr.bf16.mxu0 %v7487_v16  ;;  %10474 = vst [vmem:[#allocation19_spill] sm:$0xff] %v9259_v31  ;;  %v9276_v31 = vsel %vm8267_vm13, %v6399_v14, %v5254_v59  ;;  %v9282_v56 = vpop.f32.mrf.mxu1  ;;  %v9291_v14 = vld [vmem:[#allocation2 + $0x44] sm:$0x1]  ;;  %v4563_v59 = vrot.slane %v4561_v33, 4  ;;  %v4512_v40 = vsel %vm7879_vm7, %v9267_v13, %v9216_v20  ;;  %v4585_v33 = vshrl.u32 %v9286_v61, 16  ;;  %v7484_v13 = vld [vmem:[#allocation2 + $0x90] sm:$0xff]  }
 0x184   : > { %7197 = vmatpush3.bf16.msra.mxu1 %v7478_v53  ;;  %v10475_v53 = vcombine.low %v9013_v3, %v9028_v15  ;;  %10476 = vst [vmem:[#allocation24_spill] sm:$0xff] %v9282_v56  ;;  %v4550_v3 = vrot.slane %v4548_v12, 4  ;;  %v4553_v15 = vrot.slane %v4551_v63, 5  ;;  %v5184_v12 = vld [vmem:[#allocation2 + $0x3c] sm:$0xe]  ;;  %v4572_v63 = vshrl.u32 %v4439_v50, 16 }
 0x185   : > { %7198 = vmatprep.subr.bf16.mxu1 %v7482_v49  ;;  %v4545_v22 = vrot.slane %v4543_v8, 5  ;;  %v4567_v20 = vshll.u32 %v9291_v14, 16 }
 0x186   : > { %7249 = vmatpush3.bf16.msra.mxu0 %v7487_v16  ;;  %v4530_v16 = vor.u32 %v4529_v62, %v4526_v48  ;;  %v9295_v48 = vpop.f32.mrf.mxu0  ;;  %v7490_v62 = vld [vmem:[#allocation6 + $0x1c8] sm:$0xff]   ;;  %v4574_v8 = vrot.slane %v4572_v63, 4 }
 0x187   : > { %7119 = vmatmul.mubr.bf16.gmra.mxu1 %v10475_v53  ;;  %7250 = vmatprep.subr.bf16.mxu0 %v7491_v18  ;;  %v9293_v53 = vrot.slane %v4557_v0, 5  ;;  %10478 = vst [vmem:[#allocation20_spill] sm:$0xff] %v9295_v48  ;;  %v4575_v0 = vshll.u32 %v4439_v50, 16  ;;  %v4541_v48 = vrot.slane %v4540_v25, 4  ;;  %v9317_v25 = vsel %vm8267_vm13, %v5256_v30, %v5257_v6 }
 0x188   : > { %7122 = vmatprep.mubr.bf16.mxu1 %v10477_v55  ;;  %7199 = vmatpush3.bf16.msra.mxu1 %v7482_v49  ;;  %v5264_v49 = vrot.slane %v9255_v4, 5  ;;  %v9304_v55 = vpop.f32.mrf.mxu1  ;;  %v4531_v56 = vrot.slane %v4530_v16, 4  ;;  %v4554_v4 = vor.u32 %v4553_v15, %v4550_v3  ;;  %v7494_v16 = vld [vmem:[#allocation6 + $0x1c0] sm:$0xff]   ;;  %v10480_v6 = vcombine.low %v9059_v17, %v9079_v42 }
 0x189   : > { %7171 = vmatmul.mubr.bf16.gmra.mxu0 %v7477_v21  ;;  %7200 = vmatprep.subr.bf16.mxu1 %v7486_v57  ;;  %v4581_v21 = vshll.u32 %v9286_v61, 16  ;;  %10479 = vst [vmem:[#allocation21_spill] sm:$0xff] %v9304_v55  ;;  %v4564_v50 = vor.u32 %v4563_v59, %v9293_v53  ;;  %v9313_v55 = vpop.f32.mrf.mxu0  ;;  %v4577_v3 = vrot.slane %v4575_v0, 5  ;;  %v4587_v59 = vrot.slane %v4585_v33, 4 }
 0x18a   : > { %7174 = vmatprep.mubr.bf16.mxu0 %v7480_v34  ;;  %7251 = vmatpush3.bf16.msra.mxu0 %v7491_v18  ;;  %v4522_v18 = vsel %vm7879_vm7, %v9270_v10, %v9272_v60  ;;  %v5268_v34 = vrot.slane %v9246_v46, 5  ;;  %v9325_v60 = vsel %vm8267_vm13, %v5263_v54, %v5264_v49  ;;  %v6401_v10 = vrot.slane %v5184_v12, 9  ;;  %v9327_v46 = vld [vmem:[#allocation2 + $0x50] sm:$0x1]  ;;  %v9334_v30 = vpop.f32.mrf.mxu1  ;;  %v4442_v49 = vld [vmem:[#allocation2 + $0x54] sm:$0xf] }
 0x18b   : > { %7252 = vmatprep.subr.bf16.mxu0 %v7495_v51  ;;  %v9329_v15 = vrot.slane %v4581_v21, 5  ;;  %10481 = vst [vmem:[#allocation22_spill] sm:$0xff] %v9334_v30  ;;  %v4536_v54 = vsel %vm7879_vm7, %v4531_v56, %v9253_v52  ;;  %v4546_v17 = vsel %vm7879_vm7, %v4541_v48, %v4545_v22  ;;  %v4569_v42 = vrot.slane %v4567_v20, 5  ;;  %v9359_v0 = vpop.f32.mrf.mxu0  ;;  %v5185_v56 = vld [vmem:[#allocation2 + $0x48] sm:$0xe] }
 0x18c   : > { %7201 = vmatpush3.bf16.msra.mxu1 %v7486_v57  ;;  %v9321_v57 = vsel %vm8267_vm13, %v6400_v32, %v5261_v47  ;;  %v10482_v47 = vsel %vm7879_vm7, %v9240_v43, %v9228_v9  ;;  %v10484_v12 = vcombine.low %v9063_v36, %v9083_v5  ;;  %v4555_v9 = vrot.slane %v4554_v4, 4  ;;  %v4445_v21 = vld [vmem:[#allocation2 + $0x60] sm:$0xf]  ;;  %v9375_v33 = vpop.f32.mrf.mxu1 }
 0x18d   : > { %7202 = vmatprep.subr.bf16.mxu1 %v7490_v62  ;;  %v4565_v43 = vrot.slane %v4564_v50, 4  ;;  %v5270_v63 = vrot.slane %v5268_v34, 4  ;;  %v9361_v52 = vcombine.low %v4512_v40, %v4522_v18  ;;  %v4591_v5 = vshll.u32 %v9327_v46, 16  ;;  %10485 = vst [vmem:[#allocation28_spill] sm:$0xff] %v9375_v33  ;;  %v5187_v22 = vld [vmem:[#allocation2 + $0x60] sm:$0xe] }
 0x18e   : > { %7253 = vmatpush3.bf16.msra.mxu0 %v7495_v51  ;;  %v10483_v51 = vsel %vm7879_vm7, %v9207_v2, %v9200_v11  ;;  %v5271_v11 = vrot.slane %v9291_v14, 5  ;;  %v9357_v2 = vld [vmem:[#allocation2 + $0x58] sm:$0xf]  ;;  %v9368_v48 = vcombine.low %v4536_v54, %v4546_v17  ;;  %v9372_v14 = vsel %vm8267_vm13, %v6401_v10, %v5268_v34  ;;  %v7488_v54 = vld [vmem:[#allocation2 + $0xa8] sm:$0xff]  }
 0x18f   : > { %7123 = vmatmul.mubr.bf16.gmra.mxu1 %v10480_v6  ;;  %v9346_v32 = vcombine.low %v10483_v51, %v10482_v47  ;;  %v4588_v40 = vor.u32 %v4587_v59, %v9329_v15  ;;  %v4596_v20 = vshrl.u32 %v4442_v49, 16  ;;  %v4599_v18 = vshll.u32 %v4442_v49, 16  ;;  %v9390_v59 = vpop.f32.mrf.mxu0 }
 0x190   : > { %7126 = vmatprep.mubr.bf16.mxu1 %v10484_v12  ;;  %7203 = vmatpush3.bf16.msra.mxu1 %v7490_v62  ;;  %v4578_v62 = vor.u32 %v4577_v3, %v4574_v8  ;;  %v4605_v4 = vshll.u32 %v9357_v2, 16  ;;  %v4609_v50 = vshrl.u32 %v9357_v2, 16  ;;  %v4560_v34 = vsel %vm7879_vm7, %v4555_v9, %v9293_v53  ;;  %v7485_v3 = vld [vmem:[#allocation2 + $0x9c] sm:$0xff]   ;;  %v9398_v9 = vpop.f32.mrf.mxu1 }
 0x191   : > { %7175 = vmatmul.mubr.bf16.gmra.mxu0 %v7481_v7  ;;  %7204 = vmatprep.subr.bf16.mxu1 %v7494_v16  ;;  %v9379_v7 = vld [vmem:[#allocation2 + $0x64] sm:$0xf]  ;;  %v9388_v10 = vsel %vm8267_vm13, %v5270_v63, %v5271_v11  ;;  %v6402_v8 = vrot.slane %v5185_v56, 9  ;;  %v4593_v6 = vrot.slane %v4591_v5, 5  ;;  %v5275_v47 = vrot.slane %v9286_v61, 5  ;;  %10487 = vst [vmem:[#allocation29_spill] sm:$0xff] %v9398_v9 }
 0x192   : > { %7178 = vmatprep.mubr.bf16.mxu0 %v7484_v13  ;;  %v4570_v13 = vsel %vm7879_vm7, %v4565_v43, %v4569_v42  ;;  %v4620_v51 = vshrl.u32 %v4445_v21, 16  ;;  %v4579_v17 = vrot.slane %v4578_v62, 4  ;;  %v4589_v49 = vrot.slane %v4588_v40, 4  ;;  %v9400_v43 = vld [vmem:[#allocation2 + $0x5c] sm:$0x1] }
 0x193   : > { %v4629_v53 = vshll.u32 %v9379_v7, 16  ;;  %v4633_v42 = vshrl.u32 %v9379_v7, 16  ;;  %v10486_v12 = vcombine.low %v9092_v29, %v9098_v38  ;;  %v4598_v63 = vrot.slane %v4596_v20, 4  ;;  %v4448_v20 = vld [vmem:[#allocation2 + $0x6c] sm:$0xf] }
 0x194   : > { %7205 = vmatpush3.bf16.msra.mxu1 %v7494_v16  ;;  %v4623_v16 = vshll.u32 %v4445_v21, 16  ;;  %v4601_v11 = vrot.slane %v4599_v18, 5  ;;  %v9402_v61 = vrot.slane %v4605_v4, 5  ;;  %v4611_v5 = vrot.slane %v4609_v50, 4  ;;  %v5186_v21 = vld [vmem:[#allocation2 + $0x54] sm:$0xe]  ;;  %v9416_v18 = vpop.f32.mrf.mxu0 }
 0x195   : > { %v10488_v56 = vcombine.low %v9106_v27, %v9116_v35  ;;  %v9407_v62 = vcombine.low %v4560_v34, %v4570_v13  ;;  %v9413_v29 = vsel %vm8267_vm13, %v6402_v8, %v5275_v47  ;;  %v5278_v38 = vrot.slane %v9327_v46, 5  ;;  %v9419_v34 = vld [vmem:[#allocation2 + $0x70] sm:$0xf]  ;;  %v9426_v8 = vld [vmem:[#allocation2 + $0x68] sm:$0x1] }
 0x196   : > { %v5277_v4 = vrot.slane %v5275_v47, 4  ;;  %v5282_v27 = vrot.slane %v9357_v2, 5  ;;  %v4622_v35 = vrot.slane %v4620_v51, 4  ;;  %v4625_v50 = vrot.slane %v4623_v16, 5  ;;  %v9430_v47 = vpop.f32.mrf.mxu1  ;;  %v9448_v9 = vld [vmem:[#allocation2 + $0x74] sm:$0x1] }
 0x197   : > { %7127 = vmatmul.mubr.bf16.gmra.mxu1 %v10486_v12  ;;  %v4584_v13 = vsel %vm7879_vm7, %v4579_v17, %v9329_v15  ;;  %v4594_v46 = vsel %vm7879_vm7, %v4589_v49, %v4593_v6  ;;  %v4635_v12 = vrot.slane %v4633_v42, 4  ;;  %10489 = vst [vmem:[#allocation30_spill] sm:$0xff] %v9430_v47  ;;  %v4602_v2 = vor.u32 %v4601_v11, %v4598_v63  ;;  %v7489_v6 = vld [vmem:[#allocation2 + $0xb4] sm:$0xff]   ;;  %v9436_v49 = vpop.f32.mrf.mxu0  ;;  %v7492_v11 = vld [vmem:[#allocation2 + $0xc0] sm:$0xff]  }
 0x198   : > { %7130 = vmatprep.mubr.bf16.mxu1 %v10488_v56  ;;  %v4612_v51 = vor.u32 %v4611_v5, %v9402_v61  ;;  %v4615_v16 = vshll.u32 %v9400_v43, 16  ;;  %v4644_v56 = vshrl.u32 %v4448_v20, 16  ;;  %v4647_v40 = vshll.u32 %v4448_v20, 16 }
 0x199   : > { %7179 = vmatmul.mubr.bf16.gmra.mxu0 %v7485_v3  ;;  %v9428_v3 = vrot.slane %v4629_v53, 5  ;;  %v4653_v15 = vshll.u32 %v9419_v34, 16  ;;  %v4657_v17 = vshrl.u32 %v9419_v34, 16  ;;  %v5284_v53 = vrot.slane %v5282_v27, 4 }
 0x19a   : > { %7182 = vmatprep.mubr.bf16.mxu0 %v7488_v54  ;;  %v6403_v54 = vrot.slane %v5186_v21, 9  ;;  %v5285_v42 = vrot.slane %v9400_v43, 5  ;;  %v4626_v36 = vor.u32 %v4625_v50, %v4622_v35  ;;  %v4639_v63 = vshll.u32 %v9426_v8, 16  ;;  %v9453_v35 = vpop.f32.mrf.mxu1 }
 0x19b   : > { %v9440_v5 = vcombine.low %v4584_v13, %v4594_v46  ;;  %v9444_v21 = vsel %vm8267_vm13, %v5277_v4, %v5278_v38  ;;  %v4636_v20 = vor.u32 %v4635_v12, %v9428_v3  ;;  %v5289_v47 = vrot.slane %v9379_v7, 5  ;;  %10491 = vst [vmem:[#allocation31_spill] sm:$0xff] %v9453_v35  ;;  %v4451_v4 = vld [vmem:[#allocation2 + $0x78] sm:$0xf] }
 0x19c   : > { %v10490_v43 = vcombine.low %v9111_v1, %v9128_v23  ;;  %v4603_v50 = vrot.slane %v4602_v2, 4  ;;  %v4613_v13 = vrot.slane %v4612_v51, 4  ;;  %v4617_v46 = vrot.slane %v4615_v16, 5  ;;  %v9464_v23 = vld [vmem:[#allocation2 + $0x7c] sm:$0xf]  ;;  %v9466_v2 = vpop.f32.mrf.mxu0 }
 0x19d   : > { %v9457_v38 = vsel %vm8267_vm13, %v6403_v54, %v5282_v27  ;;  %v10492_v12 = vcombine.low %v9120_v39, %v9135_v37  ;;  %v4646_v7 = vrot.slane %v4644_v56, 4  ;;  %v4649_v33 = vrot.slane %v4647_v40, 5 }
 0x19e   : > { %v9462_v30 = vrot.slane %v4653_v15, 5  ;;  %v4659_v1 = vrot.slane %v4657_v17, 4  ;;  %v9470_v51 = vsel %vm8267_vm13, %v5284_v53, %v5285_v42  ;;  %v4627_v27 = vrot.slane %v4626_v36, 4  ;;  %v9474_v15 = vpop.f32.mrf.mxu1  ;;  %v9484_v42 = vpop.f32.mrf.mxu0 }
 0x19f   : > { %7131 = vmatmul.mubr.bf16.gmra.mxu1 %v10490_v43  ;;  %v4641_v16 = vrot.slane %v4639_v63, 5  ;;  %v6404_v54 = vrot.slane %v5187_v22, 9  ;;  %v4637_v39 = vrot.slane %v4636_v20, 4  ;;  %v5291_v37 = vrot.slane %v5289_v47, 4  ;;  %10493 = vst [vmem:[#allocation32_spill] sm:$0xff] %v9474_v15  ;;  %v7493_v63 = vld [vmem:[#allocation2 + $0xcc] sm:$0xff]  }
 0x1a0   : > { %7134 = vmatprep.mubr.bf16.mxu1 %v10492_v12  ;;  %v5292_v40 = vrot.slane %v9426_v8, 5  ;;  %v4663_v56 = vshll.u32 %v9448_v9, 16  ;;  %v4668_v17 = vshrl.u32 %v4451_v4, 16  ;;  %v4677_v43 = vshll.u32 %v9464_v23, 16 }
 0x1a1   : > { %7183 = vmatmul.mubr.bf16.gmra.mxu0 %v7489_v6  ;;  %v4671_v6 = vshll.u32 %v4451_v4, 16  ;;  %v4681_v12 = vshrl.u32 %v9464_v23, 16  ;;  %v4608_v22 = vsel %vm7879_vm7, %v4603_v50, %v9402_v61  ;;  %v4650_v53 = vor.u32 %v4649_v33, %v4646_v7  ;;  %v4454_v33 = vld [vmem:[#allocation2 + $0x84] sm:$0xf] }
 0x1a2   : > { %7186 = vmatprep.mubr.bf16.mxu0 %v7492_v11  ;;  %v4660_v8 = vor.u32 %v4659_v1, %v9462_v30  ;;  %v4618_v11 = vsel %vm7879_vm7, %v4613_v13, %v4617_v46  ;;  %v4632_v4 = vsel %vm7879_vm7, %v4627_v27, %v9428_v3  ;;  %v9495_v36 = vsel %vm8267_vm13, %v6404_v54, %v5289_v47  ;;  %v5188_v46 = vld [vmem:[#allocation2 + $0x6c] sm:$0xe]  ;;  %v9506_v1 = vld [vmem:[#allocation2 + $0x88] sm:$0xf]  ;;  %v9511_v47 = vpop.f32.mrf.mxu1  ;;  %v9513_v27 = vld [vmem:[#allocation2 + $0x80] sm:$0x1] }
 0x1a3   : > { %v4642_v61 = vsel %vm7879_vm7, %v4637_v39, %v4641_v16  ;;  %v9501_v50 = vsel %vm8267_vm13, %v5291_v37, %v5292_v40  ;;  %v9503_v13 = vrot.slane %v4663_v56, 5  ;;  %v5296_v7 = vrot.slane %v9419_v34, 5  ;;  %10495 = vst [vmem:[#allocation33_spill] sm:$0xff] %v9511_v47 }
 0x1a4   : > { %v10494_v3 = vcombine.low %v9139_v44, %v9149_v26  ;;  %v4670_v16 = vrot.slane %v4668_v17, 4  ;;  %v4673_v54 = vrot.slane %v4671_v6, 5  ;;  %v9515_v39 = vrot.slane %v4677_v43, 5 }
 0x1a5   : > { %v4683_v37 = vrot.slane %v4681_v12, 4  ;;  %v10496_v40 = vcombine.low %v9157_v45, %v9165_v28  ;;  %v4651_v34 = vrot.slane %v4650_v53, 4  ;;  %v4661_v56 = vrot.slane %v4660_v8, 4  ;;  %v9535_v8 = vpop.f32.mrf.mxu1 }
 0x1a6   : > { %v4692_v20 = vshrl.u32 %v4454_v33, 16  ;;  %v4695_v15 = vshll.u32 %v4454_v33, 16  ;;  %v9522_v44 = vcombine.low %v4608_v22, %v4618_v11  ;;  %v6405_v26 = vrot.slane %v5188_v46, 9  ;;  %v4457_v22 = vld [vmem:[#allocation2 + $0x90] sm:$0xf]  ;;  %10499 = vst [vmem:[#allocation35_spill] sm:$0xff] %v9535_v8 }
 0x1a7   : > { %7135 = vmatmul.mubr.bf16.gmra.mxu1 %v10494_v3  ;;  %v4701_v17 = vshll.u32 %v9506_v1, 16  ;;  %v4705_v6 = vshrl.u32 %v9506_v1, 16  ;;  %v10498_v43 = vcombine.low %v9232_v19, %v9244_v58  ;;  %v9529_v45 = vcombine.low %v4632_v4, %v4642_v61  ;;  %v5189_v19 = vld [vmem:[#allocation2 + $0x78] sm:$0xe]  ;;  %v9541_v4 = vld [vmem:[#allocation2 + $0x94] sm:$0xf] }
 0x1a8   : > { %7138 = vmatprep.mubr.bf16.mxu1 %v10496_v40  ;;  %v9520_v35 = vpop.f32.mrf.mxu0  ;;  %v5299_v12 = vrot.slane %v9448_v9, 5  ;;  %v4687_v53 = vshll.u32 %v9513_v27, 16  ;;  %v5298_v11 = vrot.slane %v5296_v7, 4  ;;  %v4674_v33 = vor.u32 %v4673_v54, %v4670_v16  ;;  %v9551_v16 = vld [vmem:[#allocation2 + $0x8c] sm:$0x1] }
 0x1a9   : > { %10497 = vst [vmem:[#allocation34_spill] sm:$0xff] %v9520_v35  ;;  %7187 = vmatmul.mubr.bf16.gmra.mxu0 %v7493_v63  ;;  %v4684_v46 = vor.u32 %v4683_v37, %v9515_v39  ;;  %v5303_v58 = vrot.slane %v9464_v23, 5  ;;  %v4656_v9 = vsel %vm7879_vm7, %v4651_v34, %v9462_v30  ;;  %v4666_v61 = vsel %vm7879_vm7, %v4661_v56, %v9503_v13  ;;  %v10503_v13 = vld [vmem:[#allocation23_spill] sm:$0xff] }
 0x1aa   : > { %7254 = vmatprep.mubr.bf16.mxu0 %v10498_v43  ;;  %v9537_v63 = vpop.f32.mrf.mxu0  ;;  %v4694_v3 = vrot.slane %v4692_v20, 4  ;;  %v4697_v40 = vrot.slane %v4695_v15, 5  ;;  %v9553_v54 = vrot.slane %v4701_v17, 5  ;;  %v4707_v37 = vrot.slane %v4705_v6, 4  ;;  %v10504_v20 = vld [vmem:[#allocation17_spill] sm:$0xff] }
 0x1ab   : > { %10500 = vst [vmem:[#allocation36_spill] sm:$0xff] %v9537_v63  ;;  %v4716_v23 = vshrl.u32 %v4457_v22, 16  ;;  %v4719_v28 = vshll.u32 %v4457_v22, 16  ;;  %v4689_v8 = vrot.slane %v4687_v53, 5  ;;  %v6406_v47 = vrot.slane %v5189_v19, 9 }
 0x1ac   : > { %v9549_v43 = vpop.f32.mrf.mxu0  ;;  %v4725_v63 = vshll.u32 %v9541_v4, 16  ;;  %v4729_v30 = vshrl.u32 %v9541_v4, 16  ;;  %v10505_v15 = vcombine.low %v10503_v13, %v10504_v20  ;;  %v4685_v17 = vrot.slane %v4684_v46, 4  ;;  %v5190_v22 = vld [vmem:[#allocation2 + $0x84] sm:$0xe] }
 0x1ad   : > { %10501 = vst [vmem:[#allocation37_spill] sm:$0xff] %v9549_v43  ;;  %v9557_v34 = vpop.f32.mrf.mxu1  ;;  %v4675_v43 = vrot.slane %v4674_v33, 4  ;;  %v5305_v35 = vrot.slane %v5303_v58, 4  ;;  %v5306_v6 = vrot.slane %v9513_v27, 5  ;;  %v9568_v53 = vsel %vm8267_vm13, %v6405_v26, %v5296_v7  ;;  %v10540_v24 = vld [vmem:[#allocation35_spill] sm:$0xff] }
 0x1ae   : > { %10502 = vst [vmem:[#allocation38_spill] sm:$0xff] %v9557_v34  ;;  %v9562_v56 = vpop.f32.mrf.mxu0  ;;  %v9572_v19 = vsel %vm8267_vm13, %v5298_v11, %v5299_v12  ;;  %v4698_v13 = vor.u32 %v4697_v40, %v4694_v3  ;;  %v4711_v20 = vshll.u32 %v9551_v16, 16  ;;  %v10507_v27 = vcombine.low %v9276_v31, %v9317_v25  ;;  %v9587_v40 = vld [vmem:[#allocation2 + $0x98] sm:$0x1] }
 0x1af   : > { %7139 = vmatmul.mubr.bf16.gmra.mxu1 %v10505_v15  ;;  %v9575_v15 = vpop.f32.mrf.mxu1  ;;  %v5310_v46 = vrot.slane %v9506_v1, 5  ;;  %v4718_v7 = vrot.slane %v4716_v23, 4  ;;  %v4721_v26 = vrot.slane %v4719_v28, 5  ;;  %v10508_v12 = vcombine.low %v9321_v57, %v9325_v60 }
 0x1b0   : > { %7206 = vmatprep.mubr.bf16.mxu1 %v9346_v32  ;;  %10506 = vst [vmem:[#allocation23_spill] sm:$0xff] %v9575_v15  ;;  %v6968_v33 = vpop.f32.mrf.mxu0  ;;  %v4708_v32 = vor.u32 %v4707_v37, %v9553_v54  ;;  %v9585_v11 = vcombine.low %v4656_v9, %v4666_v61  ;;  %v6407_v3 = vrot.slane %v5190_v22, 9  ;;  %v9589_v15 = vrot.slane %v4725_v63, 5  ;;  %v4460_v63 = vld [vmem:[#allocation2 + $0x9c] sm:$0xf]  ;;  %v10514_v9 = vld [vmem:[#allocation18_spill] sm:$0xff] }
 0x1b1   : > { %7255 = vmatmul.mubr.bf16.vlgmr.msra.gmra.mxu0 %v10507_v27  ;;  %v4731_v34 = vrot.slane %v4729_v30, 4  ;;  %v9591_v31 = vpop.f32.mrf.mxu1  ;;  %v4680_v1 = vsel %vm7879_vm7, %v4675_v43, %v9515_v39  ;;  %v4690_v28 = vsel %vm7879_vm7, %v4685_v17, %v4689_v8  ;;  %v9600_v57 = vsel %vm8267_vm13, %v6406_v47, %v5303_v58  ;;  %v9613_v43 = vld [vmem:[#allocation2 + $0xa0] sm:$0xf]  ;;  %v5191_v17 = vld [vmem:[#allocation2 + $0x90] sm:$0xe] }
 0x1b2   : > { %7258 = vmatprep.mubr.bf16.mxu0 %v10508_v12  ;;  %10509 = vst [vmem:[#allocation17_spill] sm:$0xff] %v9591_v31  ;;  %v2243_v25 = vpop.f32.mrf.mxu0  ;;  %v9604_v60 = vsel %vm8267_vm13, %v5305_v35, %v5306_v6  ;;  %v9608_v61 = vrot.slane %v4698_v13, 4  ;;  %v9610_v37 = vrot.slane %v4711_v20, 5  ;;  %v5313_v39 = vrot.slane %v9551_v16, 5  ;;  %v9663_v31 = vld [vmem:[#allocation2 + $0xac] sm:$0xf] }
 0x1b3   : > { %v9615_v8 = vpop.f32.mrf.mxu1  ;;  %v9617_v58 = vrot.slane %v4708_v32, 4  ;;  %v5312_v23 = vrot.slane %v5310_v46, 4  ;;  %v4722_v35 = vor.u32 %v4721_v26, %v4718_v7  ;;  %v4735_v30 = vshll.u32 %v9587_v40, 16 }
 0x1b4   : > { %10510 = vst [vmem:[#allocation39_spill] sm:$0xff] %v9615_v8  ;;  %v6969_v47 = vpop.f32.mrf.mxu0  ;;  %v9620_v6 = vcombine.low %v4680_v1, %v4690_v28  ;;  %v9626_v16 = vsel %vm8267_vm13, %v6407_v3, %v5310_v46  ;;  %v4732_v13 = vor.u32 %v4731_v34, %v9589_v15  ;;  %v4740_v32 = vshrl.u32 %v4460_v63, 16  ;;  %v10511_v1 = vld [vmem:[#allocation16_spill] sm:$0xff] }
 0x1b5   : > { %v6920_v20 = vpop.f32.mrf.mxu1  ;;  %v4743_v7 = vshll.u32 %v4460_v63, 16  ;;  %v4749_v26 = vshll.u32 %v9613_v43, 16  ;;  %v4753_v12 = vshrl.u32 %v9613_v43, 16  ;;  %v6408_v34 = vrot.slane %v5191_v17, 9 }
 0x1b6   : > { %v2246_v27 = vpop.f32.mrf.mxu0  ;;  %v1799_v28 = vadd.f32 %v6920_v20, %v10511_v1  ;;  %v5317_v3 = vrot.slane %v9541_v4, 5  ;;  %v10512_v63 = vcombine.low %v9372_v14, %v9388_v10  ;;  %v4714_v20 = vsel %vm7879_vm7, %v9617_v58, %v9610_v37  ;;  %v4463_v37 = vld [vmem:[#allocation2 + $0xa8] sm:$0xf] }
 0x1b7   : > { %7207 = vmatmul.mubr.bf16.vlgmr.msra.gmra.mxu1 %v9361_v52  ;;  %v1790_v52 = vpop.f32.mrf.mxu1  ;;  %v9650_v1 = vrot.slane %v4722_v35, 4  ;;  %v9652_v17 = vrot.slane %v4735_v30, 5  ;;  %v10515_v14 = vcombine.low %v9413_v29, %v9444_v21  ;;  %v4733_v10 = vrot.slane %v4732_v13, 4 }
 0x1b8   : > { %7210 = vmatprep.mubr.bf16.mxu1 %v9368_v48  ;;  %v6972_v22 = vpop.f32.mrf.mxu0  ;;  %v9648_v48 = vsel %vm8267_vm13, %v5312_v23, %v5313_v39  ;;  %v9654_v4 = vadd.f32 %v6968_v33, %v1799_v28  ;;  %v1791_v46 = vadd.f32 %v1790_v52, %v10514_v9  ;;  %v4742_v39 = vrot.slane %v4740_v32, 4  ;;  %v10517_v9 = vld [vmem:[#allocation26_spill] sm:$0xff] }
 0x1b9   : > { %7259 = vmatmul.mubr.bf16.gmra.mxu0 %v10512_v63  ;;  %v5320_v63 = vrot.slane %v9587_v40, 5  ;;  %v6921_v58 = vpop.f32.mrf.mxu1  ;;  %v4745_v23 = vrot.slane %v4743_v7, 5  ;;  %v9661_v35 = vrot.slane %v4749_v26, 5  ;;  %v4755_v30 = vrot.slane %v4753_v12, 4  ;;  %v4462_v40 = vld [vmem:[#allocation2 + $0xa4] sm:$0x1] }
 0x1ba   : > { %10513 = vst [vmem:[#allocation16_spill] sm:$0xff] %v9654_v4  ;;  %7262 = vmatprep.mubr.bf16.mxu0 %v10515_v14  ;;  %v2259_v8 = vpop.f32.mrf.mxu0  ;;  %v9665_v33 = vadd.f32 %v2243_v25, %v1791_v46  ;;  %v1802_v28 = vadd.f32 %v6921_v58, %v10517_v9  ;;  %v9670_v29 = vsel %vm8267_vm13, %v6408_v34, %v5317_v3  ;;  %v5319_v21 = vrot.slane %v5317_v3, 4  ;;  %v5192_v7 = vld [vmem:[#allocation2 + $0x9c] sm:$0xe]  ;;  %v10519_v14 = vld [vmem:[#allocation19_spill] sm:$0xff] }
 0x1bb   : > { %v1793_v13 = vpop.f32.mrf.mxu1  ;;  %v4728_v32 = vsel %vm7879_vm7, %v9650_v1, %v9589_v15  ;;  %v5324_v26 = vrot.slane %v9613_v43, 5  ;;  %v4764_v25 = vshrl.u32 %v4463_v37, 16  ;;  %v4767_v12 = vshll.u32 %v4463_v37, 16 }
 0x1bc   : > { %10516 = vst [vmem:[#allocation18_spill] sm:$0xff] %v9665_v33  ;;  %v6973_v52 = vpop.f32.mrf.mxu0  ;;  %v9677_v46 = vadd.f32 %v6969_v47, %v1802_v28  ;;  %v1794_v58 = vadd.f32 %v1793_v13, %v10519_v14  ;;  %v4773_v34 = vshll.u32 %v9663_v31, 16  ;;  %v4777_v3 = vshrl.u32 %v9663_v31, 16  ;;  %v10520_v28 = vld [vmem:[#allocation20_spill] sm:$0xff] }
 0x1bd   : > { %v6924_v9 = vpop.f32.mrf.mxu1  ;;  %v4738_v15 = vsel %vm7879_vm7, %v4733_v10, %v9652_v17  ;;  %v4746_v1 = vor.u32 %v4745_v23, %v4742_v39  ;;  %v4756_v43 = vor.u32 %v4755_v30, %v9661_v35  ;;  %v4759_v37 = vshll.u32 %v4462_v40, 16 }
 0x1be   : > { %10518 = vst [vmem:[#allocation26_spill] sm:$0xff] %v9677_v46  ;;  %v2262_v33 = vpop.f32.mrf.mxu0  ;;  %v9687_v47 = vadd.f32 %v2246_v27, %v1794_v58  ;;  %v1815_v13 = vadd.f32 %v6924_v9, %v10520_v28  ;;  %v9693_v14 = vsel %vm8267_vm13, %v5319_v21, %v5320_v63  ;;  %v10521_v17 = vcombine.low %v9457_v38, %v9470_v51  ;;  %v9704_v63 = vld [vmem:[#allocation2 + $0xb0] sm:$0x1] }
 0x1bf   : > { %7211 = vmatmul.mubr.bf16.gmra.mxu1 %v9407_v62  ;;  %v6409_v62 = vrot.slane %v5192_v7, 9  ;;  %v1806_v46 = vpop.f32.mrf.mxu1  ;;  %v5326_v10 = vrot.slane %v5324_v26, 4  ;;  %v5327_v39 = vrot.slane %v4462_v40, 5  ;;  %v4766_v23 = vrot.slane %v4764_v25, 4 }
 0x1c0   : > { %7214 = vmatprep.mubr.bf16.mxu1 %v9440_v5  ;;  %v6976_v4 = vpop.f32.mrf.mxu0  ;;  %v4769_v27 = vrot.slane %v4767_v12, 5  ;;  %v9698_v30 = vadd.f32 %v6972_v22, %v1815_v13  ;;  %v1807_v58 = vadd.f32 %v1806_v46, %v9313_v55  ;;  %v10522_v5 = vcombine.low %v9495_v36, %v9501_v50 }
 0x1c1   : > { %7263 = vmatmul.mubr.bf16.gmra.mxu0 %v10521_v17  ;;  %v9706_v21 = vrot.slane %v4773_v34, 5  ;;  %v4779_v7 = vrot.slane %v4777_v3, 4  ;;  %v6925_v9 = vpop.f32.mrf.mxu1  ;;  %v10523_v51 = vsel %vm7879_vm7, %v9608_v61, %v9553_v54  ;;  %v4747_v40 = vrot.slane %v4746_v1, 4  ;;  %v5193_v34 = vld [vmem:[#allocation2 + $0xa8] sm:$0xe] }
 0x1c2   : > { %7266 = vmatprep.mubr.bf16.mxu0 %v10522_v5  ;;  %v2275_v38 = vpop.f32.mrf.mxu0  ;;  %v9713_v22 = vcombine.low %v10523_v51, %v4714_v20  ;;  %v4757_v55 = vrot.slane %v4756_v43, 4  ;;  %v4761_v25 = vrot.slane %v4759_v37, 5  ;;  %v9715_v12 = vadd.f32 %v2259_v8, %v1807_v58  ;;  %v4466_v20 = vld [vmem:[#allocation2 + $0xb4] sm:$0xf]  ;;  %v9737_v37 = vld [vmem:[#allocation2 + $0xb8] sm:$0xf] }
 0x1c3   : > { %v1818_v36 = vadd.f32 %v6925_v9, %v9359_v0  ;;  %v6423_v50 = vcombine.low %v9626_v16, %v9648_v48  ;;  %v9720_v46 = vcombine.low %v4728_v32, %v4738_v15  ;;  %v1809_v3 = vpop.f32.mrf.mxu1  ;;  %v6424_v54 = vcombine.low %v9670_v29, %v9693_v14 }
 0x1c4   : > { %v6977_v28 = vpop.f32.mrf.mxu0  ;;  %v9726_v61 = vsel %vm8267_vm13, %v6409_v62, %v5324_v26  ;;  %v9730_v8 = vsel %vm8267_vm13, %v5326_v10, %v5327_v39  ;;  %v4783_v0 = vshll.u32 %v9704_v63, 16  ;;  %v1810_v32 = vadd.f32 %v1809_v3, %v9390_v59 }
 0x1c5   : > { %v9733_v1 = vadd.f32 %v6973_v52, %v1818_v36  ;;  %v4770_v15 = vor.u32 %v4769_v27, %v4766_v23  ;;  %v4780_v43 = vor.u32 %v4779_v7, %v9706_v21  ;;  %v6928_v13 = vpop.f32.mrf.mxu1  ;;  %v4752_v62 = vsel %vm7879_vm7, %v4747_v40, %v9661_v35 }
 0x1c6   : > { %v2278_v26 = vpop.f32.mrf.mxu0  ;;  %v4762_v17 = vsel %vm7879_vm7, %v4757_v55, %v4761_v25  ;;  %v6410_v52 = vrot.slane %v5193_v34, 9  ;;  %v5331_v10 = vrot.slane %v9663_v31, 5  ;;  %v9746_v59 = vadd.f32 %v2262_v33, %v1810_v32 }
 0x1c7   : > { %7215 = vmatmul.mubr.bf16.gmra.mxu1 %v9522_v44  ;;  %v1831_v39 = vadd.f32 %v6928_v13, %v9416_v18  ;;  %v4788_v23 = vshrl.u32 %v4466_v20, 16  ;;  %v4791_v27 = vshll.u32 %v4466_v20, 16  ;;  %v1822_v44 = vpop.f32.mrf.mxu1  ;;  %v10524_v5 = vcombine.low %v9568_v53, %v9572_v19  ;;  %v4469_v53 = vld [vmem:[#allocation2 + $0xc0] sm:$0xf]  ;;  %v9775_v20 = vld [vmem:[#allocation2 + $0xc4] sm:$0xf] }
 0x1c8   : > { %7218 = vmatprep.mubr.bf16.mxu1 %v9529_v45  ;;  %v6980_v58 = vpop.f32.mrf.mxu0  ;;  %v6425_v35 = vcombine.low %v9726_v61, %v9730_v8  ;;  %v4785_v7 = vrot.slane %v4783_v0, 5  ;;  %v4797_v31 = vshll.u32 %v9737_v37, 16  ;;  %v4801_v33 = vshrl.u32 %v9737_v37, 16  ;;  %v5196_v61 = vld [vmem:[#allocation2 + $0xcc] sm:$0xe] }
 0x1c9   : > { %7267 = vmatmul.mubr.bf16.gmra.mxu0 %v10524_v5  ;;  %v9757_v9 = vadd.f32 %v6976_v4, %v1831_v39  ;;  %v1823_v18 = vadd.f32 %v1822_v44, %v9436_v49  ;;  %v10525_v45 = vcombine.low %v9600_v57, %v9604_v60  ;;  %v4771_v51 = vrot.slane %v4770_v15, 4  ;;  %v6929_v19 = vpop.f32.mrf.mxu1  ;;  %v9773_v57 = vld [vmem:[#allocation2 + $0xbc] sm:$0x1] }
 0x1ca   : > { %v4781_v40 = vrot.slane %v4780_v43, 4  ;;  %v2291_v55 = vpop.f32.mrf.mxu0  ;;  %v9763_v25 = vcombine.low %v4752_v62, %v4762_v17  ;;  %v9767_v36 = vsel %vm8267_vm13, %v6410_v52, %v5331_v10  ;;  %v5333_v34 = vrot.slane %v5331_v10, 4  ;;  %v9779_v62 = vld [vmem:[#allocation2 + $0xb4] sm:$0xe] }
 0x1cb   : > { %7270 = vmatprep.mubr.bf16.mxu0 %v10525_v45  ;;  %v5334_v4 = vrot.slane %v9704_v63, 5  ;;  %v9770_v3 = vadd.f32 %v2275_v38, %v1823_v18  ;;  %v1834_v49 = vadd.f32 %v6929_v19, %v9466_v2  ;;  %v4790_v60 = vrot.slane %v4788_v23, 4  ;;  %v1825_v32 = vpop.f32.mrf.mxu1  ;;  %v10527_v19 = vld [vmem:[#allocation36_spill] sm:$0xff] }
 0x1cc   : > { %v4793_v0 = vrot.slane %v4791_v27, 5  ;;  %v6981_v15 = vpop.f32.mrf.mxu0  ;;  %v9777_v43 = vrot.slane %v4797_v31, 5  ;;  %v4803_v13 = vrot.slane %v4801_v33, 4  ;;  %v4812_v17 = vshrl.u32 %v4469_v53, 16 }
 0x1cd   : > { %v4815_v52 = vshll.u32 %v4469_v53, 16  ;;  %v9781_v63 = vadd.f32 %v6977_v28, %v1834_v49  ;;  %v1826_v38 = vadd.f32 %v1825_v32, %v9484_v42  ;;  %v4776_v2 = vsel %vm7879_vm7, %v4771_v51, %v9706_v21  ;;  %v6932_v39 = vpop.f32.mrf.mxu1  ;;  %v10526_v21 = vld [vmem:[#allocation34_spill] sm:$0xff]  ;;  %v10528_v32 = vld [vmem:[#allocation37_spill] sm:$0xff] }
 0x1ce   : > { %v4786_v10 = vsel %vm7879_vm7, %v4781_v40, %v4785_v7  ;;  %v2294_v23 = vpop.f32.mrf.mxu0  ;;  %v9792_v27 = vsel %vm8267_vm13, %v5333_v34, %v5334_v4  ;;  %v4807_v28 = vshll.u32 %v9773_v57, 16  ;;  %v4821_v44 = vshll.u32 %v9775_v20, 16  ;;  %v5195_v4 = vld [vmem:[#allocation2 + $0xc0] sm:$0xe] }
 0x1cf   : > { %7219 = vmatmul.mubr.bf16.gmra.mxu1 %v9585_v11  ;;  %v4825_v42 = vshrl.u32 %v9775_v20, 16  ;;  %v9797_v5 = vadd.f32 %v2278_v26, %v1826_v38  ;;  %v1847_v31 = vadd.f32 %v6932_v39, %v10526_v21  ;;  %v4794_v7 = vor.u32 %v4793_v0, %v4790_v60  ;;  %v1838_v33 = vpop.f32.mrf.mxu1 }
 0x1d0   : > { %7222 = vmatprep.mubr.bf16.mxu1 %v9620_v6  ;;  %v6411_v11 = vrot.slane %v9779_v62, 9  ;;  %v6984_v18 = vpop.f32.mrf.mxu0  ;;  %v4804_v45 = vor.u32 %v4803_v13, %v9777_v43  ;;  %v5338_v51 = vrot.slane %v9737_v37, 5  ;;  %v4814_v40 = vrot.slane %v4812_v17, 4  ;;  %v4471_v13 = vld [vmem:[#allocation2 + $0xc8] sm:$0x1] }
 0x1d1   : > { %7271 = vmatmul.mubr.bf16.gmra.mxu0 %v6423_v50  ;;  %v4817_v26 = vrot.slane %v4815_v52, 5  ;;  %v9807_v53 = vadd.f32 %v6980_v58, %v1847_v31  ;;  %v1839_v34 = vadd.f32 %v1838_v33, %v10527_v19  ;;  %v9813_v6 = vcombine.low %v4776_v2, %v4786_v10  ;;  %v6933_v48 = vpop.f32.mrf.mxu1  ;;  %v9830_v10 = vld [vmem:[#allocation2 + $0xd0] sm:$0xf] }
 0x1d2   : > { %7274 = vmatprep.mubr.bf16.mxu0 %v6424_v54  ;;  %v5345_v16 = vrot.slane %v9775_v20, 5  ;;  %v2307_v50 = vpop.f32.mrf.mxu0  ;;  %v6426_v37 = vcombine.low %v9767_v36, %v9792_v27  ;;  %v9818_v49 = vrot.slane %v4807_v28, 5  ;;  %v9820_v58 = vrot.slane %v4821_v44, 5  ;;  %v4472_v20 = vld [vmem:[#allocation2 + $0xcc] sm:$0xf] }
 0x1d3   : > { %v4827_v60 = vrot.slane %v4825_v42, 4  ;;  %v9822_v0 = vadd.f32 %v2291_v55, %v1839_v34  ;;  %v1850_v29 = vadd.f32 %v6933_v48, %v10528_v32  ;;  %v9825_v14 = vrot.slane %v4794_v7, 4  ;;  %v1841_v62 = vpop.f32.mrf.mxu1  ;;  %v10530_v48 = vld [vmem:[#allocation27_spill] sm:$0xff] }
 0x1d4   : > { %v5341_v54 = vrot.slane %v9773_v57, 5  ;;  %v6985_v17 = vpop.f32.mrf.mxu0  ;;  %v9828_v52 = vrot.slane %v4804_v45, 4  ;;  %v5340_v36 = vrot.slane %v5338_v51, 4  ;;  %v4818_v38 = vor.u32 %v4817_v26, %v4814_v40  ;;  %v10529_v45 = vld [vmem:[#allocation25_spill] sm:$0xff] }
 0x1d5   : > { %v6412_v2 = vrot.slane %v5195_v4, 9  ;;  %v9832_v39 = vadd.f32 %v6981_v15, %v1850_v29  ;;  %v1842_v55 = vadd.f32 %v1841_v62, %v9562_v56  ;;  %v5347_v27 = vrot.slane %v5345_v16, 4  ;;  %v6936_v44 = vpop.f32.mrf.mxu1  ;;  %v4474_v62 = vld [vmem:[#allocation2 + $0xd4] sm:$0x1] }
 0x1d6   : > { %v5348_v28 = vrot.slane %v4471_v13, 5  ;;  %v2310_v57 = vpop.f32.mrf.mxu0  ;;  %v4828_v42 = vor.u32 %v4827_v60, %v9820_v58  ;;  %v4831_v21 = vshll.u32 %v4471_v13, 16  ;;  %v4836_v31 = vshrl.u32 %v4472_v20, 16 }
 0x1d7   : > { %7223 = vmatmul.mubr.bf16.gmra.mxu1 %v9713_v22  ;;  %v4839_v7 = vshll.u32 %v4472_v20, 16  ;;  %v9837_v33 = vadd.f32 %v2294_v23, %v1842_v55  ;;  %v1863_v40 = vadd.f32 %v6936_v44, %v10529_v45  ;;  %v4845_v15 = vshll.u32 %v9830_v10, 16  ;;  %v1854_v26 = vpop.f32.mrf.mxu1 }
 0x1d8   : > { %7226 = vmatprep.mubr.bf16.mxu1 %v9720_v46  ;;  %v4849_v56 = vshrl.u32 %v9830_v10, 16  ;;  %v6988_v19 = vpop.f32.mrf.mxu0  ;;  %v5339_v22 = vsel %vm8267_vm13, %v6411_v11, %v5338_v51  ;;  %v5342_v23 = vsel %vm8267_vm13, %v5340_v36, %v5341_v54  ;;  %v4819_v34 = vrot.slane %v4818_v38, 4 }
 0x1d9   : > { %7275 = vmatmul.mubr.bf16.gmra.mxu0 %v6425_v35  ;;  %v5346_v46 = vsel %vm8267_vm13, %v6412_v2, %v5345_v16  ;;  %v9852_v4 = vadd.f32 %v6984_v18, %v1863_v40  ;;  %v1855_v60 = vadd.f32 %v1854_v26, %v10530_v48  ;;  %v5349_v32 = vsel %vm8267_vm13, %v5347_v27, %v5348_v28  ;;  %v6937_v35 = vpop.f32.mrf.mxu1  ;;  %v10531_v16 = vld [vmem:[#allocation24_spill] sm:$0xff] }
 0x1da   : > { %7278 = vmatprep.mubr.bf16.mxu0 %v6426_v37  ;;  %v5352_v8 = vrot.slane %v9830_v10, 5  ;;  %v2323_v11 = vpop.f32.mrf.mxu0  ;;  %v4829_v51 = vrot.slane %v4828_v42, 4  ;;  %v4833_v29 = vrot.slane %v4831_v21, 5  ;;  %v4838_v54 = vrot.slane %v4836_v31, 4  ;;  %v10532_v42 = vld [vmem:[#allocation21_spill] sm:$0xff] }
 0x1db   : > { %v4841_v13 = vrot.slane %v4839_v7, 5  ;;  %v9858_v20 = vadd.f32 %v2307_v50, %v1855_v60  ;;  %v1866_v18 = vadd.f32 %v6937_v35, %v10531_v16  ;;  %v4847_v36 = vrot.slane %v4845_v15, 5  ;;  %v1857_v37 = vpop.f32.mrf.mxu1 }
 0x1dc   : > { %v4851_v38 = vrot.slane %v4849_v56, 4  ;;  %v6989_v2 = vpop.f32.mrf.mxu0  ;;  %v4800_v10 = vsel %vm7879_vm7, %v9825_v14, %v9777_v43  ;;  %v6427_v55 = vcombine.low %v5339_v22, %v5342_v23  ;;  %v6428_v27 = vcombine.low %v5346_v46, %v5349_v32  ;;  %v10533_v56 = vld [vmem:[#allocation22_spill] sm:$0xff] }
 0x1dd   : > { %v6413_v28 = vrot.slane %v5196_v61, 9  ;;  %v9865_v44 = vadd.f32 %v6985_v17, %v1866_v18  ;;  %v1858_v50 = vadd.f32 %v1857_v37, %v10532_v42  ;;  %v5354_v21 = vrot.slane %v5352_v8, 4  ;;  %v6940_v7 = vpop.f32.mrf.mxu1 }
 0x1de   : > { %v5355_v31 = vrot.slane %v4474_v62, 5  ;;  %v2326_v45 = vpop.f32.mrf.mxu0  ;;  %v4810_v40 = vsel %vm7879_vm7, %v9828_v52, %v9818_v49  ;;  %v4824_v43 = vsel %vm7879_vm7, %v4819_v34, %v9820_v58  ;;  %v4834_v14 = vsel %vm7879_vm7, %v4829_v51, %v4833_v29  ;;  %v10534_v52 = vld [vmem:[#allocation28_spill] sm:$0xff]  ;;  %v10535_v51 = vld [vmem:[#allocation29_spill] sm:$0xff] }
 0x1df   : > { %7227 = vmatmul.mubr.bf16.gmra.mxu1 %v9763_v25  ;;  %v4855_v17 = vshll.u32 %v4474_v62, 16  ;;  %v9878_v15 = vadd.f32 %v2310_v57, %v1858_v50  ;;  %v1879_v26 = vadd.f32 %v6940_v7, %v10533_v56  ;;  %v4842_v25 = vor.u32 %v4841_v13, %v4838_v54  ;;  %v1870_v23 = vpop.f32.mrf.mxu1 }
 0x1e0   : > { %7230 = vmatprep.mubr.bf16.mxu1 %v9813_v6  ;;  %v4852_v22 = vor.u32 %v4851_v38, %v4847_v36  ;;  %v6992_v46 = vpop.f32.mrf.mxu0  ;;  %v1871_v48 = vadd.f32 %v1870_v23, %v10534_v52  ;;  %v5353_v58 = vsel %vm8267_vm13, %v6413_v28, %v5352_v8  ;;  %v5356_v57 = vsel %vm8267_vm13, %v5354_v21, %v5355_v31  ;;  %v10536_v8 = vld [vmem:[#allocation30_spill] sm:$0xff]  ;;  %v10538_v21 = vld [vmem:[#allocation32_spill] sm:$0xff] }
 0x1e1   : > { %7279 = vmatmul.mubr.bf16.gmra.mxu0 %v6427_v55  ;;  %v9882_v49 = vadd.f32 %v6988_v19, %v1879_v26  ;;  %v6941_v34 = vpop.f32.mrf.mxu1  ;;  %v6387_v60 = vcombine.low %v4800_v10, %v4810_v40  ;;  %v6388_v6 = vcombine.low %v4824_v43, %v4834_v14  ;;  %v4857_v61 = vrot.slane %v4855_v17, 5  ;;  %v10537_v55 = vld [vmem:[#allocation31_spill] sm:$0xff]  ;;  %v10539_v14 = vld [vmem:[#allocation33_spill] sm:$0xff]  ;;  %v10541_v52 = vld [vmem:[#allocation38_spill] sm:$0xff] }
 0x1e2   : > { %7282 = vmatprep.mubr.bf16.mxu0 %v6428_v27  ;;  %v2339_v32 = vpop.f32.mrf.mxu0  ;;  %v9889_v35 = vadd.f32 %v2323_v11, %v1871_v48  ;;  %v1882_v29 = vadd.f32 %v6941_v34, %v10535_v51  ;;  %v4843_v19 = vrot.slane %v4842_v25, 4  ;;  %v4853_v54 = vrot.slane %v4852_v22, 4 }
 0x1e3   : > { %v1873_v13 = vpop.f32.mrf.mxu1  ;;  %v6429_v18 = vcombine.low %v5353_v58, %v5356_v57 }
 0x1e4   : > { %v6993_v16 = vpop.f32.mrf.mxu0  ;;  %v9892_v62 = vadd.f32 %v6989_v2, %v1882_v29  ;;  %v1874_v38 = vadd.f32 %v1873_v13, %v10536_v8  ;;  %v4848_v11 = vsel %vm7879_vm7, %v4843_v19, %v4847_v36  ;;  %v4858_v28 = vsel %vm7879_vm7, %v4853_v54, %v4857_v61  ;;  %v10543_v29 = vld [vmem:[#allocation17_spill] sm:$0xff] }
 0x1e5   : > { %v6944_v41 = vpop.f32.mrf.mxu1  ;;  %v6389_v40 = vcombine.low %v4848_v11, %v4858_v28 }
 0x1e6   : > { %v2342_v37 = vpop.f32.mrf.mxu0  ;;  %v9895_v10 = vadd.f32 %v2326_v45, %v1874_v38  ;;  %v1895_v27 = vadd.f32 %v6944_v41, %v10537_v55  ;;  %v10545_v55 = vld [vmem:[#allocation16_spill] sm:$0xff] }
 0x1e7   : > { %7231 = vmatmul.mubr.bf16.gmra.mxu1 %v6387_v60  ;;  %v1886_v42 = vpop.f32.mrf.mxu1  ;;  %v10542_v60 = vld [vmem:[#allocation23_spill] sm:$0xff] }
 0x1e8   : > { %7234 = vmatprep.mubr.bf16.mxu1 %v6388_v6  ;;  %v9902_v2 = vadd.f32 %v6992_v46, %v1895_v27  ;;  %v1887_v31 = vadd.f32 %v1886_v42, %v10538_v21 }
 0x1e9   : > { %v6996_v50 = vpop.f32.mrf.mxu0  ;;  %7283 = vmatmul.mubr.bf16.gmra.mxu0 %v6429_v18  ;;  %v6945_v7 = vpop.f32.mrf.mxu1  ;;  %v10544_v18 = vld [vmem:[#allocation39_spill] sm:$0xff] }
 0x1ea   : > { %v9905_v43 = vadd.f32 %v2339_v32, %v1887_v31  ;;  %v1898_v17 = vadd.f32 %v6945_v7, %v10539_v14 }
 0x1eb   : > { %v2355_v45 = vpop.f32.mrf.mxu0  ;;  %v1889_v56 = vpop.f32.mrf.mxu1 }
 0x1ec   : > { %v9908_v36 = vadd.f32 %v6993_v16, %v1898_v17  ;;  %v1890_v25 = vadd.f32 %v1889_v56, %v10540_v24 }
 0x1ed   : > { %v6997_v26 = vpop.f32.mrf.mxu0 }
 0x1ee   : > { %v9911_v46 = vadd.f32 %v2342_v37, %v1890_v25 }
 0x1ef   : > { %v6948_v22 = vpop.f32.mrf.mxu1  ;;  %7235 = vmatmul.mubr.bf16.gmra.mxu1 %v6389_v40  ;;  %v2358_v23 = vpop.f32.mrf.mxu0 }
 0x1f0   : > { %v1911_v48 = vadd.f32 %v6948_v22, %v10541_v52 }
 0x1f1   : > { %v1902_v58 = vpop.f32.mrf.mxu1  ;;  %v7064_v57 = vpop.f32.mrf.mxu0 }
 0x1f2   : > { %v9914_v34 = vadd.f32 %v6996_v50, %v1911_v48  ;;  %v1903_v32 = vadd.f32 %v1902_v58, %v10542_v60  ;;  %v10546_v50 = vld [vmem:[#allocation18_spill] sm:$0xff] }
 0x1f3   : > { %v6949_v6 = vpop.f32.mrf.mxu1  ;;  %v3383_v61 = vpop.f32.mrf.mxu0 }
 0x1f4   : > { %v9917_v51 = vadd.f32 %v2355_v45, %v1903_v32  ;;  %v1914_v19 = vadd.f32 %v6949_v6, %v10543_v29  ;;  %v10547_v45 = vld [vmem:[#allocation26_spill] sm:$0xff] }
 0x1f5   : > { %v1905_v54 = vpop.f32.mrf.mxu1  ;;  %v7065_v13 = vpop.f32.mrf.mxu0 }
 0x1f6   : > { %v9920_v16 = vadd.f32 %v6997_v26, %v1914_v19  ;;  %v1906_v8 = vadd.f32 %v1905_v54, %v10544_v18 }
 0x1f7   : > { %v7016_v38 = vpop.f32.mrf.mxu1  ;;  %v3386_v41 = vpop.f32.mrf.mxu0 }
 0x1f8   : > { %v9923_v37 = vadd.f32 %v2358_v23, %v1906_v8  ;;  %v2758_v27 = vadd.f32 %v7016_v38, %v10545_v55 }
 0x1f9   : > { %v2629_v11 = vpop.f32.mrf.mxu1  ;;  %v7068_v28 = vpop.f32.mrf.mxu0 }
 0x1fa   : > { %v9926_v42 = vadd.f32 %v7064_v57, %v2758_v27  ;;  %v2756_v21 = vadd.f32 %v2629_v11, %v10546_v50 }
 0x1fb   : > { %v7017_v31 = vpop.f32.mrf.mxu1  ;;  %v3399_v7 = vpop.f32.mrf.mxu0 }
 0x1fc   : > { %v9929_v40 = vadd.f32 %v3383_v61, %v2756_v21  ;;  %v2759_v14 = vadd.f32 %v7017_v31, %v10547_v45 }
 0x1fd   : > { %v2632_v17 = vpop.f32.mrf.mxu1  ;;  %v7069_v56 = vpop.f32.mrf.mxu0 }
 0x1fe   : > { %v9932_v26 = vadd.f32 %v7065_v13, %v2759_v14  ;;  %v2757_v24 = vadd.f32 %v2632_v17, %v9687_v47 }
 0x1ff   : > { %v7020_v25 = vpop.f32.mrf.mxu1  ;;  %v3402_v22 = vpop.f32.mrf.mxu0 }
 0x200   : > { %v9935_v23 = vadd.f32 %v3386_v41, %v2757_v24  ;;  %v2762_v52 = vadd.f32 %v7020_v25, %v9698_v30 }
 0x201   : > { %v2645_v48 = vpop.f32.mrf.mxu1  ;;  %v7072_v58 = vpop.f32.mrf.mxu0 }
 0x202   : > { %v9938_v57 = vadd.f32 %v7068_v28, %v2762_v52  ;;  %v2760_v60 = vadd.f32 %v2645_v48, %v9715_v12 }
 0x203   : > { %v7021_v32 = vpop.f32.mrf.mxu1  ;;  %v3415_v6 = vpop.f32.mrf.mxu0 }
 0x204   : > { %v9941_v61 = vadd.f32 %v3399_v7, %v2760_v60  ;;  %v2763_v29 = vadd.f32 %v7021_v32, %v9733_v1 }
 0x205   : > { %v2648_v19 = vpop.f32.mrf.mxu1  ;;  %v7073_v47 = vpop.f32.mrf.mxu0 }
 0x206   : > { %v9944_v54 = vadd.f32 %v7069_v56, %v2763_v29  ;;  %v2761_v13 = vadd.f32 %v2648_v19, %v9746_v59 }
 0x207   : > { %v7024_v18 = vpop.f32.mrf.mxu1  ;;  %v3418_v30 = vpop.f32.mrf.mxu0 }
 0x208   : > { %v9947_v8 = vadd.f32 %v3402_v22, %v2761_v13  ;;  %v2766_v38 = vadd.f32 %v7024_v18, %v9757_v9 }
 0x209   : > { %v2661_v41 = vpop.f32.mrf.mxu1  ;;  %v7076_v12 = vpop.f32.mrf.mxu0 }
 0x20a   : > { %v9950_v55 = vadd.f32 %v7072_v58, %v2766_v38  ;;  %v2764_v27 = vadd.f32 %v2661_v41, %v9770_v3 }
 0x20b   : > { %v7025_v11 = vpop.f32.mrf.mxu1  ;;  %v3431_v1 = vpop.f32.mrf.mxu0 }
 0x20c   : > { %v9953_v28 = vadd.f32 %v3415_v6, %v2764_v27  ;;  %v2767_v50 = vadd.f32 %v7025_v11, %v9781_v63 }
 0x20d   : > { %v2664_v21 = vpop.f32.mrf.mxu1  ;;  %v7077_v59 = vpop.f32.mrf.mxu0 }
 0x20e   : > { %v9956_v31 = vadd.f32 %v7073_v47, %v2767_v50  ;;  %v2765_v7 = vadd.f32 %v2664_v21, %v9797_v5 }
 0x20f   : > { %v7028_v45 = vpop.f32.mrf.mxu1  ;;  %v3434_v9 = vpop.f32.mrf.mxu0 }
 0x210   : > { %v9959_v14 = vadd.f32 %v3418_v30, %v2765_v7  ;;  %v2770_v17 = vadd.f32 %v7028_v45, %v9807_v53 }
 0x211   : > { %v2677_v56 = vpop.f32.mrf.mxu1  ;;  %v7080_v3 = vpop.f32.mrf.mxu0 }
 0x212   : > { %v9962_v24 = vadd.f32 %v7076_v12, %v2770_v17  ;;  %v2768_v25 = vadd.f32 %v2677_v56, %v9822_v0 }
 0x213   : > { %v7029_v22 = vpop.f32.mrf.mxu1  ;;  %v3447_v63 = vpop.f32.mrf.mxu0 }
 0x214   : > { %v9965_v52 = vadd.f32 %v3431_v1, %v2768_v25  ;;  %v2771_v48 = vadd.f32 %v7029_v22, %v9832_v39 }
 0x215   : > { %v2680_v58 = vpop.f32.mrf.mxu1  ;;  %v7081_v5 = vpop.f32.mrf.mxu0 }
 0x216   : > { %v9968_v60 = vadd.f32 %v7077_v59, %v2771_v48  ;;  %v2769_v32 = vadd.f32 %v2680_v58, %v9837_v33 }
 0x217   : > { %v7032_v6 = vpop.f32.mrf.mxu1  ;;  %v3450_v53 = vpop.f32.mrf.mxu0 }
 0x218   : > { %v9971_v29 = vadd.f32 %v3434_v9, %v2769_v32  ;;  %v2774_v19 = vadd.f32 %v7032_v6, %v9852_v4 }
 0x219   : > { %v2693_v47 = vpop.f32.mrf.mxu1  ;;  %v7084_v0 = vpop.f32.mrf.mxu0 }
 0x21a   : > { %v9974_v13 = vadd.f32 %v7080_v3, %v2774_v19  ;;  %v2772_v18 = vadd.f32 %v2693_v47, %v9858_v20 }
 0x21b   : > { %v7033_v30 = vpop.f32.mrf.mxu1  ;;  %v3463_v39 = vpop.f32.mrf.mxu0 }
 0x21c   : > { %v9977_v38 = vadd.f32 %v3447_v63, %v2772_v18  ;;  %v2775_v41 = vadd.f32 %v7033_v30, %v9865_v44 }
 0x21d   : > { %v2696_v12 = vpop.f32.mrf.mxu1  ;;  %v7085_v33 = vpop.f32.mrf.mxu0 }
 0x21e   : > { %v9980_v27 = vadd.f32 %v7081_v5, %v2775_v41  ;;  %v2773_v11 = vadd.f32 %v2696_v12, %v9878_v15 }
 0x21f   : > { %v7036_v1 = vpop.f32.mrf.mxu1  ;;  %v3466_v4 = vpop.f32.mrf.mxu0 }
 0x220   : > { %v9983_v50 = vadd.f32 %v3450_v53, %v2773_v11  ;;  %v2778_v21 = vadd.f32 %v7036_v1, %v9882_v49 }
 0x221   : > { %v2709_v59 = vpop.f32.mrf.mxu1  ;;  %v7088_v20 = vpop.f32.mrf.mxu0 }
 0x222   : > { %v9986_v7 = vadd.f32 %v7084_v0, %v2778_v21  ;;  %v2776_v45 = vadd.f32 %v2709_v59, %v9889_v35 }
 0x223   : > { %v7037_v9 = vpop.f32.mrf.mxu1  ;;  %v3479_v44 = vpop.f32.mrf.mxu0 }
 0x224   : > { %v9989_v17 = vadd.f32 %v3463_v39, %v2776_v45  ;;  %v2779_v56 = vadd.f32 %v7037_v9, %v9892_v62 }
 0x225   : > { %v2712_v3 = vpop.f32.mrf.mxu1  ;;  %v7089_v15 = vpop.f32.mrf.mxu0 }
 0x226   : > { %10548 = vst [vmem:[#allocation19_spill] sm:$0xff] %v9989_v17  ;;  %v9992_v25 = vadd.f32 %v7085_v33, %v2779_v56  ;;  %v2777_v22 = vadd.f32 %v2712_v3, %v9895_v10 }
 0x227   : > { %v7040_v63 = vpop.f32.mrf.mxu1  ;;  %v3482_v49 = vpop.f32.mrf.mxu0 }
 0x228   : > { %10549 = vst [vmem:[#allocation20_spill] sm:$0xff] %v9992_v25  ;;  %v9995_v48 = vadd.f32 %v3466_v4, %v2777_v22  ;;  %v2782_v58 = vadd.f32 %v7040_v63, %v9902_v2 }
 0x229   : > { %v2725_v5 = vpop.f32.mrf.mxu1  ;;  %v7092_v35 = vpop.f32.mrf.mxu0 }
 0x22a   : > { %10550 = vst [vmem:[#allocation34_spill] sm:$0xff] %v9995_v48  ;;  %v9998_v32 = vadd.f32 %v7088_v20, %v2782_v58  ;;  %v2780_v6 = vadd.f32 %v2725_v5, %v9905_v43 }
 0x22b   : > { %v7041_v53 = vpop.f32.mrf.mxu1  ;;  %v3495_v62 = vpop.f32.mrf.mxu0 }
 0x22c   : > { %v10001_v19 = vadd.f32 %v3479_v44, %v2780_v6  ;;  %v2783_v47 = vadd.f32 %v7041_v53, %v9908_v36 }
 0x22d   : > { %v2728_v0 = vpop.f32.mrf.mxu1  ;;  %v7093_v10 = vpop.f32.mrf.mxu0 }
 0x22e   : > { %10551 = vst [vmem:[#allocation36_spill] sm:$0xff] %v10001_v19  ;;  %v10004_v18 = vadd.f32 %v7089_v15, %v2783_v47  ;;  %v2781_v30 = vadd.f32 %v2728_v0, %v9911_v46 }
 0x22f   : > { %v7044_v39 = vpop.f32.mrf.mxu1  ;;  %v3498_v2 = vpop.f32.mrf.mxu0 }
 0x230   : > { %10552 = vst [vmem:[#allocation37_spill] sm:$0xff] %v10004_v18  ;;  %v10007_v41 = vadd.f32 %v3482_v49, %v2781_v30  ;;  %v2786_v12 = vadd.f32 %v7044_v39, %v9914_v34 }
 0x231   : > { %v2741_v33 = vpop.f32.mrf.mxu1  ;;  %v7160_v43 = vpop.f32.mrf.mxu0 }
 0x232   : > { %10553 = vst [vmem:[#allocation25_spill] sm:$0xff] %v10007_v41  ;;  %v10010_v11 = vadd.f32 %v7092_v35, %v2786_v12  ;;  %v2784_v1 = vadd.f32 %v2741_v33, %v9917_v51 }
 0x233   : > { %v7045_v4 = vpop.f32.mrf.mxu1  ;;  %v4268_v36 = vpop.f32.mrf.mxu0 }
 0x234   : > { %v10013_v21 = vadd.f32 %v3495_v62, %v2784_v1  ;;  %v2787_v59 = vadd.f32 %v7045_v4, %v9920_v16 }
 0x235   : > { %v2744_v20 = vpop.f32.mrf.mxu1  ;;  %v10016_v46 = vpop.f32.mrf.mxu0 }
 0x236   : > { %10554 = vst [vmem:[#allocation27_spill] sm:$0xff] %v10013_v21  ;;  %v10018_v45 = vadd.f32 %v7093_v10, %v2787_v59  ;;  %v2785_v9 = vadd.f32 %v2744_v20, %v9923_v37 }
 0x237   : > { %v7112_v34 = vpop.f32.mrf.mxu1  ;;  %v10021_v44 = vpop.f32.mrf.mxu0 }
 0x238   : > { %10555 = vst [vmem:[#allocation24_spill] sm:$0xff] %v10018_v45  ;;  %v10023_v56 = vadd.f32 %v3498_v2, %v2785_v9  ;;  %v4010_v51 = vadd.f32 %v7112_v34, %v9926_v42 }
 0x239   : > { %v3881_v3 = vpop.f32.mrf.mxu1  ;;  %v7164_v15 = vpop.f32.mrf.mxu0 }
 0x23a   : > { %10556 = vst [vmem:[#allocation21_spill] sm:$0xff] %v10023_v56  ;;  %v10026_v22 = vadd.f32 %v7160_v43, %v4010_v51  ;;  %v4008_v16 = vadd.f32 %v3881_v3, %v9929_v40 }
 0x23b   : > { %v10029_v63 = vpop.f32.mrf.mxu1  ;;  %v10031_v49 = vpop.f32.mrf.mxu0 }
 0x23c   : > { %v10033_v58 = vadd.f32 %v4268_v36, %v4008_v16 }
 0x23d   : > { %v10035_v37 = vpop.f32.mrf.mxu1  ;;  %v10037_v5 = vpop.f32.mrf.mxu0 }
 0x23f   : > { %v7116_v35 = vpop.f32.mrf.mxu1  ;;  %v10039_v6 = vpop.f32.mrf.mxu0 }
 0x240   : > { %v4014_v42 = vadd.f32 %v7116_v35, %v9938_v57 }
 0x241   : > { %v10042_v53 = vpop.f32.mrf.mxu1  ;;  %v7168_v62 = vpop.f32.mrf.mxu0 }
 0x242   : > { %v10044_v47 = vadd.f32 %v7164_v15, %v4014_v42 }
 0x243   : > { %v10046_v40 = vpop.f32.mrf.mxu1  ;;  %v10048_v0 = vpop.f32.mrf.mxu0 }
 0x245   : > { %v10050_v10 = vpop.f32.mrf.mxu1  ;;  %v10052_v30 = vpop.f32.mrf.mxu0 }
 0x247   : > { %v7120_v39 = vpop.f32.mrf.mxu1  ;;  %v10054_v2 = vpop.f32.mrf.mxu0 }
 0x248   : > { %v4018_v12 = vadd.f32 %v7120_v39, %v9950_v55 }
 0x249   : > { %v10057_v33 = vpop.f32.mrf.mxu1  ;;  %v7172_v57 = vpop.f32.mrf.mxu0 }
 0x24a   : > { %v10059_v43 = vadd.f32 %v7168_v62, %v4018_v12 }
 0x24b   : > { %v10061_v1 = vpop.f32.mrf.mxu1  ;;  %v10063_v4 = vpop.f32.mrf.mxu0 }
 0x24d   : > { %v10065_v36 = vpop.f32.mrf.mxu1  ;;  %v10067_v59 = vpop.f32.mrf.mxu0 }
 0x24f   : > { %v7124_v20 = vpop.f32.mrf.mxu1  ;;  %v10069_v9 = vpop.f32.mrf.mxu0 }
 0x250   : > { %v4022_v34 = vadd.f32 %v7124_v20, %v9962_v24 }
 0x251   : > { %v10072_v51 = vpop.f32.mrf.mxu1  ;;  %v7176_v55 = vpop.f32.mrf.mxu0 }
 0x252   : > { %v10074_v3 = vadd.f32 %v7172_v57, %v4022_v34 }
 0x253   : > { %v10076_v15 = vpop.f32.mrf.mxu1  ;;  %v10078_v16 = vpop.f32.mrf.mxu0 }
 0x255   : > { %v10080_v35 = vpop.f32.mrf.mxu1  ;;  %v10082_v42 = vpop.f32.mrf.mxu0 }
 0x257   : > { %v7128_v62 = vpop.f32.mrf.mxu1  ;;  %v10084_v39 = vpop.f32.mrf.mxu0 }
 0x258   : > { %10557 = vst [vmem:[#allocation22_spill] sm:$0xff] %v10084_v39  ;;  %v4026_v12 = vadd.f32 %v7128_v62, %v9974_v13 }
 0x259   : > { %v10087_v56 = vpop.f32.mrf.mxu1  ;;  %v7180_v24 = vpop.f32.mrf.mxu0 }
 0x25a   : > { %v10089_v20 = vadd.f32 %v7176_v55, %v4026_v12 }
 0x25b   : > { %v10091_v57 = vpop.f32.mrf.mxu1  ;;  %v10093_v34 = vpop.f32.mrf.mxu0 }
 0x25c   : > { %10558 = vst [vmem:[#allocation28_spill] sm:$0xff] %v10093_v34 }
 0x25d   : > { %v10095_v45 = vpop.f32.mrf.mxu1  ;;  %v10097_v21 = vpop.f32.mrf.mxu0 }
 0x25e   : > { %10559 = vst [vmem:[#allocation29_spill] sm:$0xff] %v10097_v21 }
 0x25f   : > { %v7132_v41 = vpop.f32.mrf.mxu1  ;;  %v10099_v18 = vpop.f32.mrf.mxu0 }
 0x260   : > { %10560 = vst [vmem:[#allocation30_spill] sm:$0xff] %v10099_v18  ;;  %v4030_v19 = vadd.f32 %v7132_v41, %v9986_v7 }
 0x261   : > { %v10102_v48 = vpop.f32.mrf.mxu1  ;;  %v7184_v13 = vpop.f32.mrf.mxu0 }
 0x262   : > { %10561 = vst [vmem:[#allocation31_spill] sm:$0xff] %v10102_v48  ;;  %v10104_v62 = vadd.f32 %v7180_v24, %v4030_v19 }
 0x263   : > { %v10106_v55 = vpop.f32.mrf.mxu1  ;;  %v10108_v12 = vpop.f32.mrf.mxu0 }
 0x264   : > { %10562 = vst [vmem:[#allocation32_spill] sm:$0xff] %v10104_v62  ;;  %10563 = vst [vmem:[#allocation33_spill] sm:$0xff] %v10106_v55 }
 0x265   : > { %10564 = vst [vmem:[#allocation35_spill] sm:$0xff] %v10108_v12  ;;  %v10110_v25 = vpop.f32.mrf.mxu1  ;;  %v10112_v34 = vpop.f32.mrf.mxu0 }
 0x266   : > { %10565 = vst [vmem:[#allocation38_spill] sm:$0xff] %v10110_v25  ;;  %10566 = vst [vmem:[#allocation23_spill] sm:$0xff] %v10112_v34 }
 0x267   : > { %v7136_v17 = vpop.f32.mrf.mxu1  ;;  %v10114_v21 = vpop.f32.mrf.mxu0 }
 0x268   : > { %10567 = vst [vmem:[#allocation17_spill] sm:$0xff] %v10114_v21  ;;  %v4034_v18 = vadd.f32 %v7136_v17, %v9998_v32 }
 0x269   : > { %v10117_v39 = vpop.f32.mrf.mxu1  ;;  %v7188_v7 = vpop.f32.mrf.mxu0 }
 0x26a   : > { %10568 = vst [vmem:[#allocation39_spill] sm:$0xff] %v10117_v39  ;;  %v10119_v41 = vadd.f32 %v7184_v13, %v4034_v18 }
 0x26b   : > { %v10121_v19 = vpop.f32.mrf.mxu1  ;;  %v10123_v24 = vpop.f32.mrf.mxu0 }
 0x26c   : > { %10569 = vst [vmem:[#allocation16_spill] sm:$0xff] %v10119_v41  ;;  %10570 = vst [vmem:[#allocation18_spill] sm:$0xff] %v10121_v19 }
 0x26d   : > { %10571 = vst [vmem:[#allocation26_spill] sm:$0xff] %v10123_v24  ;;  %v10125_v62 = vpop.f32.mrf.mxu1  ;;  %v10127_v12 = vpop.f32.mrf.mxu0 }
 0x26e   : > { %10572 = vst [vmem:[#allocation40_spill] sm:$0xff] %v10125_v62  ;;  %10573 = vst [vmem:[#allocation41_spill] sm:$0xff] %v10127_v12  ;;  %v4011_v12 = vadd.f32 %v10029_v63, %v9932_v26  ;;  %v4012_v26 = vadd.f32 %v10042_v53, %v9941_v61 }
 0x26f   : > { %v7140_v25 = vpop.f32.mrf.mxu1  ;;  %v10129_v34 = vpop.f32.mrf.mxu0 }
 0x270   : > { %10574 = vst [vmem:[#allocation42_spill] sm:$0xff] %v10129_v34  ;;  %v4038_v21 = vadd.f32 %v7140_v25, %v10010_v11  ;;  %v4009_v25 = vadd.f32 %v10035_v37, %v9935_v23  ;;  %v4015_v23 = vadd.f32 %v10046_v40, %v9944_v54 }
 0x271   : > { %v10132_v55 = vpop.f32.mrf.mxu1  ;;  %v7256_v17 = vpop.f32.mrf.mxu0 }
 0x272   : > { %10575 = vst [vmem:[#allocation43_spill] sm:$0xff] %v10132_v55  ;;  %v10134_v32 = vadd.f32 %v7188_v7, %v4038_v21  ;;  %v4398_v21 = vadd.f32 %v10016_v46, %v4011_v12  ;;  %v4402_v61 = vadd.f32 %v10037_v5, %v4015_v23 }
 0x273   : > { %v10136_v18 = vpop.f32.mrf.mxu1  ;;  %v5520_v13 = vpop.f32.mrf.mxu0 }
 0x274   : > { %10576 = vst [vmem:[#allocation44_spill] sm:$0xff] %v10134_v32  ;;  %10577 = vst [vmem:[#allocation45_spill] sm:$0xff] %v10136_v18 }
 0x275   : > { %v10138_v41 = vpop.f32.mrf.mxu1  ;;  %v7257_v24 = vpop.f32.mrf.mxu0 }
 0x276   : > { %10578 = vst [vmem:[#allocation46_spill] sm:$0xff] %v10138_v41  ;;  %v4396_v41 = vadd.f32 %v10021_v44, %v4009_v25  ;;  %v4399_v25 = vadd.f32 %v10031_v49, %v4012_v26  ;;  %v4016_v49 = vadd.f32 %v10057_v33, %v9953_v28 }
 0x277   : > { %v7208_v62 = vpop.f32.mrf.mxu1  ;;  %v5523_v19 = vpop.f32.mrf.mxu0 }
 0x278   : > { %v5151_v7 = vadd.f32 %v7208_v62, %v10026_v22 }
 0x279   : > { %v5022_v11 = vpop.f32.mrf.mxu1  ;;  %v7260_v34 = vpop.f32.mrf.mxu0 }
 0x27a   : > { %v5149_v32 = vadd.f32 %v5022_v11, %v10033_v58  ;;  %v5649_v48 = vadd.f32 %v7256_v17, %v5151_v7  ;;  %v4013_v58 = vadd.f32 %v10050_v10, %v9947_v8  ;;  %v4019_v7 = vadd.f32 %v10061_v1, %v9956_v31 }
 0x27b   : > { %v7209_v18 = vpop.f32.mrf.mxu1  ;;  %v5536_v55 = vpop.f32.mrf.mxu0 }
 0x27c   : > { %v5152_v39 = vadd.f32 %v7209_v18, %v4398_v21  ;;  %v5647_v46 = vadd.f32 %v5520_v13, %v5149_v32 }
 0x27d   : > { %v5025_v63 = vpop.f32.mrf.mxu1  ;;  %v7261_v37 = vpop.f32.mrf.mxu0 }
 0x27e   : > { %v5650_v12 = vadd.f32 %v7257_v24, %v5152_v39  ;;  %v5150_v22 = vadd.f32 %v5025_v63, %v4396_v41  ;;  %v5877_v21 = vmul.f32 %v5647_v46, %v5647_v46  ;;  %v4400_v41 = vadd.f32 %v10039_v6, %v4013_v58 }
 0x27f   : > { %v7212_v62 = vpop.f32.mrf.mxu1  ;;  %v5539_v11 = vpop.f32.mrf.mxu0 }
 0x280   : > { %v6551_v44 = vpack.c.bf16 %v5650_v12, %v5649_v48  ;;  %v5648_v18 = vadd.f32 %v5523_v19, %v5150_v22  ;;  %v5155_v53 = vadd.f32 %v7212_v62, %v10044_v47  ;;  %v5879_v47 = vmul.f32 %v5649_v48, %v5649_v48 }
 0x281   : > { %v5038_v54 = vpop.f32.mrf.mxu1  ;;  %v7264_v40 = vpop.f32.mrf.mxu0  ;;  %v5880_v26 = vmul.f32 %v5650_v12, %v5650_v12  ;;  %v4403_v62 = vadd.f32 %v10048_v0, %v4016_v49 }
 0x282   : > { %6623 = vst [vmem:[%s10158_s23 + $0x8] sm:$0xff] %v6551_v44   ;;  %v6546_v39 = vpack.c.bf16 %v5648_v18, %v5647_v46  ;;  %v5839_v8 = vadd.f32 %v5648_v18, %v5647_v46  ;;  %v5878_v10 = vmul.f32 %v5648_v18, %v5648_v18  ;;  %v5153_v19 = vadd.f32 %v5038_v54, %v4399_v25 }
 0x283   : > { %v7213_v5 = vpop.f32.mrf.mxu1  ;;  %v5552_v24 = vpop.f32.mrf.mxu0  ;;  %v5653_v23 = vadd.f32 %v7260_v34, %v5155_v53 }
 0x284   : > { %6547 = vst [vmem:[%s10158_s23] sm:$0xff] %v6546_v39   ;;  %v5840_v17 = vadd.f32 %v5839_v8, %v5649_v48  ;;  %v5909_v32 = vadd.f32 %v5878_v10, %v5877_v21  ;;  %v5156_v13 = vadd.f32 %v7213_v5, %v4402_v61  ;;  %v5651_v63 = vadd.f32 %v5536_v55, %v5153_v19 }
 0x285   : > { %v5041_v46 = vpop.f32.mrf.mxu1  ;;  %v7265_v22 = vpop.f32.mrf.mxu0  ;;  %v4017_v48 = vadd.f32 %v10065_v36, %v9959_v14 }
 0x286   : > { %v5910_v6 = vadd.f32 %v5909_v32, %v5879_v47  ;;  %v5841_v58 = vadd.f32 %v5840_v17, %v5650_v12  ;;  %v5654_v28 = vadd.f32 %v7261_v37, %v5156_v13  ;;  %v5154_v33 = vadd.f32 %v5041_v46, %v4400_v41 }
 0x287   : > { %v7216_v44 = vpop.f32.mrf.mxu1  ;;  %v5555_v18 = vpop.f32.mrf.mxu0  ;;  %v5881_v61 = vmul.f32 %v5651_v63, %v5651_v63  ;;  %v4406_v12 = vadd.f32 %v10052_v30, %v4019_v7  ;;  %v4404_v10 = vadd.f32 %v10054_v2, %v4017_v48  ;;  %v4023_v41 = vadd.f32 %v10076_v15, %v9968_v60 }
 0x288   : > { %v5842_v25 = vadd.f32 %v5841_v58, %v5651_v63  ;;  %v5911_v31 = vadd.f32 %v5910_v6, %v5880_v26  ;;  %v6561_v1 = vpack.c.bf16 %v5654_v28, %v5653_v23  ;;  %v5652_v34 = vadd.f32 %v5539_v11, %v5154_v33 }
 0x289   : > { %v5054_v55 = vpop.f32.mrf.mxu1  ;;  %v7268_v53 = vpop.f32.mrf.mxu0  ;;  %v5159_v37 = vadd.f32 %v7216_v44, %v10059_v43  ;;  %v4020_v11 = vadd.f32 %v10072_v51, %v9965_v52  ;;  %v5883_v30 = vmul.f32 %v5653_v23, %v5653_v23  ;;  %v5884_v26 = vmul.f32 %v5654_v28, %v5654_v28 }
 0x28a   : > { %v5912_v54 = vadd.f32 %v5911_v31, %v5881_v61  ;;  %6625 = vst [vmem:[%s10158_s23 + $0x18] sm:$0xff] %v6561_v1   ;;  %v5157_v0 = vadd.f32 %v5054_v55, %v4403_v62  ;;  %v6556_v21 = vpack.c.bf16 %v5652_v34, %v5651_v63  ;;  %v5843_v39 = vadd.f32 %v5842_v25, %v5652_v34 }
 0x28b   : > { %v5882_v14 = vmul.f32 %v5652_v34, %v5652_v34  ;;  %v7217_v36 = vpop.f32.mrf.mxu1  ;;  %v5568_v8 = vpop.f32.mrf.mxu0  ;;  %v5657_v32 = vadd.f32 %v7264_v40, %v5159_v37  ;;  %v4407_v51 = vadd.f32 %v10063_v4, %v4020_v11  ;;  %v4021_v60 = vadd.f32 %v10080_v35, %v9971_v29 }
 0x28c   : > { %v5160_v49 = vadd.f32 %v7217_v36, %v4406_v12  ;;  %6624 = vst [vmem:[%s10158_s23 + $0x10] sm:$0xff] %v6556_v21   ;;  %v5844_v19 = vadd.f32 %v5843_v39, %v5653_v23  ;;  %v5655_v43 = vadd.f32 %v5552_v24, %v5157_v0  ;;  %v4410_v24 = vadd.f32 %v10067_v59, %v4023_v41 }
 0x28d   : > { %v5913_v5 = vadd.f32 %v5912_v54, %v5882_v14  ;;  %v5057_v47 = vpop.f32.mrf.mxu1  ;;  %v7269_v17 = vpop.f32.mrf.mxu0  ;;  %v4408_v35 = vadd.f32 %v10069_v9, %v4021_v60  ;;  %v4024_v59 = vadd.f32 %v10087_v56, %v9977_v38  ;;  %v5887_v1 = vmul.f32 %v5657_v32, %v5657_v32 }
 0x28e   : > { %v5658_v13 = vadd.f32 %v7265_v22, %v5160_v49  ;;  %v5158_v7 = vadd.f32 %v5057_v47, %v4404_v10  ;;  %v5845_v63 = vadd.f32 %v5844_v19, %v5654_v28  ;;  %v5885_v58 = vmul.f32 %v5655_v43, %v5655_v43 }
 0x28f   : > { %v5914_v2 = vadd.f32 %v5913_v5, %v5883_v30  ;;  %v7220_v46 = vpop.f32.mrf.mxu1  ;;  %v5571_v52 = vpop.f32.mrf.mxu0  ;;  %v4411_v56 = vadd.f32 %v10078_v16, %v4024_v59 }
 0x290   : > { %v6571_v15 = vpack.c.bf16 %v5658_v13, %v5657_v32  ;;  %v5656_v23 = vadd.f32 %v5555_v18, %v5158_v7  ;;  %v5846_v6 = vadd.f32 %v5845_v63, %v5655_v43  ;;  %v5163_v48 = vadd.f32 %v7220_v46, %v10074_v3  ;;  %v10580_v7 = vld [vmem:[#allocation19_spill] sm:$0xff]  ;;  %v10583_v63 = vld [vmem:[#allocation33_spill] sm:$0xff] }
 0x291   : > { %v5915_v40 = vadd.f32 %v5914_v2, %v5884_v26  ;;  %v5070_v22 = vpop.f32.mrf.mxu1  ;;  %v7272_v33 = vpop.f32.mrf.mxu0  ;;  %v4027_v18 = vadd.f32 %v10091_v57, %v9980_v27  ;;  %v5888_v39 = vmul.f32 %v5658_v13, %v5658_v13  ;;  %v4025_v27 = vadd.f32 %v10095_v45, %v9983_v50  ;;  %v10579_v45 = vld [vmem:[#allocation22_spill] sm:$0xff]  ;;  %v10582_v2 = vld [vmem:[#allocation20_spill] sm:$0xff] }
 0x292   : > { %6627 = vst [vmem:[%s10158_s23 + $0x28] sm:$0xff] %v6571_v15   ;;  %v6566_v62 = vpack.c.bf16 %v5656_v23, %v5655_v43  ;;  %v5886_v28 = vmul.f32 %v5656_v23, %v5656_v23  ;;  %v5161_v44 = vadd.f32 %v5070_v22, %v4407_v51  ;;  %v5847_v25 = vadd.f32 %v5846_v6, %v5656_v23 }
 0x293   : > { %v5916_v4 = vadd.f32 %v5915_v40, %v5885_v58  ;;  %v7221_v61 = vpop.f32.mrf.mxu1  ;;  %v5584_v29 = vpop.f32.mrf.mxu0  ;;  %v5661_v37 = vadd.f32 %v7268_v53, %v5163_v48  ;;  %v4031_v46 = vadd.f32 %v10583_v63, %v10582_v2 }
 0x294   : > { %6626 = vst [vmem:[%s10158_s23 + $0x20] sm:$0xff] %v6566_v62   ;;  %v5164_v31 = vadd.f32 %v7221_v61, %v4410_v24  ;;  %v5848_v34 = vadd.f32 %v5847_v25, %v5657_v32  ;;  %v5659_v12 = vadd.f32 %v5568_v8, %v5161_v44  ;;  %v4414_v8 = vadd.f32 %v10082_v42, %v4027_v18  ;;  %v10581_v42 = vld [vmem:[#allocation31_spill] sm:$0xff]  ;;  %v10585_v61 = vld [vmem:[#allocation34_spill] sm:$0xff] }
 0x295   : > { %v5917_v55 = vadd.f32 %v5916_v4, %v5886_v28  ;;  %v5073_v3 = vpop.f32.mrf.mxu1  ;;  %v7273_v54 = vpop.f32.mrf.mxu0  ;;  %v4028_v26 = vadd.f32 %v10581_v42, %v10580_v7  ;;  %v5891_v51 = vmul.f32 %v5661_v37, %v5661_v37  ;;  %v10584_v4 = vld [vmem:[#allocation28_spill] sm:$0xff] }
 0x296   : > { %v5662_v0 = vadd.f32 %v7269_v17, %v5164_v31  ;;  %v5162_v21 = vadd.f32 %v5073_v3, %v4408_v35  ;;  %v5849_v14 = vadd.f32 %v5848_v34, %v5658_v13  ;;  %v5889_v41 = vmul.f32 %v5659_v12, %v5659_v12  ;;  %v10586_v35 = vld [vmem:[#allocation38_spill] sm:$0xff] }
 0x297   : > { %v5918_v9 = vadd.f32 %v5917_v55, %v5887_v1  ;;  %v7224_v36 = vpop.f32.mrf.mxu1  ;;  %v5587_v38 = vpop.f32.mrf.mxu0  ;;  %v4412_v13 = vadd.f32 %v10579_v45, %v4025_v27  ;;  %v4415_v25 = vadd.f32 %v10584_v4, %v4028_v26  ;;  %v4029_v59 = vadd.f32 %v10586_v35, %v10585_v61  ;;  %v10587_v1 = vld [vmem:[#allocation29_spill] sm:$0xff]  ;;  %v10589_v27 = vld [vmem:[#allocation30_spill] sm:$0xff] }
 0x298   : > { %v6581_v57 = vpack.c.bf16 %v5662_v0, %v5661_v37  ;;  %v5660_v10 = vadd.f32 %v5571_v52, %v5162_v21  ;;  %v5850_v11 = vadd.f32 %v5849_v14, %v5659_v12  ;;  %v5167_v43 = vadd.f32 %v7224_v36, %v10089_v20 }
 0x299   : > { %v5919_v53 = vadd.f32 %v5918_v9, %v5888_v39  ;;  %v5086_v49 = vpop.f32.mrf.mxu1  ;;  %v7276_v30 = vpop.f32.mrf.mxu0  ;;  %v5892_v22 = vmul.f32 %v5662_v0, %v5662_v0 }
 0x29a   : > { %6629 = vst [vmem:[%s10158_s23 + $0x38] sm:$0xff] %v6581_v57   ;;  %v6576_v19 = vpack.c.bf16 %v5660_v10, %v5659_v12  ;;  %v5890_v5 = vmul.f32 %v5660_v10, %v5660_v10  ;;  %v5165_v47 = vadd.f32 %v5086_v49, %v4411_v56  ;;  %v5851_v17 = vadd.f32 %v5850_v11, %v5660_v10  ;;  %v10590_v57 = vld [vmem:[#allocation36_spill] sm:$0xff]  ;;  %v10591_v10 = vld [vmem:[#allocation39_spill] sm:$0xff]  ;;  %v10592_v11 = vld [vmem:[#allocation37_spill] sm:$0xff] }
 0x29b   : > { %v5920_v16 = vadd.f32 %v5919_v53, %v5889_v41  ;;  %v7225_v32 = vpop.f32.mrf.mxu1  ;;  %v5600_v50 = vpop.f32.mrf.mxu0  ;;  %v5665_v6 = vadd.f32 %v7272_v33, %v5167_v43  ;;  %v10593_v41 = vld [vmem:[#allocation18_spill] sm:$0xff] }
 0x29c   : > { %6628 = vst [vmem:[%s10158_s23 + $0x30] sm:$0xff] %v6576_v19   ;;  %v5168_v52 = vadd.f32 %v7225_v32, %v4414_v8  ;;  %v5852_v60 = vadd.f32 %v5851_v17, %v5661_v37  ;;  %v5663_v23 = vadd.f32 %v5584_v29, %v5165_v47  ;;  %v4418_v29 = vadd.f32 %v10587_v1, %v4031_v46  ;;  %v10594_v46 = vld [vmem:[#allocation35_spill] sm:$0xff] }
 0x29d   : > { %v5921_v15 = vadd.f32 %v5920_v16, %v5890_v5  ;;  %v5089_v20 = vpop.f32.mrf.mxu1  ;;  %v7277_v24 = vpop.f32.mrf.mxu0  ;;  %v4032_v8 = vadd.f32 %v10591_v10, %v10590_v57  ;;  %v4035_v53 = vadd.f32 %v10593_v41, %v10592_v11  ;;  %v5895_v19 = vmul.f32 %v5665_v6, %v5665_v6  ;;  %v10601_v1 = vld [vmem:[#allocation43_spill] sm:$0xff]  ;;  %v10604_v11 = vld [vmem:[#allocation26_spill] sm:$0xff] }
 0x29e   : > { %v5666_v58 = vadd.f32 %v7273_v54, %v5168_v52  ;;  %v5166_v40 = vadd.f32 %v5089_v20, %v4412_v13  ;;  %v5853_v28 = vadd.f32 %v5852_v60, %v5662_v0  ;;  %v5893_v55 = vmul.f32 %v5663_v23, %v5663_v23  ;;  %v10588_v0 = vld [vmem:[#allocation32_spill] sm:$0xff] }
 0x29f   : > { %v5922_v62 = vadd.f32 %v5921_v15, %v5891_v51  ;;  %v7228_v48 = vpop.f32.mrf.mxu1  ;;  %v5603_v44 = vpop.f32.mrf.mxu0  ;;  %v4419_v52 = vadd.f32 %v10594_v46, %v4032_v8  ;;  %v10595_v51 = vld [vmem:[#allocation25_spill] sm:$0xff]  ;;  %v10596_v60 = vld [vmem:[#allocation40_spill] sm:$0xff] }
 0x2a0   : > { %v6591_v18 = vpack.c.bf16 %v5666_v58, %v5665_v6  ;;  %v5664_v31 = vadd.f32 %v5587_v38, %v5166_v40  ;;  %v5854_v34 = vadd.f32 %v5853_v28, %v5663_v23  ;;  %v5171_v21 = vadd.f32 %v7228_v48, %v10588_v0 }
 0x2a1   : > { %v5923_v33 = vadd.f32 %v5922_v62, %v5892_v22  ;;  %v5102_v12 = vpop.f32.mrf.mxu1  ;;  %v7280_v3 = vpop.f32.mrf.mxu0  ;;  %v4416_v38 = vadd.f32 %v10589_v27, %v4029_v59  ;;  %v5896_v7 = vmul.f32 %v5666_v58, %v5666_v58  ;;  %v4033_v15 = vadd.f32 %v10596_v60, %v10595_v51 }
 0x2a2   : > { %6631 = vst [vmem:[%s10158_s23 + $0x48] sm:$0xff] %v6591_v18   ;;  %v6586_v54 = vpack.c.bf16 %v5664_v31, %v5663_v23  ;;  %v5894_v37 = vmul.f32 %v5664_v31, %v5664_v31  ;;  %v5169_v39 = vadd.f32 %v5102_v12, %v4415_v25  ;;  %v5855_v14 = vadd.f32 %v5854_v34, %v5664_v31  ;;  %v10599_v18 = vld [vmem:[#allocation17_spill] sm:$0xff]  ;;  %v10602_v34 = vld [vmem:[#allocation24_spill] sm:$0xff] }
 0x2a3   : > { %v5924_v9 = vadd.f32 %v5923_v33, %v5893_v55  ;;  %v7229_v36 = vpop.f32.mrf.mxu1  ;;  %v5616_v56 = vpop.f32.mrf.mxu0  ;;  %v5669_v32 = vadd.f32 %v7276_v30, %v5171_v21  ;;  %v4420_v31 = vadd.f32 %v10599_v18, %v4033_v15  ;;  %v10603_v55 = vld [vmem:[#allocation45_spill] sm:$0xff] }
 0x2a4   : > { %6630 = vst [vmem:[%s10158_s23 + $0x40] sm:$0xff] %v6586_v54   ;;  %v5172_v49 = vadd.f32 %v7229_v36, %v4418_v29  ;;  %v5856_v5 = vadd.f32 %v5855_v14, %v5665_v6  ;;  %v5667_v47 = vadd.f32 %v5600_v50, %v5169_v39  ;;  %v10597_v6 = vld [vmem:[#allocation23_spill] sm:$0xff]  ;;  %v4039_v33 = vadd.f32 %v10603_v55, %v10602_v34 }
 0x2a5   : > { %v5925_v43 = vadd.f32 %v5924_v9, %v5894_v37  ;;  %v5105_v16 = vpop.f32.mrf.mxu1  ;;  %v7281_v17 = vpop.f32.mrf.mxu0  ;;  %v4422_v50 = vadd.f32 %v10597_v6, %v4035_v53  ;;  %v5899_v54 = vmul.f32 %v5669_v32, %v5669_v32  ;;  %v10605_v53 = vld [vmem:[#allocation21_spill] sm:$0xff] }
 0x2a6   : > { %v5670_v45 = vadd.f32 %v7277_v24, %v5172_v49  ;;  %v5170_v13 = vadd.f32 %v5105_v16, %v4416_v38  ;;  %v5857_v26 = vadd.f32 %v5856_v5, %v5666_v58  ;;  %v5897_v30 = vmul.f32 %v5667_v47, %v5667_v47  ;;  %v10598_v58 = vld [vmem:[#allocation16_spill] sm:$0xff]  ;;  %v10606_v49 = vld [vmem:[#allocation46_spill] sm:$0xff] }
 0x2a7   : > { %v5926_v42 = vadd.f32 %v5925_v43, %v5895_v19  ;;  %v7232_v2 = vpop.f32.mrf.mxu1  ;;  %v5619_v63 = vpop.f32.mrf.mxu0  ;;  %v4037_v19 = vadd.f32 %v10606_v49, %v10605_v53 }
 0x2a8   : > { %v6601_v23 = vpack.c.bf16 %v5670_v45, %v5669_v32  ;;  %v5668_v20 = vadd.f32 %v5603_v44, %v5170_v13  ;;  %v5858_v40 = vadd.f32 %v5857_v26, %v5667_v47  ;;  %v5175_v48 = vadd.f32 %v7232_v2, %v10598_v58  ;;  %v10600_v44 = vld [vmem:[#allocation27_spill] sm:$0xff] }
 0x2a9   : > { %v5927_v24 = vadd.f32 %v5926_v42, %v5896_v7  ;;  %v5118_v22 = vpop.f32.mrf.mxu1  ;;  %v7284_v59 = vpop.f32.mrf.mxu0  ;;  %v4036_v29 = vadd.f32 %v10601_v1, %v10600_v44  ;;  %v5900_v27 = vmul.f32 %v5670_v45, %v5670_v45 }
 0x2aa   : > { %6633 = vst [vmem:[%s10158_s23 + $0x58] sm:$0xff] %v6601_v23   ;;  %v6596_v62 = vpack.c.bf16 %v5668_v20, %v5667_v47  ;;  %v5898_v28 = vmul.f32 %v5668_v20, %v5668_v20  ;;  %v5173_v4 = vadd.f32 %v5118_v22, %v4419_v52  ;;  %v5859_v61 = vadd.f32 %v5858_v40, %v5668_v20  ;;  %v10607_v47 = vld [vmem:[#allocation41_spill] sm:$0xff] }
 0x2ab   : > { %v5928_v25 = vadd.f32 %v5927_v24, %v5897_v30  ;;  %v7233_v35 = vpop.f32.mrf.mxu1  ;;  %v5673_v9 = vadd.f32 %v7280_v3, %v5175_v48  ;;  %v5632_v8 = vpop.f32.mrf.mxu0  ;;  %v4423_v41 = vadd.f32 %v10604_v11, %v4036_v29 }
 0x2ac   : > { %6632 = vst [vmem:[%s10158_s23 + $0x50] sm:$0xff] %v6596_v62   ;;  %v5176_v12 = vadd.f32 %v7233_v35, %v4422_v50  ;;  %v5860_v37 = vadd.f32 %v5859_v61, %v5669_v32  ;;  %v5671_v21 = vadd.f32 %v5616_v56, %v5173_v4  ;;  %v4426_v56 = vadd.f32 %v10607_v47, %v4039_v33 }
 0x2ad   : > { %v5929_v0 = vadd.f32 %v5928_v25, %v5898_v28  ;;  %v5121_v39 = vpop.f32.mrf.mxu1  ;;  %v7285_v51 = vpop.f32.mrf.mxu0  ;;  %v5903_v23 = vmul.f32 %v5673_v9, %v5673_v9 }
 0x2ae   : > { %v5674_v14 = vadd.f32 %v7281_v17, %v5176_v12  ;;  %v5174_v36 = vadd.f32 %v5121_v39, %v4420_v31  ;;  %v5861_v57 = vadd.f32 %v5860_v37, %v5670_v45  ;;  %v5901_v3 = vmul.f32 %v5671_v21, %v5671_v21  ;;  %v10608_v45 = vld [vmem:[#allocation44_spill] sm:$0xff] }
 0x2af   : > { %v5930_v38 = vadd.f32 %v5929_v0, %v5899_v54  ;;  %v7236_v10 = vpop.f32.mrf.mxu1  ;;  %v5635_v48 = vpop.f32.mrf.mxu0 }
 0x2b0   : > { %v6611_v5 = vpack.c.bf16 %v5674_v14, %v5673_v9  ;;  %v5672_v43 = vadd.f32 %v5619_v63, %v5174_v36  ;;  %v5862_v16 = vadd.f32 %v5861_v57, %v5671_v21  ;;  %v5179_v42 = vadd.f32 %v7236_v10, %v10608_v45  ;;  %v10609_v63 = vld [vmem:[#allocation42_spill] sm:$0xff] }
 0x2b1   : > { %v5931_v17 = vadd.f32 %v5930_v38, %v5900_v27  ;;  %v5134_v32 = vpop.f32.mrf.mxu1  ;;  %v4424_v60 = vadd.f32 %v10609_v63, %v4037_v19  ;;  %v5904_v62 = vmul.f32 %v5674_v14, %v5674_v14 }
 0x2b2   : > { %6635 = vst [vmem:[%s10158_s23 + $0x68] sm:$0xff] %v6611_v5   ;;  %v6606_v13 = vpack.c.bf16 %v5672_v43, %v5671_v21  ;;  %v5902_v7 = vmul.f32 %v5672_v43, %v5672_v43  ;;  %v5177_v26 = vadd.f32 %v5134_v32, %v4423_v41  ;;  %v5863_v46 = vadd.f32 %v5862_v16, %v5672_v43 }
 0x2b3   : > { %v5932_v2 = vadd.f32 %v5931_v17, %v5901_v3  ;;  %v7237_v52 = vpop.f32.mrf.mxu1  ;;  %v5677_v30 = vadd.f32 %v7284_v59, %v5179_v42 }
 0x2b4   : > { %6634 = vst [vmem:[%s10158_s23 + $0x60] sm:$0xff] %v6606_v13   ;;  %v5180_v15 = vadd.f32 %v7237_v52, %v4426_v56  ;;  %v5864_v20 = vadd.f32 %v5863_v46, %v5673_v9  ;;  %v5675_v50 = vadd.f32 %v5632_v8, %v5177_v26 }
 0x2b5   : > { %v5933_v6 = vadd.f32 %v5932_v2, %v5902_v7  ;;  %v5137_v40 = vpop.f32.mrf.mxu1  ;;  %v5907_v29 = vmul.f32 %v5677_v30, %v5677_v30 }
 0x2b6   : > { %v5678_v24 = vadd.f32 %v7285_v51, %v5180_v15  ;;  %v5178_v22 = vadd.f32 %v5137_v40, %v4424_v60  ;;  %v5865_v58 = vadd.f32 %v5864_v20, %v5674_v14  ;;  %v5905_v35 = vmul.f32 %v5675_v50, %v5675_v50 }
 0x2b7   : > { %v5934_v28 = vadd.f32 %v5933_v6, %v5903_v23 }
 0x2b8   : > { %v6621_v4 = vpack.c.bf16 %v5678_v24, %v5677_v30  ;;  %v5676_v25 = vadd.f32 %v5635_v48, %v5178_v22  ;;  %v5866_v61 = vadd.f32 %v5865_v58, %v5675_v50 }
 0x2b9   : > { %v5935_v18 = vadd.f32 %v5934_v28, %v5904_v62 }
 0x2ba   : > { %6637 = vst [vmem:[%s10158_s23 + $0x78] sm:$0xff] %v6621_v4   ;;  %v6616_v59 = vpack.c.bf16 %v5676_v25, %v5675_v50  ;;  %v5906_v31 = vmul.f32 %v5676_v25, %v5676_v25  ;;  %v5867_v1 = vadd.f32 %v5866_v61, %v5676_v25 }
 0x2bb   : > { %v5936_v44 = vadd.f32 %v5935_v18, %v5905_v35 }
 0x2bc   : > { %6636 = vst [vmem:[%s10158_s23 + $0x70] sm:$0xff] %v6616_v59   ;;  %v5868_v34 = vadd.f32 %v5867_v1, %v5677_v30 }
 0x2bd   : > { %v5937_v55 = vadd.f32 %v5936_v44, %v5906_v31 }
 0x2be   : > { %7591 = shalt.err (!%p7588_p0)
}
 0x2bf   : > { %s7592_s8 = scalar_lea.hbm %s10240_s11, 2048  ;;  %s7596_s21 = scalar_lea.hbm %s10357_s2, 4096 }
 0x2c0   : > { %p7593_p5 = scmp.ne.s32.totalorder %s10240_s11, %s7592_s8  ;;  %p7597_p4 = scmp.lt.s32.totalorder %s10240_s11, %s10357_s2 }
 0x2c1   : > { %p7598_p6 = scmp.lt.s32.totalorder %s7596_s21, %s7592_s8 }
 0x2c2   : > { %p7594_p9 = pnand %p7593_p5, %p10610_p11 }
 0x2c3   : > { %p7599_p8 = por %p7598_p6, %p7597_p4 }
 0x2c4   : > { %p7595_p1 = pneg %p7594_p9 }
 0x2c6   : > { %p7600_p3 = pnand %p7599_p8, %p7595_p1 }
 0x2c8   : > { %7603 = shalt.err (!%p7600_p3)
}
 0x2c9   : > { %s7712_s29 = smov 64   ;;  %s7713_s30 = smov 4   ;;  %v5908_v33 = vmul.f32 %v5678_v24, %v5678_v24  ;;  %v5869_v12 = vadd.f32 %v5868_v34, %v5678_v24  ;;  %v5938_v54 = vadd.f32 %v5937_v55, %v5907_v29 }
 0x2ca   : > { %7308 = dma.vmem_to_hbm [thread:$0]  (%p10610_p11), %s10242_s28, 2048, %s10240_s11, %s5948_s14, %s7712_s29, %s7712_s29, %s7713_s30  }
 0x2cb   : > { %v5870_v37 = vrot.slane %v5869_v12, 4  ;;  %v5939_v0 = vadd.f32 %v5938_v54, %v5908_v33  ;;  %s5952_s24 = sand.u32 1, %s7762_s19   ;;  %s6473_s25 = sshll.u32 %s7762_s19, 4 }
 0x2cc   : > { %s240_s5 = scalar_lea.vmem [#allocation9], %s7859_s7  ;;  %s246_s28 = scalar_lea.vmem [#allocation11], %s7859_s7 }
 0x2cd   : > { %v5871_v21 = vadd.f32 %v5870_v37, %v5869_v12  ;;  %v5940_v39 = vrot.slane %v5939_v0, 4  ;;  %s5985_s6 = sshll.u32 %s240_s5, 4  ;;  %s5998_s11 = sshll.u32 %s246_s28, 4  ;;  %s10280_s6 = int_to_ptr.vmem [resolvable:$true] %s5985_s6  ;;  %s10287_s11 = int_to_ptr.vmem [resolvable:$true] %s5998_s11 }
 0x2ce   : > { %s10278_s12 = scalar_lea.hbm %s10358_s3, %s6473_s25  ;;  %s10285_s21 = scalar_lea.hbm %s10359_s4, %s6473_s25 }
 0x2cf   : > { %v5872_v9 = vrot.slane %v5871_v21, 2  ;;  %v5941_v14 = vadd.f32 %v5940_v39, %v5939_v0  ;;  %s10289_s23 = scalar_lea.sflag [#allocation10], %s5952_s24  ;;  %s7604_s26 = scalar_lea.vmem %s10280_s6, 16 }
 0x2d0   : > { %p7605_p7 = scmp.ne.s32.totalorder %s10280_s6, %s7604_s26  ;;  %s7714_s29 = smov [#allocation9]  }
 0x2d1   : > { %v5942_v36 = vrot.slane %v5941_v14, 2  ;;  %v5873_v27 = vadd.f32 %v5872_v9, %v5871_v21  ;;  %s7608_s30 = sshll.u32 %s7714_s29, 4  ;;  %s7609_s30 = int_to_ptr.vmem [resolvable:$false] %s7608_s30 }
 0x2d2   : > { %p7606_p12 = pnand %p7605_p7, %p10610_p11  ;;  %s7610_s14 = scalar_lea.vmem %s7609_s30, 32 }
 0x2d3   : > { %v5874_v38 = vrot.slane %v5873_v27, 1  ;;  %v5943_v57 = vadd.f32 %v5942_v36, %v5941_v14  ;;  %p7611_p2 = scmp.lt.s32.totalorder %s10280_s6, %s7609_s30  ;;  %p7612_p13 = scmp.lt.s32.totalorder %s7610_s14, %s7604_s26 }
 0x2d4   : > { %p7607_p10 = pneg %p7606_p12 }
 0x2d5   : > { %v5875_v10 = vadd.f32 %v5874_v38, %v5873_v27  ;;  %v5944_v8 = vrot.slane %v5943_v57, 1  ;;  %p7613_p0 = por %p7612_p13, %p7611_p2 }
 0x2d7   : > { %5876 = vst [vmem:[%s240_s5] sm:$0x1] %v5875_v10  ;;  %v5945_v11 = vadd.f32 %v5944_v8, %v5943_v57  ;;  %p7614_p5 = pnand %p7613_p0, %p7607_p10 }
 0x2d9   : > { %7617 = shalt.err (!%p7614_p5)
}
 0x2da   : > { %s7618_s24 = scalar_lea.hbm %s10278_s12, 16  ;;  %s7622_s8 = scalar_lea.hbm %s10358_s3, 32 }
 0x2db   : > { %p7619_p9 = scmp.ne.s32.totalorder %s10278_s12, %s7618_s24  ;;  %p7623_p6 = scmp.lt.s32.totalorder %s10278_s12, %s10358_s3 }
 0x2dc   : > { %p7624_p8 = scmp.lt.s32.totalorder %s7622_s8, %s7618_s24 }
 0x2dd   : > { %p7620_p1 = pnand %p7619_p9, %p10610_p11 }
 0x2de   : > { %p7625_p3 = por %p7624_p8, %p7623_p6 }
 0x2df   : > { %p7621_p4 = pneg %p7620_p1 }
 0x2e1   : > { %p7626_p7 = pnand %p7625_p3, %p7621_p4 }
 0x2e3   : > { %7629 = shalt.err (!%p7626_p7)
}
 0x2e4   : > { %7309 = dma.vmem_to_hbm [thread:$0]  (%p10610_p11), %s10280_s6, 16, %s10278_s12, %s10289_s23   ;;  %5946 = vst [vmem:[%s246_s28] sm:$0x1] %v5945_v11 }
 0x2e5   : > { %s7630_s26 = scalar_lea.vmem %s10287_s11, 16  ;;  %s7715_s29 = smov [#allocation11]  }
 0x2e6   : > { %p7631_p12 = scmp.ne.s32.totalorder %s10287_s11, %s7630_s26  ;;  %s7634_s30 = sshll.u32 %s7715_s29, 4  ;;  %s7635_s30 = int_to_ptr.vmem [resolvable:$false] %s7634_s30 }
 0x2e7   : > { %s7636_s14 = scalar_lea.vmem %s7635_s30, 32  ;;  %p7637_p13 = scmp.lt.s32.totalorder %s10287_s11, %s7635_s30 }
 0x2e8   : > { %p7632_p10 = pnand %p7631_p12, %p10610_p11  ;;  %p7638_p0 = scmp.lt.s32.totalorder %s7636_s14, %s7630_s26 }
 0x2ea   : > { %p7633_p2 = pneg %p7632_p10  ;;  %p7639_p5 = por %p7638_p0, %p7637_p13 }
 0x2ec   : > { %p7640_p9 = pnand %p7639_p5, %p7633_p2 }
 0x2ee   : > { %7643 = shalt.err (!%p7640_p9)
}
 0x2ef   : > { %s7644_s7 = scalar_lea.hbm %s10285_s21, 16  ;;  %s7648_s12 = scalar_lea.hbm %s10359_s4, 32 }
 0x2f0   : > { %p7645_p1 = scmp.ne.s32.totalorder %s10285_s21, %s7644_s7  ;;  %p7649_p8 = scmp.lt.s32.totalorder %s10285_s21, %s10359_s4 }
 0x2f1   : > { %p7650_p3 = scmp.lt.s32.totalorder %s7648_s12, %s7644_s7 }
 0x2f2   : > { %p7646_p4 = pnand %p7645_p1, %p10610_p11 }
 0x2f3   : > { %p7651_p7 = por %p7650_p3, %p7649_p8 }
 0x2f4   : > { %p7647_p6 = pneg %p7646_p4 }
 0x2f6   : > { %p7652_p12 = pnand %p7651_p7, %p7647_p6 }
 0x2f8   : > { %7655 = shalt.err (!%p7652_p12)
}
 0x2f9   : > { %7310 = dma.vmem_to_hbm [thread:$0]  (%p10610_p11), %s10287_s11, 16, %s10285_s21, %s10289_s23  }
 0x2fa PF: > { %s6010_s5 = sand.u32 1, %s7690_s15   ;;  %p10611_p10 = scmp.ne.s32.totalorder %s10384_s22, 0 }
 0x2fb   : > { %p10612_p2 = scmp.ge.s32.totalorder %s7702_s18, 2  ;;  %s6011_s8 = scalar_lea.sflag [#allocation5], %s6010_s5 }
 0x2fd   : > { %p7323_p13 = pnand %p10612_p2, %p10611_p10 }
 0x2ff   : > { %p7324_p0 = pneg %p7323_p13 }
 0x301   : > { %7681 = dma.done.wait (%p7324_p0), %s6011_s8, 2048  }
 0x302   : > { %7683 = vsyncadd (%p7324_p0), %s6011_s8, 4294965248  ;;  %s6019_s19 = sand.u32 1, %s6131_s20  }
 0x303   : > { %s6020_s10 = scalar_lea.sflag [#allocation10], %s6019_s19 }
 0x304   : > { %7685 = dma.done.wait (%p7324_p0), %s6020_s10, 32  }
 0x305   : > { %7687 = vsyncadd (%p7324_p0), %s6020_s10, 4294967264  ;;  %p22_p11 = scmp.ge.s32.totalorder %s7797_s27, 4   ;;  %s10613_s15 = smov %s7694_s16 }
 0x306   : > { %s10614_s16 = smov %s7698_s17  ;;  %s10615_s17 = smov %s7814_s9 }
 0x307   : > { %s10616_s18 = smov %s7797_s27  ;;  %24 = sbr.rel (!%p22_p11) target bundleno = 8 (0x8), region = 119 }
 0x30c   :  { %6032 = vsyncpa [#allocation4], 1 }
 0x30d   :  { %6034 = vsyncpa [#allocation4 + $0x1], 1 }
 0x30e   :  { %6035 = vsyncpa [#allocation7], 1 }
 0x30f   :  { %6036 = vsyncpa [#allocation5], 1 }
 0x310   :  { %6038 = vsyncpa [#allocation5 + $0x1], 1 }
 0x311   :  { %6039 = vsyncpa [#allocation10], 1 }
 0x312   :  { %6041 = vsyncpa [#allocation10 + $0x1], 1 }

</bundles_post_ra>
